<compile_context>
chip_gen: v5e
topology: v5e:2x2
jax: 0.10.0
libtpu: 0.0.40
codegen_flags: <defaults>
</compile_context>

<pallas_src>
import functools

import jax
import jax.numpy as jnp
from jax.experimental import pallas as pl
from jax.experimental.pallas import tpu as pltpu

NUM_CLASSES = 313
_KEY_PACK = 512  # next power of two >= NUM_CLASSES; class id lives in the low 9 key bits


def _rebalance_loss_kernel(preds_ref, targets_ref, cab_ref, ccl2_ref, w_ref,
                           mean_ref, std_ref, labels_ref, partial_ref):
    # ---- un-standardize ab targets -> truncated integer grid coordinates ----
    t = targets_ref[0].astype(jnp.float32)                              # (2, T)
    ab = jnp.clip(t * std_ref[...] + mean_ref[...], 0.0, 1.0) * 255.0 - 128.0
    # float->int32 truncates toward zero, matching torch .long(); back to f32 for the MXU
    coord = ab.astype(jnp.int32).astype(jnp.float32)                    # (2, T) integer-valued

    # ---- distance to the 313 cluster centers on the (otherwise idle) MXU ----
    # d = ||cc||^2 - 2*cc.(a,b); the per-pixel ||(a,b)||^2 constant is dropped (argmin-invariant).
    # Centers and coords are small integers (exact in bf16/f32), so the result is exact.
    d = jnp.dot(cab_ref[...], coord, preferred_element_type=jnp.float32) + ccl2_ref[...]
    d_i = d.astype(jnp.int32)                                           # (C, T) exact int distances

    # ---- single-pass packed-key argmin == lut[a*256+b] with first-min tie-break ----
    cls_iota = jax.lax.broadcasted_iota(jnp.int32, d_i.shape, 0)        # (C, T)
    key = d_i * _KEY_PACK + cls_iota                                    # lexicographic (d, class)
    key_min = jnp.min(key, axis=0, keepdims=True)                       # (1, T)
    labels_ref[0] = jnp.bitwise_and(key_min, _KEY_PACK - 1)             # (1, T) int32 labels
    mask = key == key_min                                               # (C, T), one True per column

    # ---- weighted cross-entropy over the class (sublane) axis ----
    logits = preds_ref[0].astype(jnp.float32)                           # (C, T), cast in-VMEM
    logit_y = jnp.sum(jnp.where(mask, logits, 0.0), axis=0, keepdims=True)    # (1, T)
    w_y = jnp.sum(jnp.where(mask, w_ref[...], 0.0), axis=0, keepdims=True)    # (1, T)
    m = jnp.max(logits, axis=0, keepdims=True)                          # (1, T)
    lse = m + jnp.log(jnp.sum(jnp.exp(logits - m), axis=0, keepdims=True))

    # ---- per-tile partial sums, emitted as a lane-dense (2, 128) block (payload in lane 0) ----
    wnll_s = jnp.sum(w_y * (lse - logit_y), axis=1, keepdims=True)      # (1, 1)
    wsum_s = jnp.sum(w_y, axis=1, keepdims=True)                        # (1, 1)
    lane0 = jax.lax.broadcasted_iota(jnp.int32, (1, 128), 1) == 0
    partial_ref[0, 0:1, :] = jnp.where(lane0, wnll_s, 0.0)
    partial_ref[0, 1:2, :] = jnp.where(lane0, wsum_s, 0.0)


@functools.partial(jax.jit, static_argnames=("tile_pixels",))
def rebalance_loss(preds, targets, cluster_centers, class_weights, ab_mean, ab_std, *,
                   tile_pixels=4096):
    """Returns (loss, labels) matching RebalanceLoss.forward.

    preds:           (B, 313, H, W) logits, native dtype (f32 or bf16), NCHW -- no transpose/upcast
    targets:         (B, 2, H, W)   normalized ab
    cluster_centers: (313, 2) integer-valued ab cluster centers (pts_in_hull); the module's LUT is
                     the integer-grid argmin over these centers, so the in-kernel exact-int argmin
                     reproduces lut[a*256+b] bit-exactly.
    class_weights:   (313,) float32;  ab_mean, ab_std: (2,) float32
    tile_pixels:     pixels per grid step; 4096 fits 48 MiB scoped VMEM on v5e/v6e/v7x.
                     Sweep 2048-8192 per chip (v5e may prefer 2048 at default scoped limits).
    """
    B, C, H, W = preds.shape
    assert C == NUM_CLASSES, "Input channels must be 313 for the classifier"
    # TODO(synk): the original asserts preds.shape == targets.shape, which is unsatisfiable with
    # 2-channel ab mean/std; targets must be (B, 2, H, W) for the forward to run.
    assert targets.shape == (B, 2, H, W)
    HW = H * W
    T = min(tile_pixels, HW)
    # keep the grid >= 2 steps so both v7x TensorCores get work
    if B * (HW // T) < 2 and HW % 256 == 0:
        T = HW // 2
    assert HW % T == 0, "H*W must be divisible by the pixel tile"
    assert T % 128 == 0 or T == HW, "pixel tile must be lane-aligned (multiple of 128)"
    G = HW // T

    preds3 = preds.reshape(B, C, HW)                       # free reshape: no transpose, no upcast
    targets3 = targets.reshape(B, 2, HW)
    cc = cluster_centers.astype(jnp.float32)               # (313, 2) integer-valued
    cab = -2.0 * cc                                        # (313, 2): [-2*a_c, -2*b_c]
    ccl2 = jnp.sum(cc * cc, axis=1, keepdims=True)         # (313, 1)
    w_col = class_weights.reshape(C, 1).astype(jnp.float32)
    mean_col = ab_mean.reshape(2, 1).astype(jnp.float32)
    std_col = ab_std.reshape(2, 1).astype(jnp.float32)

    labels3, partials = pl.pallas_call(
        _rebalance_loss_kernel,
        out_shape=(
            jax.ShapeDtypeStruct((B, 1, HW), jnp.int32),        # per-pixel labels, lane-dense
            jax.ShapeDtypeStruct((B, 2, G * 128), jnp.float32),  # per-tile [w*nll, w] partial sums
        ),
        grid_spec=pltpu.PrefetchScalarGridSpec(
            num_scalar_prefetch=0,
            grid=(B, G),
            in_specs=[
                pl.BlockSpec((1, C, T), lambda b, j: (b, 0, j)),   # preds (class x pixels)
                pl.BlockSpec((1, 2, T), lambda b, j: (b, 0, j)),   # target ab
                pl.BlockSpec((C, 2), lambda b, j: (0, 0)),         # -2 * cc       (resident)
                pl.BlockSpec((C, 1), lambda b, j: (0, 0)),         # ||cc||^2      (resident)
                pl.BlockSpec((C, 1), lambda b, j: (0, 0)),         # class weights (resident)
                pl.BlockSpec((2, 1), lambda b, j: (0, 0)),         # ab mean
                pl.BlockSpec((2, 1), lambda b, j: (0, 0)),         # ab std
            ],
            out_specs=(
                pl.BlockSpec((1, 1, T), lambda b, j: (b, 0, j)),
                pl.BlockSpec((1, 2, 128), lambda b, j: (b, 0, j)),
            ),
        ),
        compiler_params=pltpu.CompilerParams(
            dimension_semantics=("parallel", "parallel"),
            vmem_limit_bytes=48 * 1024 * 1024),
    )(preds3, targets3, cab, ccl2, w_col, mean_col, std_col)

    # final weighted mean reduced in the wrapper (tiny partials array, keeps grid fully parallel)
    loss = jnp.sum(partials[:, 0, :]) / jnp.sum(partials[:, 1, :])
    labels = labels3.reshape(B, H, W)
    return loss, labels


# ------------------------- deterministic parameter setup (plain JAX glue) -------------------------

def build_lut(cluster_centers):
    """Replicates: argmin over squared distances from the 256x256 ab grid to cluster centers."""
    grid_a, grid_b = jnp.meshgrid(jnp.arange(256), jnp.arange(256), indexing="ij")
    coords = jnp.stack([grid_a, grid_b], axis=-1).astype(jnp.float32).reshape(-1, 2) - 128.0
    cc_l2 = jnp.sum(cluster_centers ** 2, axis=1)
    dists = (jnp.sum(coords ** 2, axis=1, keepdims=True)
             + cc_l2[None, :]
             - 2.0 * coords @ cluster_centers.T)
    return jnp.argmin(dists, axis=1).astype(jnp.int32)


def make_rebalancing_weights(priors, alpha=0.5):
    C = priors.shape[0]
    uniform = jnp.full_like(priors, 1.0 / C)
    smoothed = (1.0 - alpha) * uniform + alpha * priors
    weights = 1.0 / smoothed
    return weights / jnp.mean(weights)


def reference_forward(preds, targets, lut, class_weights, ab_mean, ab_std):
    """Pure-JAX reference of RebalanceLoss.forward (LUT-based) for verification."""
    B, C, H, W = preds.shape
    ab = jnp.clip(targets * ab_std.reshape(1, 2, 1, 1) + ab_mean.reshape(1, 2, 1, 1),
                  0.0, 1.0) * 255.0 - 128.0
    a = ab[:, 0].astype(jnp.int32) + 128
    b = ab[:, 1].astype(jnp.int32) + 128
    labels = lut[a * 256 + b]                                   # (B, H, W)
    logits = jnp.transpose(preds, (0, 2, 3, 1)).reshape(-1, C).astype(jnp.float32)
    lab = labels.reshape(-1)
    logp = jax.nn.log_softmax(logits, axis=-1)
    nll = -jnp.take_along_axis(logp, lab[:, None], axis=1)[:, 0]
    w = class_weights[lab]
    loss = jnp.sum(w * nll) / jnp.sum(w)
    return loss, labels


if __name__ == "__main__":
    key = jax.random.PRNGKey(0)
    k_cc, k_prior, k_pred, k_tgt = jax.random.split(key, 4)

    # deterministic "buffers": 313 distinct integer-grid ab cluster centers (multiples of 10 in
    # [-110, 110]), mimicking pts_in_hull.npy, plus synthetic data statistics / priors.
    idx = jax.random.choice(k_cc, 23 * 23, shape=(NUM_CLASSES,), replace=False)
    cluster_centers = jnp.stack(
        [(idx // 23).astype(jnp.float32) * 10.0 - 110.0,
         (idx % 23).astype(jnp.float32) * 10.0 - 110.0], axis=1)          # (313, 2) integer-valued
    lut = build_lut(cluster_centers)                                      # (65536,) int32
    prior_raw = jax.random.uniform(k_prior, (NUM_CLASSES,), dtype=jnp.float32) + 0.1
    prior = prior_raw / jnp.sum(prior_raw)
    class_weights = make_rebalancing_weights(prior, alpha=0.5)            # (313,)
    ab_mean = jnp.array([0.50, 0.48], dtype=jnp.float32)
    ab_std = jnp.array([0.28, 0.26], dtype=jnp.float32)

    # small example inputs: B=2, 313 logit channels, 16x16 spatial, 2-channel ab targets
    B, H, W = 2, 16, 16
    preds = jax.random.normal(k_pred, (B, NUM_CLASSES, H, W), dtype=jnp.float32)
    targets = jax.random.normal(k_tgt, (B, 2, H, W), dtype=jnp.float32)

    loss, labels = rebalance_loss(preds, targets, cluster_centers, class_weights,
                                  ab_mean, ab_std)
    jax.block_until_ready((loss, labels))

    # lightweight correctness check against the pure-JAX LUT-based reference
    loss_ref, labels_ref = reference_forward(preds, targets, lut, class_weights, ab_mean, ab_std)
    mismatch = jnp.mean((labels != labels_ref).astype(jnp.float32))
    rel_err = jnp.abs(loss - loss_ref) / jnp.maximum(jnp.abs(loss_ref), 1.0)
    assert float(mismatch) < 0.01, f"label mismatch fraction {float(mismatch)}"
    assert float(rel_err) < 1e-2, f"loss rel err {float(rel_err)}"

    print("KERNEL_OK")
</pallas_src>

<mosaic_0001>
module attributes {stable_mosaic.version = 11 : i64} {
  func.func @_rebalance_loss_kernel(%arg0: i32, %arg1: i32, %arg2: memref<1x313x256xf32, #tpu.memory_space<vmem>>, %arg3: memref<1x2x256xf32, #tpu.memory_space<vmem>>, %arg4: memref<313x2xf32, #tpu.memory_space<vmem>>, %arg5: memref<313x1xf32, #tpu.memory_space<vmem>>, %arg6: memref<313x1xf32, #tpu.memory_space<vmem>>, %arg7: memref<2x1xf32, #tpu.memory_space<vmem>>, %arg8: memref<2x1xf32, #tpu.memory_space<vmem>>, %arg9: memref<1x1x256xi32, #tpu.memory_space<vmem>>, %arg10: memref<1x2x128xf32, #tpu.memory_space<vmem>>) attributes {dimension_semantics = [#tpu.dimension_semantics<parallel>, #tpu.dimension_semantics<parallel>], iteration_bounds = array<i64: 2, 1>, scalar_prefetch = 0 : i64, scratch_operands = 0 : i64, tpu.core_type = #tpu.core_type<tc>, window_params = [{transform_indices = @transform_0, window_bounds = array<i64: 1, 313, 256>}, {transform_indices = @transform_1, window_bounds = array<i64: 1, 2, 256>}, {pipeline_mode = #tpu.pipeline_mode<synchronous>, transform_indices = @transform_2, window_bounds = array<i64: 313, 2>}, {pipeline_mode = #tpu.pipeline_mode<synchronous>, transform_indices = @transform_3, window_bounds = array<i64: 313, 1>}, {pipeline_mode = #tpu.pipeline_mode<synchronous>, transform_indices = @transform_4, window_bounds = array<i64: 313, 1>}, {pipeline_mode = #tpu.pipeline_mode<synchronous>, transform_indices = @transform_5, window_bounds = array<i64: 2, 1>}, {pipeline_mode = #tpu.pipeline_mode<synchronous>, transform_indices = @transform_6, window_bounds = array<i64: 2, 1>}, {transform_indices = @transform_7, window_bounds = array<i64: 1, 1, 256>}, {transform_indices = @transform_8, window_bounds = array<i64: 1, 2, 128>}]} {
    %c0 = arith.constant 0 : index
    %c0_0 = arith.constant 0 : index
    %c0_1 = arith.constant 0 : index
    %0 = vector.load %arg3[%c0, %c0_0, %c0_1] : memref<1x2x256xf32, #tpu.memory_space<vmem>>, vector<1x2x256xf32>
    %1 = vector.shape_cast %0 : vector<1x2x256xf32> to vector<2x256xf32>
    %c0_2 = arith.constant 0 : index
    %c0_3 = arith.constant 0 : index
    %2 = vector.load %arg8[%c0_2, %c0_3] : memref<2x1xf32, #tpu.memory_space<vmem>>, vector<2x1xf32>
    %3 = vector.broadcast %2 : vector<2x1xf32> to vector<2x256xf32>
    %4 = arith.mulf %1, %3 : vector<2x256xf32>
    %c0_4 = arith.constant 0 : index
    %c0_5 = arith.constant 0 : index
    %5 = vector.load %arg7[%c0_4, %c0_5] : memref<2x1xf32, #tpu.memory_space<vmem>>, vector<2x1xf32>
    %6 = vector.broadcast %5 : vector<2x1xf32> to vector<2x256xf32>
    %7 = arith.addf %4, %6 : vector<2x256xf32>
    %cst = arith.constant 0.000000e+00 : f32
    %cst_6 = arith.constant 1.000000e+00 : f32
    %8 = vector.broadcast %cst : f32 to vector<2x256xf32>
    %9 = arith.maximumf %8, %7 : vector<2x256xf32>
    %10 = vector.broadcast %cst_6 : f32 to vector<2x256xf32>
    %11 = arith.minimumf %10, %9 : vector<2x256xf32>
    %cst_7 = arith.constant 2.550000e+02 : f32
    %12 = vector.broadcast %cst_7 : f32 to vector<2x256xf32>
    %13 = arith.mulf %11, %12 : vector<2x256xf32>
    %cst_8 = arith.constant 1.280000e+02 : f32
    %14 = vector.broadcast %cst_8 : f32 to vector<2x256xf32>
    %15 = arith.subf %13, %14 : vector<2x256xf32>
    %16 = arith.fptosi %15 : vector<2x256xf32> to vector<2x256xi32>
    %17 = arith.sitofp %16 : vector<2x256xi32> to vector<2x256xf32>
    %c0_9 = arith.constant 0 : index
    %c0_10 = arith.constant 0 : index
    %18 = vector.load %arg4[%c0_9, %c0_10] : memref<313x2xf32, #tpu.memory_space<vmem>>, vector<313x2xf32>
    %cst_11 = arith.constant dense<0.000000e+00> : vector<313x256xf32>
    %19 = tpu.matmul %18, %17, %cst_11 {dimension_numbers = #tpu.dot_dimension_numbers<[1], [0], [0], [1], [0, 0, 1, 1], [], []>} : vector<313x2xf32>, vector<2x256xf32>, vector<313x256xf32> -> vector<313x256xf32>
    %c0_12 = arith.constant 0 : index
    %c0_13 = arith.constant 0 : index
    %20 = vector.load %arg5[%c0_12, %c0_13] : memref<313x1xf32, #tpu.memory_space<vmem>>, vector<313x1xf32>
    %21 = vector.broadcast %20 : vector<313x1xf32> to vector<313x256xf32>
    %22 = arith.addf %19, %21 : vector<313x256xf32>
    %23 = arith.fptosi %22 : vector<313x256xf32> to vector<313x256xi32>
    %24 = tpu.iota {dimensions = array<i32: 0>} : vector<313x256xi32>
    %c512_i32 = arith.constant 512 : i32
    %25 = vector.broadcast %c512_i32 : i32 to vector<313x256xi32>
    %26 = arith.muli %23, %25 : vector<313x256xi32>
    %27 = arith.addi %26, %24 : vector<313x256xi32>
    %cst_14 = arith.constant dense<2147483647> : vector<256xi32>
    %28 = vector.multi_reduction <minsi>, %27, %cst_14 [0] : vector<313x256xi32> to vector<256xi32>
    %29 = vector.shape_cast %28 : vector<256xi32> to vector<1x256xi32>
    %c511_i32 = arith.constant 511 : i32
    %30 = vector.broadcast %c511_i32 : i32 to vector<1x256xi32>
    %31 = arith.andi %29, %30 : vector<1x256xi32>
    %c0_15 = arith.constant 0 : index
    %c0_16 = arith.constant 0 : index
    %c0_17 = arith.constant 0 : index
    %32 = vector.load %arg9[%c0_15, %c0_16, %c0_17] : memref<1x1x256xi32, #tpu.memory_space<vmem>>, vector<1x1x256xi32>
    %33 = vector.shape_cast %32 : vector<1x1x256xi32> to vector<1x256xi32>
    %34 = vector.shape_cast %31 : vector<1x256xi32> to vector<1x1x256xi32>
    tpu.vector_store %arg9[%c0_15, %c0_16, %c0_17], %34 {strides = array<i32>} : memref<1x1x256xi32, #tpu.memory_space<vmem>>, vector<1x1x256xi32>,
    %35 = vector.broadcast %29 : vector<1x256xi32> to vector<313x256xi32>
    %36 = arith.cmpi eq, %27, %35 : vector<313x256xi32>
    %c0_18 = arith.constant 0 : index
    %c0_19 = arith.constant 0 : index
    %c0_20 = arith.constant 0 : index
    %37 = vector.load %arg2[%c0_18, %c0_19, %c0_20] : memref<1x313x256xf32, #tpu.memory_space<vmem>>, vector<1x313x256xf32>
    %38 = vector.shape_cast %37 : vector<1x313x256xf32> to vector<313x256xf32>
    %cst_21 = arith.constant 0.000000e+00 : f32
    %39 = vector.broadcast %cst_21 : f32 to vector<313x256xf32>
    %40 = arith.select %36, %38, %39 : vector<313x256xi1>, vector<313x256xf32>
    %cst_22 = arith.constant dense<0.000000e+00> : vector<256xf32>
    %41 = vector.multi_reduction <add>, %40, %cst_22 [0] : vector<313x256xf32> to vector<256xf32>
    %42 = vector.shape_cast %41 : vector<256xf32> to vector<1x256xf32>
    %c0_23 = arith.constant 0 : index
    %c0_24 = arith.constant 0 : index
    %43 = vector.load %arg6[%c0_23, %c0_24] : memref<313x1xf32, #tpu.memory_space<vmem>>, vector<313x1xf32>
    %cst_25 = arith.constant 0.000000e+00 : f32
    %44 = vector.shape_cast %43 : vector<313x1xf32> to vector<313x1xf32>
    %45 = vector.broadcast %44 : vector<313x1xf32> to vector<313x256xf32>
    %46 = vector.broadcast %cst_25 : f32 to vector<313x256xf32>
    %47 = arith.select %36, %45, %46 : vector<313x256xi1>, vector<313x256xf32>
    %cst_26 = arith.constant dense<0.000000e+00> : vector<256xf32>
    %48 = vector.multi_reduction <add>, %47, %cst_26 [0] : vector<313x256xf32> to vector<256xf32>
    %49 = vector.shape_cast %48 : vector<256xf32> to vector<1x256xf32>
    %cst_27 = arith.constant dense<0xFF800000> : vector<256xf32>
    %50 = vector.multi_reduction <maximumf>, %38, %cst_27 [0] : vector<313x256xf32> to vector<256xf32>
    %51 = vector.shape_cast %50 : vector<256xf32> to vector<1x256xf32>
    %52 = vector.broadcast %51 : vector<1x256xf32> to vector<313x256xf32>
    %53 = arith.subf %38, %52 : vector<313x256xf32>
    %54 = math.exp %53 : vector<313x256xf32>
    %cst_28 = arith.constant dense<0.000000e+00> : vector<256xf32>
    %55 = vector.multi_reduction <add>, %54, %cst_28 [0] : vector<313x256xf32> to vector<256xf32>
    %56 = vector.shape_cast %55 : vector<256xf32> to vector<1x256xf32>
    %57 = math.log %56 : vector<1x256xf32>
    %58 = arith.addf %51, %57 : vector<1x256xf32>
    %59 = arith.subf %58, %42 : vector<1x256xf32>
    %60 = arith.mulf %49, %59 : vector<1x256xf32>
    %cst_29 = arith.constant dense<0.000000e+00> : vector<1xf32>
    %61 = vector.multi_reduction <add>, %60, %cst_29 [1] : vector<1x256xf32> to vector<1xf32>
    %62 = vector.shape_cast %61 : vector<1xf32> to vector<1x1xf32>
    %cst_30 = arith.constant dense<0.000000e+00> : vector<1xf32>
    %63 = vector.multi_reduction <add>, %49, %cst_30 [1] : vector<1x256xf32> to vector<1xf32>
    %64 = vector.shape_cast %63 : vector<1xf32> to vector<1x1xf32>
    %65 = tpu.iota {dimensions = array<i32: 1>} : vector<1x128xi32>
    %c0_i32 = arith.constant 0 : i32
    %66 = vector.broadcast %c0_i32 : i32 to vector<1x128xi32>
    %67 = arith.cmpi eq, %65, %66 : vector<1x128xi32>
    %cst_31 = arith.constant 0.000000e+00 : f32
    %68 = vector.shape_cast %62 : vector<1x1xf32> to vector<1x1xf32>
    %69 = vector.broadcast %68 : vector<1x1xf32> to vector<1x128xf32>
    %70 = vector.broadcast %cst_31 : f32 to vector<1x128xf32>
    %71 = arith.select %67, %69, %70 : vector<1x128xi1>, vector<1x128xf32>
    %c0_32 = arith.constant 0 : index
    %c0_33 = arith.constant 0 : index
    %c0_34 = arith.constant 0 : index
    %72 = vector.load %arg10[%c0_32, %c0_33, %c0_34] : memref<1x2x128xf32, #tpu.memory_space<vmem>>, vector<1x1x128xf32>
    %73 = vector.shape_cast %72 : vector<1x1x128xf32> to vector<1x128xf32>
    %74 = vector.shape_cast %71 : vector<1x128xf32> to vector<1x1x128xf32>
    tpu.vector_store %arg10[%c0_32, %c0_33, %c0_34], %74 {strides = array<i32>} : memref<1x2x128xf32, #tpu.memory_space<vmem>>, vector<1x1x128xf32>,
    %cst_35 = arith.constant 0.000000e+00 : f32
    %75 = vector.shape_cast %64 : vector<1x1xf32> to vector<1x1xf32>
    %76 = vector.broadcast %75 : vector<1x1xf32> to vector<1x128xf32>
    %77 = vector.broadcast %cst_35 : f32 to vector<1x128xf32>
    %78 = arith.select %67, %76, %77 : vector<1x128xi1>, vector<1x128xf32>
    %c0_36 = arith.constant 0 : index
    %c1 = arith.constant 1 : index
    %c0_37 = arith.constant 0 : index
    %79 = vector.load %arg10[%c0_36, %c1, %c0_37] : memref<1x2x128xf32, #tpu.memory_space<vmem>>, vector<1x1x128xf32>
    %80 = vector.shape_cast %79 : vector<1x1x128xf32> to vector<1x128xf32>
    %81 = vector.shape_cast %78 : vector<1x128xf32> to vector<1x1x128xf32>
    tpu.vector_store %arg10[%c0_36, %c1, %c0_37], %81 {strides = array<i32>} : memref<1x2x128xf32, #tpu.memory_space<vmem>>, vector<1x1x128xf32>,
    return
  }
  func.func @transform_0(%arg0: i32, %arg1: i32) -> (i32, i32, i32) {
    %c0_i32 = arith.constant 0 : i32
    %c0_i32_0 = arith.constant 0 : i32
    return %arg0, %c0_i32, %arg1 : i32, i32, i32
  }
  func.func @transform_1(%arg0: i32, %arg1: i32) -> (i32, i32, i32) {
    %c0_i32 = arith.constant 0 : i32
    %c0_i32_0 = arith.constant 0 : i32
    return %arg0, %c0_i32, %arg1 : i32, i32, i32
  }
  func.func @transform_2(%arg0: i32, %arg1: i32) -> (i32, i32) {
    %c0_i32 = arith.constant 0 : i32
    %c0_i32_0 = arith.constant 0 : i32
    %c0_i32_1 = arith.constant 0 : i32
    return %c0_i32, %c0_i32_0 : i32, i32
  }
  func.func @transform_3(%arg0: i32, %arg1: i32) -> (i32, i32) {
    %c0_i32 = arith.constant 0 : i32
    %c0_i32_0 = arith.constant 0 : i32
    %c0_i32_1 = arith.constant 0 : i32
    return %c0_i32, %c0_i32_0 : i32, i32
  }
  func.func @transform_4(%arg0: i32, %arg1: i32) -> (i32, i32) {
    %c0_i32 = arith.constant 0 : i32
    %c0_i32_0 = arith.constant 0 : i32
    %c0_i32_1 = arith.constant 0 : i32
    return %c0_i32, %c0_i32_0 : i32, i32
  }
  func.func @transform_5(%arg0: i32, %arg1: i32) -> (i32, i32) {
    %c0_i32 = arith.constant 0 : i32
    %c0_i32_0 = arith.constant 0 : i32
    %c0_i32_1 = arith.constant 0 : i32
    return %c0_i32, %c0_i32_0 : i32, i32
  }
  func.func @transform_6(%arg0: i32, %arg1: i32) -> (i32, i32) {
    %c0_i32 = arith.constant 0 : i32
    %c0_i32_0 = arith.constant 0 : i32
    %c0_i32_1 = arith.constant 0 : i32
    return %c0_i32, %c0_i32_0 : i32, i32
  }
  func.func @transform_7(%arg0: i32, %arg1: i32) -> (i32, i32, i32) {
    %c0_i32 = arith.constant 0 : i32
    %c0_i32_0 = arith.constant 0 : i32
    return %arg0, %c0_i32, %arg1 : i32, i32, i32
  }
  func.func @transform_8(%arg0: i32, %arg1: i32) -> (i32, i32, i32) {
    %c0_i32 = arith.constant 0 : i32
    %c0_i32_0 = arith.constant 0 : i32
    return %arg0, %c0_i32, %arg1 : i32, i32, i32
  }
}

</mosaic_0001>

<bundles_post_ra>
// kernel: rebalance_loss.1
= control target key start
LH: loop header
LB: loop body
LE: loop exit
PB: predicated region body
PF: predicated region fallthrough
CT: control target
= control target key end

     0   :  { %s3770_s27 = smov 0   ;;  %s3772_s28 = smov 0   ;;  %s6566_s0 = inlined_call_operand.vmem [shape: f32[2,313,256], index: 0, kind: input, shape index: {}]   ;;  %s6567_s1 = inlined_call_operand.vmem [shape: f32[2,2,256], index: 1, kind: input, shape index: {}]   ;;  %s6568_s2 = inlined_call_operand.vmem [shape: f32[313,2], index: 2, kind: input, shape index: {}]   ;;  %s6569_s3 = inlined_call_operand.vmem [shape: f32[313,1], index: 3, kind: input, shape index: {}]   ;;  %s6570_s4 = inlined_call_operand.vmem [shape: f32[313,1], index: 4, kind: input, shape index: {}]   ;;  %s6571_s5 = inlined_call_operand.vmem [shape: f32[2,1], index: 5, kind: input, shape index: {}]   ;;  %s6572_s6 = inlined_call_operand.vmem [shape: f32[2,1], index: 6, kind: input, shape index: {}]   ;;  %s6573_s7 = inlined_call_operand.vmem [shape: s32[2,1,256], index: 7, kind: output, shape index: {0}]   ;;  %s6574_s8 = inlined_call_operand.vmem [shape: f32[2,2,128], index: 8, kind: output, shape index: {1}]  }
   0x1   :  { %s3774_s29 = smov 0  }
   0x2 LB: > { %s31_s30 = sadd.s32 1, %s3717_s28  ;;  %p2913_p0 = scmp.ge.s32.totalorder %s3721_s29, 1  ;;  %s3721_s29 = sphi %s3774_s29, %s19_s29   ;;  %s3717_s28 = sphi %s3772_s28, %s7266_s28   ;;  %s3713_s27 = sphi %s3770_s27, %s7265_s27  }
   0x3   : > { %p33_p1 = scmp.ge.s32.totalorder %s31_s30, 2  ;;  %p305_p2 = scmp.lt.s32.totalorder %s3721_s29, 3 }
   0x5   : > { %s7268_s30 = smov (%p33_p1, %s31_s30), 0  ;;  %p306_p3 = pnand %p2913_p0, %p305_p2 }
   0x7   : > { %309 = sbr.rel (%p306_p3) target bundleno = 895 (0x37f), region = 48 }
   0xc   : > { %v399_v0 = vld [vmem:[%s6572_s6] sm:$0x3]  ;;  %v3723_v1 = vmov 0   ;;  %v468_v4 = vld [vmem:[%s6569_s3 + $0x8] sm:$0xff]  ;;  %v469_v5 = vld [vmem:[%s6569_s3 + $0x10] sm:$0xff]  ;;  %p363_p4 = scmp.lt.s32.totalorder %s3713_s27, 1 }
   0xd   : > { %3439 = vset.pattern.permute.xlu0 %v3723_v1  ;;  %3440 = vset.pattern.permute.xlu1 %v3723_v1  ;;  %v467_v2 = vld [vmem:[%s6569_s3] sm:$0xff]  ;;  %v472_v7 = vld [vmem:[%s6569_s3 + $0x28] sm:$0xff]  ;;  %v470_v8 = vld [vmem:[%s6569_s3 + $0x18] sm:$0xff]  ;;  %v3724_v44 = vmov 269488144   ;;  %vm832_vm1 = vcmask 1041408  }
   0xe   : > { %402 = vperm.xlu0 %3439, %v399_v0   ;;  %509 = vperm.xlu1 %3440, %v467_v2   ;;  %v410_v3 = vld [vmem:[%s6571_s5] sm:$0x3]  ;;  %v474_v9 = vld [vmem:[%s6569_s3 + $0x38] sm:$0xff]  ;;  %v473_v11 = vld [vmem:[%s6569_s3 + $0x30] sm:$0xff]  ;;  %s7270_s27 = smov (!%p363_p4, %s3713_s27), 1  ;;  %v405_v45 = vunpack.c.l.s4 %v3724_v44  ;;  %vm711_vm2 = vcmask 15360  }
   0xf   : > { %3441 = vset.pattern.permute.xlu2 %v3723_v1  ;;  %v471_v6 = vld [vmem:[%s6569_s3 + $0x20] sm:$0xff]  ;;  %v477_v12 = vld [vmem:[%s6569_s3 + $0x50] sm:$0xff]  ;;  %v478_v13 = vld [vmem:[%s6569_s3 + $0x58] sm:$0xff]  ;;  %s3004_s23 = sshll.u32 %s7270_s27, 2  ;;  %s3007_s13 = smul.u32 640, %s7270_s27  ;;  %vm6724_vm3 = vcmask 1040384  }
  0x10   : > { %519 = vperm.xlu2 %3441, %v469_v5   ;;  %v475_v10 = vld [vmem:[%s6569_s3 + $0x40] sm:$0xff]  ;;  %v476_v14 = vld [vmem:[%s6569_s3 + $0x48] sm:$0xff]  ;;  %v481_v16 = vld [vmem:[%s6569_s3 + $0x70] sm:$0xff]  ;;  %v406_v48 = vunpack.c.0.s8 %v405_v45  ;;  %s380_s10 = scalar_lea.vmem %s6567_s1, %s3004_s23 }
  0x11   : > { %v480_v15 = vld [vmem:[%s6569_s3 + $0x68] sm:$0xff]  ;;  %v479_v17 = vld [vmem:[%s6569_s3 + $0x60] sm:$0xff]  ;;  %v482_v20 = vld [vmem:[%s6569_s3 + $0x78] sm:$0xff]  ;;  %s4178_s16 = scalar_lea.vmem %s6566_s0, %s3007_s13 }
  0x12   : > { %v483_v18 = vld [vmem:[%s6569_s3 + $0x80] sm:$0xff]  ;;  %v484_v19 = vld [vmem:[%s6569_s3 + $0x88] sm:$0xff]  ;;  %v486_v21 = vld [vmem:[%s6569_s3 + $0x98] sm:$0xff] }
  0x13   : > { %v487_v22 = vld [vmem:[%s6569_s3 + $0xa0] sm:$0xff]  ;;  %v485_v23 = vld [vmem:[%s6569_s3 + $0x90] sm:$0xff]  ;;  %v490_v25 = vld [vmem:[%s6569_s3 + $0xb8] sm:$0xff] }
  0x14   : > { %v489_v24 = vld [vmem:[%s6569_s3 + $0xb0] sm:$0xff]  ;;  %v488_v26 = vld [vmem:[%s6569_s3 + $0xa8] sm:$0xff]  ;;  %v491_v29 = vld [vmem:[%s6569_s3 + $0xc0] sm:$0xff] }
  0x15   : > { %v492_v27 = vld [vmem:[%s6569_s3 + $0xc8] sm:$0xff]  ;;  %v493_v28 = vld [vmem:[%s6569_s3 + $0xd0] sm:$0xff]  ;;  %v495_v30 = vld [vmem:[%s6569_s3 + $0xe0] sm:$0xff] }
  0x16   : > { %413 = vperm.xlu0 %3439, %v410_v3   ;;  %514 = vperm.xlu1 %3440, %v468_v4   ;;  %v496_v31 = vld [vmem:[%s6569_s3 + $0xe8] sm:$0xff]  ;;  %v494_v32 = vld [vmem:[%s6569_s3 + $0xd8] sm:$0xff]  ;;  %v499_v34 = vld [vmem:[%s6569_s3 + $0x100] sm:$0xff] }
  0x17   : > { %v498_v33 = vld [vmem:[%s6569_s3 + $0xf8] sm:$0xff]  ;;  %v497_v35 = vld [vmem:[%s6569_s3 + $0xf0] sm:$0xff]  ;;  %v500_v38 = vld [vmem:[%s6569_s3 + $0x108] sm:$0xff] }
  0x18   : > { %524 = vperm.xlu2 %3441, %v470_v8   ;;  %v501_v36 = vld [vmem:[%s6569_s3 + $0x110] sm:$0xff]  ;;  %v502_v37 = vld [vmem:[%s6569_s3 + $0x118] sm:$0xff]  ;;  %v504_v39 = vld [vmem:[%s6569_s3 + $0x128] sm:$0xff] }
  0x19   : > { %v505_v40 = vld [vmem:[%s6569_s3 + $0x130] sm:$0xff]  ;;  %v503_v41 = vld [vmem:[%s6569_s3 + $0x120] sm:$0xff]  ;;  %v1911_v43 = vld [vmem:[%s6570_s4 + $0x8] sm:$0xff] }
  0x1a   : > { %v1910_v42 = vld [vmem:[%s6570_s4] sm:$0xff]  ;;  %v506_v47 = vld [vmem:[%s6569_s3 + $0x138] sm:$0x1]  ;;  %v1912_v54 = vld [vmem:[%s6570_s4 + $0x10] sm:$0xff] }
  0x1b   : > { %v1913_v49 = vld [vmem:[%s6570_s4 + $0x18] sm:$0xff]  ;;  %v1914_v50 = vld [vmem:[%s6570_s4 + $0x20] sm:$0xff]  ;;  %v1916_v58 = vld [vmem:[%s6570_s4 + $0x30] sm:$0xff] }
  0x1c   : > { %v398_v52 = vld [vmem:[%s380_s10] sm:$0xf]  ;;  %v1917_v59 = vld [vmem:[%s6570_s4 + $0x38] sm:$0xff]  ;;  %v1915_v62 = vld [vmem:[%s6570_s4 + $0x28] sm:$0xff]  ;;  %s2917_s10 = sshll.u32 %s7270_s27, 1 }
  0x1d   : > { %v1919_v1 = vld [vmem:[%s6570_s4 + $0x48] sm:$0xff]  ;;  %v1920_v2 = vld [vmem:[%s6570_s4 + $0x50] sm:$0xff]  ;;  %s389_s13 = scalar_lea.vmem %s6573_s7, %s2917_s10  ;;  %s397_s15 = scalar_lea.vmem %s6574_s8, %s2917_s10 }
  0x1e   : > { %529 = vperm.xlu0 %3439, %v471_v6   ;;  %534 = vperm.xlu1 %3440, %v472_v7   ;;  %v1918_v7 = vld [vmem:[%s6570_s4 + $0x40] sm:$0xff]  ;;  %v433_v44 = vld [vmem:[%s6568_s2 + $0x30] sm:$0xff] }
  0x1f   : > { %v453_v45 = vld [vmem:[%s6568_s2 + $0xd0] sm:$0xff] }
  0x20   : > { %539 = vperm.xlu2 %3441, %v473_v11   ;;  %v1921_v11 = vld [vmem:[%s6570_s4 + $0x58] sm:$0xff] }
  0x26   : > { %544 = vperm.xlu0 %3439, %v474_v9   ;;  %549 = vperm.xlu1 %3440, %v475_v10   ;;  %v1922_v9 = vld [vmem:[%s6570_s4 + $0x60] sm:$0xff]  ;;  %v1923_v10 = vld [vmem:[%s6570_s4 + $0x68] sm:$0xff] }
  0x28   : > { %554 = vperm.xlu2 %3441, %v476_v14  }
  0x2e   : > { %559 = vperm.xlu0 %3439, %v477_v12   ;;  %564 = vperm.xlu1 %3440, %v478_v13   ;;  %v427_v12 = vld [vmem:[%s6568_s2] sm:$0xff] }
  0x2f   : > { %v447_v13 = vld [vmem:[%s6568_s2 + $0xa0] sm:$0xff] }
  0x30   : > { %569 = vperm.xlu2 %3441, %v479_v17   ;;  %v1926_v17 = vld [vmem:[%s6570_s4 + $0x80] sm:$0xff] }
  0x36   : > { %574 = vperm.xlu0 %3439, %v480_v15   ;;  %579 = vperm.xlu1 %3440, %v481_v16   ;;  %v1925_v16 = vld [vmem:[%s6570_s4 + $0x78] sm:$0xff] }
  0x38   : > { %584 = vperm.xlu2 %3441, %v482_v20   ;;  %v448_v20 = vld [vmem:[%s6568_s2 + $0xa8] sm:$0xff] }
  0x3e   : > { %589 = vperm.xlu0 %3439, %v483_v18   ;;  %594 = vperm.xlu1 %3440, %v484_v19   ;;  %v1924_v18 = vld [vmem:[%s6570_s4 + $0x70] sm:$0xff]  ;;  %v428_v19 = vld [vmem:[%s6568_s2 + $0x8] sm:$0xff] }
  0x40   : > { %599 = vperm.xlu2 %3441, %v485_v23   ;;  %v1927_v23 = vld [vmem:[%s6570_s4 + $0x88] sm:$0xff] }
  0x46   : > { %604 = vperm.xlu0 %3439, %v486_v21   ;;  %609 = vperm.xlu1 %3440, %v487_v22   ;;  %v1928_v21 = vld [vmem:[%s6570_s4 + $0x90] sm:$0xff]  ;;  %v1929_v22 = vld [vmem:[%s6570_s4 + $0x98] sm:$0xff] }
  0x48   : > { %614 = vperm.xlu2 %3441, %v488_v26   ;;  %v1931_v26 = vld [vmem:[%s6570_s4 + $0xa8] sm:$0xff] }
  0x4e   : > { %619 = vperm.xlu0 %3439, %v489_v24   ;;  %624 = vperm.xlu1 %3440, %v490_v25   ;;  %v429_v24 = vld [vmem:[%s6568_s2 + $0x10] sm:$0xff] }
  0x4f   : > { %v449_v25 = vld [vmem:[%s6568_s2 + $0xb0] sm:$0xff] }
  0x50   : > { %629 = vperm.xlu2 %3441, %v491_v29   ;;  %v430_v29 = vld [vmem:[%s6568_s2 + $0x18] sm:$0xff] }
  0x56   : > { %634 = vperm.xlu0 %3439, %v492_v27   ;;  %639 = vperm.xlu1 %3440, %v493_v28   ;;  %v1932_v27 = vld [vmem:[%s6570_s4 + $0xb0] sm:$0xff]  ;;  %v1930_v28 = vld [vmem:[%s6570_s4 + $0xa0] sm:$0xff] }
  0x58   : > { %644 = vperm.xlu2 %3441, %v494_v32   ;;  %v1935_v32 = vld [vmem:[%s6570_s4 + $0xc8] sm:$0xff] }
  0x5e   : > { %649 = vperm.xlu0 %3439, %v495_v30   ;;  %654 = vperm.xlu1 %3440, %v496_v31   ;;  %v450_v30 = vld [vmem:[%s6568_s2 + $0xb8] sm:$0xff]  ;;  %v1934_v31 = vld [vmem:[%s6570_s4 + $0xc0] sm:$0xff] }
  0x60   : > { %659 = vperm.xlu2 %3441, %v497_v35   ;;  %v451_v35 = vld [vmem:[%s6568_s2 + $0xc0] sm:$0xff] }
  0x66   : > { %664 = vperm.xlu0 %3439, %v498_v33   ;;  %669 = vperm.xlu1 %3440, %v499_v34   ;;  %v1933_v33 = vld [vmem:[%s6570_s4 + $0xb8] sm:$0xff]  ;;  %v431_v34 = vld [vmem:[%s6568_s2 + $0x20] sm:$0xff] }
  0x68   : > { %674 = vperm.xlu2 %3441, %v500_v38   ;;  %v1936_v38 = vld [vmem:[%s6570_s4 + $0xd0] sm:$0xff] }
  0x6e   : > { %679 = vperm.xlu0 %3439, %v501_v36   ;;  %684 = vperm.xlu1 %3440, %v502_v37   ;;  %v1937_v36 = vld [vmem:[%s6570_s4 + $0xd8] sm:$0xff]  ;;  %v1938_v37 = vld [vmem:[%s6570_s4 + $0xe0] sm:$0xff] }
  0x70   : > { %689 = vperm.xlu2 %3441, %v503_v41   ;;  %v1940_v41 = vld [vmem:[%s6570_s4 + $0xf0] sm:$0xff] }
  0x76   : > { %694 = vperm.xlu0 %3439, %v504_v39   ;;  %699 = vperm.xlu1 %3440, %v505_v40   ;;  %v432_v39 = vld [vmem:[%s6568_s2 + $0x28] sm:$0xff] }
  0x77   : > { %v452_v40 = vld [vmem:[%s6568_s2 + $0xc8] sm:$0xff] }
  0x78   : > { %704 = vperm.xlu2 %3441, %v506_v47   ;;  %v1944_v47 = vld [vmem:[%s6570_s4 + $0x110] sm:$0xff] }
  0x7e   : > { %1952 = vperm.xlu0 %3439, %v1910_v42   ;;  %1957 = vperm.xlu1 %3440, %v1911_v43   ;;  %v1941_v42 = vld [vmem:[%s6570_s4 + $0xf8] sm:$0xff]  ;;  %v1939_v43 = vld [vmem:[%s6570_s4 + $0xe8] sm:$0xff] }
  0x80   : > { %v403_v46 = vpop.permute.xlu0 %402  ;;  %1962 = vperm.xlu2 %3441, %v1912_v54   ;;  %v435_v54 = vld [vmem:[%s6568_s2 + $0x40] sm:$0xff] }
  0x81   : > { %v407_v51 = vperm.slane %v403_v46, %v406_v48  ;;  %v1943_v46 = vld [vmem:[%s6570_s4 + $0x108] sm:$0xff] }
  0x83   : > { %v409_v55 = vmul.f32 %v407_v51, %v398_v52  ;;  %v1946_v51 = vld [vmem:[%s6570_s4 + $0x120] sm:$0xff]  ;;  %v1947_v52 = vld [vmem:[%s6570_s4 + $0x128] sm:$0xff] }
  0x86   : > { %1967 = vperm.xlu0 %3439, %v1913_v49   ;;  %1972 = vperm.xlu1 %3440, %v1914_v50   ;;  %v434_v49 = vld [vmem:[%s6568_s2 + $0x38] sm:$0xff] }
  0x87   : > { %v454_v50 = vld [vmem:[%s6568_s2 + $0xd8] sm:$0xff] }
  0x88   : > { %v414_v53 = vpop.permute.xlu0 %413  ;;  %1977 = vperm.xlu2 %3441, %v1915_v62   ;;  %v438_v62 = vld [vmem:[%s6568_s2 + $0x58] sm:$0xff] }
  0x89   : > { %v418_v56 = vperm.slane %v414_v53, %v406_v48  ;;  %v1942_v48 = vld [vmem:[%s6570_s4 + $0x100] sm:$0xff]  ;;  %v1945_v53 = vld [vmem:[%s6570_s4 + $0x118] sm:$0xff] }
  0x8b   : > { %v420_v57 = vadd.f32 %v418_v56, %v409_v55  ;;  %v455_v55 = vld [vmem:[%s6568_s2 + $0xe0] sm:$0xff]  ;;  %v1949_v56 = vld [vmem:[%s6570_s4 + $0x138] sm:$0x1] }
  0x8d   : > { %v421_v60 = vmax.f32 %v420_v57, 0.0  ;;  %v1948_v57 = vld [vmem:[%s6570_s4 + $0x130] sm:$0xff] }
  0x8e   : > { %1982 = vperm.xlu0 %3439, %v1916_v58   ;;  %1987 = vperm.xlu1 %3440, %v1917_v59   ;;  %v436_v58 = vld [vmem:[%s6568_s2 + $0x48] sm:$0xff] }
  0x8f   : > { %v422_v61 = vmin.f32 %v421_v60, 1.0  ;;  %v456_v59 = vld [vmem:[%s6568_s2 + $0xe8] sm:$0xff]  ;;  %v437_v60 = vld [vmem:[%s6568_s2 + $0x50] sm:$0xff] }
  0x90   : > { %1992 = vperm.xlu2 %3441, %v1918_v7   ;;  %v4195_v7 = vpop.permute.xlu1 %509 }
  0x91   : > { %v423_v63 = vmul.f32 255.0, %v422_v61  ;;  %v457_v61 = vld [vmem:[%s6568_s2 + $0xf0] sm:$0xff] }
  0x93   : > { %v2919_v0 = vadd.f32 -128.0, %v423_v63  ;;  %v458_v63 = vld [vmem:[%s6568_s2 + $0xf8] sm:$0xff] }
  0x95   : > { %vm3008_vm0 = vcmp.lt.s32.totalorder %v2919_v0, 0  ;;  %v3009_v3 = vceil.f32 %v2919_v0  ;;  %v3010_v4 = vfloor.f32 %v2919_v0  ;;  %v439_v0 = vld [vmem:[%s6568_s2 + $0x60] sm:$0xff] }
  0x96   : > { %1997 = vperm.xlu0 %3439, %v1919_v1   ;;  %2002 = vperm.xlu1 %3440, %v1920_v2   ;;  %v459_v1 = vld [vmem:[%s6568_s2 + $0x100] sm:$0xff]  ;;  %v440_v2 = vld [vmem:[%s6568_s2 + $0x68] sm:$0xff] }
  0x97   : > { %v3011_v5 = vsel %vm3008_vm0, %v3009_v3, %v3010_v4  ;;  %v460_v3 = vld [vmem:[%s6568_s2 + $0x108] sm:$0xff]  ;;  %v4187_v4 = vld [vmem:[%s4178_s16] sm:$0xff] }
  0x98   : > { %v3012_v6 = vcvt.f32.s32 %v3011_v5  ;;  %2007 = vperm.xlu2 %3441, %v1921_v11   ;;  %v4190_v5 = vld [vmem:[%s4178_s16 + $0x10] sm:$0xff] }
  0x9a   : > { %v426_v8 = vcvt.s32.f32 %v3012_v6  ;;  %v4193_v6 = vld [vmem:[%s4178_s16 + $0x20] sm:$0xff] }
  0x9b   : > { %v2322_v11 = vmax.f32 %v4187_v4, %v4193_v6 }
  0x9c   : > { %708 = vst [vmem:[#allocation1] ss:$4 sm:$0xff] %v426_v8  ;;  %v4200_v8 = vld [vmem:[%s4178_s16 + $0x30] sm:$0xff] }
  0x9e   : > { %2012 = vperm.xlu0 %3439, %v1922_v9   ;;  %2017 = vperm.xlu1 %3440, %v1923_v10   ;;  %v4203_v9 = vld [vmem:[%s4178_s16 + $0x40] sm:$0xff]  ;;  %v4206_v10 = vld [vmem:[%s4178_s16 + $0x50] sm:$0xff] }
  0xa0   : > { %2022 = vperm.xlu2 %3441, %v1924_v18   ;;  %v4226_v18 = vld [vmem:[%s4178_s16 + $0x90] sm:$0xff] }
  0xa3   : > { %v709_v14 = vld.sshfl [vmem:[#allocation1] sm:$0xff pattern:$0x73625140]  ;;  %v710_v15 = vld.sshfl [vmem:[#allocation1 + $0x8] sm:$0xff pattern:$0x73625140] }
  0xa4   : > { %2920 = vmatpush.msk.msra.mxu0 %vm832_vm1, %v709_v14  ;;  %3005 = vmatpush.msk.msra.mxu2 %vm832_vm1, %v709_v14  ;;  %v4218_v14 = vld [vmem:[%s4178_s16 + $0x70] sm:$0xff] }
  0xa5   : > { %2961 = vmatpush.msk.msra.mxu1 %vm832_vm1, %v710_v15  ;;  %3006 = vmatpush.msk.msra.mxu3 %vm832_vm1, %v710_v15  ;;  %v2324_v15 = vmax.f32 %v2322_v11, %v4203_v9 }
  0xa6   : > { %2921 = vmatmul.msk.f32.vlgmr.msra.gmra.mxu0 %vm711_vm2, %v427_v12  ;;  %2941 = vmatmul.msk.f32.vlgmr.msra.gmra.mxu2 %vm711_vm2, %v447_v13 }
  0xa7   : > { %2962 = vmatmul.msk.f32.vlgmr.msra.gmra.mxu1 %vm711_vm2, %v427_v12  ;;  %2982 = vmatmul.msk.f32.vlgmr.msra.gmra.mxu3 %vm711_vm2, %v447_v13  ;;  %v4213_v12 = vld [vmem:[%s4178_s16 + $0x60] sm:$0xff]  ;;  %v2323_v13 = vmax.f32 %v4190_v5, %v4200_v8 }
  0xa8   : > { %2027 = vperm.xlu0 %3439, %v1925_v16   ;;  %2032 = vperm.xlu1 %3440, %v1926_v17   ;;  %v4222_v16 = vld [vmem:[%s4178_s16 + $0x80] sm:$0xff] }
  0xa9   : > { %2037 = vperm.xlu2 %3441, %v1927_v23   ;;  %v2325_v17 = vmax.f32 %v2323_v13, %v4206_v10  ;;  %v1716_v13 = vld [vmem:[%s4178_s16 + $0x1d0] sm:$0xff] }
  0xab   : > { %v2327_v23 = vmax.f32 %v2325_v17, %v4218_v14  ;;  %v1720_v17 = vld [vmem:[%s4178_s16 + $0x1f0] sm:$0xff] }
  0xae   : > { %2922 = vmatmul.msk.f32.gmra.mxu0 %vm711_vm2, %v428_v19  ;;  %2942 = vmatmul.msk.f32.gmra.mxu2 %vm711_vm2, %v448_v20 }
  0xaf   : > { %2963 = vmatmul.msk.f32.gmra.mxu1 %vm711_vm2, %v428_v19  ;;  %2983 = vmatmul.msk.f32.gmra.mxu3 %vm711_vm2, %v448_v20  ;;  %v2326_v19 = vmax.f32 %v2324_v15, %v4213_v12  ;;  %v441_v20 = vld [vmem:[%s6568_s2 + $0x70] sm:$0xff]  ;;  %v1718_v15 = vld [vmem:[%s4178_s16 + $0x1e0] sm:$0xff] }
  0xb0   : > { %2042 = vperm.xlu0 %3439, %v1928_v21   ;;  %2047 = vperm.xlu1 %3440, %v1929_v22   ;;  %v461_v21 = vld [vmem:[%s6568_s2 + $0x110] sm:$0xff]  ;;  %v4236_v22 = vld [vmem:[%s4178_s16 + $0xa0] sm:$0xff] }
  0xb1   : > { %2052 = vperm.xlu2 %3441, %v1930_v28   ;;  %v4250_v28 = vld [vmem:[%s4178_s16 + $0xd0] sm:$0xff] }
  0xb6   : > { %2923 = vmatmul.msk.f32.gmra.mxu0 %vm711_vm2, %v429_v24  ;;  %2943 = vmatmul.msk.f32.gmra.mxu2 %vm711_vm2, %v449_v25 }
  0xb7   : > { %2964 = vmatmul.msk.f32.gmra.mxu1 %vm711_vm2, %v429_v24  ;;  %2984 = vmatmul.msk.f32.gmra.mxu3 %vm711_vm2, %v449_v25  ;;  %v4240_v24 = vld [vmem:[%s4178_s16 + $0xb0] sm:$0xff]  ;;  %v2328_v25 = vmax.f32 %v2326_v19, %v4222_v16 }
  0xb8   : > { %2057 = vperm.xlu0 %3439, %v1931_v26   ;;  %2062 = vperm.xlu1 %3440, %v1932_v27   ;;  %v4244_v26 = vld [vmem:[%s4178_s16 + $0xc0] sm:$0xff]  ;;  %v2329_v27 = vmax.f32 %v2327_v23, %v4226_v18  ;;  %v4332_v23 = vld [vmem:[%s4178_s16 + $0x18] sm:$0xff] }
  0xb9   : > { %2067 = vperm.xlu2 %3441, %v1933_v33   ;;  %v4262_v33 = vld [vmem:[%s4178_s16 + $0xf0] sm:$0xff] }
  0xbe   : > { %2924 = vmatmul.msk.f32.gmra.mxu0 %vm711_vm2, %v430_v29  ;;  %2944 = vmatmul.msk.f32.gmra.mxu2 %vm711_vm2, %v450_v30 }
  0xbf   : > { %2965 = vmatmul.msk.f32.gmra.mxu1 %vm711_vm2, %v430_v29  ;;  %2985 = vmatmul.msk.f32.gmra.mxu3 %vm711_vm2, %v450_v30  ;;  %v2330_v29 = vmax.f32 %v2328_v25, %v4236_v22  ;;  %v4256_v30 = vld [vmem:[%s4178_s16 + $0xe0] sm:$0xff]  ;;  %v4335_v25 = vld [vmem:[%s4178_s16 + $0x28] sm:$0xff] }
  0xc0   : > { %2072 = vperm.xlu0 %3439, %v1934_v31   ;;  %2077 = vperm.xlu1 %3440, %v1935_v32   ;;  %v2331_v31 = vmax.f32 %v2329_v27, %v4240_v24  ;;  %v4259_v32 = vpop.permute.xlu1 %514 }
  0xc1   : > { %2082 = vperm.xlu2 %3441, %v1936_v38  }
  0xc6   : > { %2925 = vmatmul.msk.f32.gmra.mxu0 %vm711_vm2, %v431_v34  ;;  %2945 = vmatmul.msk.f32.gmra.mxu2 %vm711_vm2, %v451_v35 }
  0xc7   : > { %2966 = vmatmul.msk.f32.gmra.mxu1 %vm711_vm2, %v431_v34  ;;  %2986 = vmatmul.msk.f32.gmra.mxu3 %vm711_vm2, %v451_v35  ;;  %v2332_v34 = vmax.f32 %v2330_v29, %v4244_v26  ;;  %v4266_v35 = vld [vmem:[%s4178_s16 + $0x100] sm:$0xff] }
  0xc8   : > { %2087 = vperm.xlu0 %3439, %v1937_v36   ;;  %2092 = vperm.xlu1 %3440, %v1938_v37   ;;  %v2333_v36 = vmax.f32 %v2331_v31, %v4250_v28  ;;  %v4270_v37 = vld [vmem:[%s4178_s16 + $0x110] sm:$0xff]  ;;  %v4342_v31 = vld [vmem:[%s4178_s16 + $0x38] sm:$0xff] }
  0xc9   : > { %2097 = vperm.xlu2 %3441, %v1939_v43   ;;  %6783 = vst [vmem:[#allocation2_spill] sm:$0xff] %v4270_v37  ;;  %v2334_v38 = vmax.f32 %v2332_v34, %v4256_v30  ;;  %v4284_v43 = vld [vmem:[%s4178_s16 + $0x130] sm:$0xff]  ;;  %v4345_v34 = vld [vmem:[%s4178_s16 + $0x48] sm:$0xff] }
  0xca   : > { %6785 = vst [vmem:[#allocation4_spill] sm:$0xff] %v4284_v43 }
  0xce   : > { %2926 = vmatmul.msk.f32.gmra.mxu0 %vm711_vm2, %v432_v39  ;;  %2946 = vmatmul.msk.f32.gmra.mxu2 %vm711_vm2, %v452_v40 }
  0xcf   : > { %2967 = vmatmul.msk.f32.gmra.mxu1 %vm711_vm2, %v432_v39  ;;  %2987 = vmatmul.msk.f32.gmra.mxu3 %vm711_vm2, %v452_v40  ;;  %v442_v39 = vld [vmem:[%s6568_s2 + $0x78] sm:$0xff] }
  0xd0   : > { %2102 = vperm.xlu0 %3439, %v1940_v41   ;;  %2107 = vperm.xlu1 %3440, %v1941_v42   ;;  %v462_v40 = vld [vmem:[%s6568_s2 + $0x118] sm:$0xff]  ;;  %v4280_v41 = vld [vmem:[%s4178_s16 + $0x120] sm:$0xff]  ;;  %v2335_v42 = vmax.f32 %v2333_v36, %v4262_v33 }
  0xd1   : > { %2112 = vperm.xlu2 %3441, %v1942_v48   ;;  %6784 = vst [vmem:[#allocation3_spill] sm:$0xff] %v4280_v41  ;;  %v4296_v48 = vld [vmem:[%s4178_s16 + $0x150] sm:$0xff]  ;;  %v4348_v36 = vld [vmem:[%s4178_s16 + $0x58] sm:$0xff] }
  0xd6   : > { %2927 = vmatmul.msk.f32.gmra.mxu0 %vm711_vm2, %v433_v44  ;;  %2947 = vmatmul.msk.f32.gmra.mxu2 %vm711_vm2, %v453_v45 }
  0xd7   : > { %2968 = vmatmul.msk.f32.gmra.mxu1 %vm711_vm2, %v433_v44  ;;  %2988 = vmatmul.msk.f32.gmra.mxu3 %vm711_vm2, %v453_v45  ;;  %v2336_v44 = vmax.f32 %v2334_v38, %v4266_v35  ;;  %v4288_v45 = vld [vmem:[%s4178_s16 + $0x140] sm:$0xff] }
  0xd8   : > { %2117 = vperm.xlu0 %3439, %v1943_v46   ;;  %2122 = vperm.xlu1 %3440, %v1944_v47   ;;  %6786 = vst [vmem:[#allocation5_spill] sm:$0xff] %v4288_v45  ;;  %v2337_v46 = vmax.f32 %v2335_v42, %v4270_v37  ;;  %v4291_v47 = vpop.permute.xlu2 %519  ;;  %v4354_v42 = vld [vmem:[%s4178_s16 + $0x68] sm:$0xff] }
  0xd9   : > { %2127 = vperm.xlu2 %3441, %v1945_v53  }
  0xde   : > { %2928 = vmatmul.msk.f32.gmra.mxu0 %vm711_vm2, %v434_v49  ;;  %2948 = vmatmul.msk.f32.gmra.mxu2 %vm711_vm2, %v454_v50 }
  0xdf   : > { %2969 = vmatmul.msk.f32.gmra.mxu1 %vm711_vm2, %v434_v49  ;;  %2989 = vmatmul.msk.f32.gmra.mxu3 %vm711_vm2, %v454_v50  ;;  %v2338_v49 = vmax.f32 %v2336_v44, %v4280_v41  ;;  %v1702_v50 = vld [vmem:[%s4178_s16 + $0x160] sm:$0xff]  ;;  %v2369_v44 = vmax.f32 %v4332_v23, %v4342_v31 }
  0xe0   : > { %2132 = vperm.xlu0 %3439, %v1946_v51   ;;  %2137 = vperm.xlu1 %3440, %v1947_v52   ;;  %v2339_v51 = vmax.f32 %v2337_v46, %v4284_v43  ;;  %v1704_v52 = vld [vmem:[%s4178_s16 + $0x170] sm:$0xff]  ;;  %v4339_v27 = vpop.permute.xlu2 %524 }
  0xe1   : > { %2142 = vperm.xlu2 %3441, %v1948_v57   ;;  %v2340_v53 = vmax.f32 %v2338_v49, %v4288_v45  ;;  %v1708_v57 = vld [vmem:[%s4178_s16 + $0x190] sm:$0xff]  ;;  %v1726_v49 = vld [vmem:[%s4178_s16 + $0x220] sm:$0xff] }
  0xe2   : > { %v1724_v46 = vld [vmem:[%s4178_s16 + $0x210] sm:$0xff] }
  0xe6   : > { %2929 = vmatmul.msk.f32.gmra.mxu0 %vm711_vm2, %v435_v54  ;;  %2949 = vmatmul.msk.f32.gmra.mxu2 %vm711_vm2, %v455_v55 }
  0xe7   : > { %2970 = vmatmul.msk.f32.gmra.mxu1 %vm711_vm2, %v435_v54  ;;  %2990 = vmatmul.msk.f32.gmra.mxu3 %vm711_vm2, %v455_v55  ;;  %v1706_v54 = vld [vmem:[%s4178_s16 + $0x180] sm:$0xff]  ;;  %v2341_v55 = vmax.f32 %v2339_v51, %v4296_v48  ;;  %v4361_v51 = vld [vmem:[%s4178_s16 + $0x78] sm:$0xff] }
  0xe8   : > { %2147 = vperm.xlu0 %3439, %v1949_v56   ;;  %v4307_v56 = vpop.permute.xlu1 %534 }
  0xe9   : > { %6787 = vst [vmem:[#allocation6_spill] sm:$0xff] %v4307_v56 }
  0xee   : > { %2930 = vmatmul.msk.f32.gmra.mxu0 %vm711_vm2, %v436_v58  ;;  %2950 = vmatmul.msk.f32.gmra.mxu2 %vm711_vm2, %v456_v59 }
  0xef   : > { %2971 = vmatmul.msk.f32.gmra.mxu1 %vm711_vm2, %v436_v58  ;;  %2991 = vmatmul.msk.f32.gmra.mxu3 %vm711_vm2, %v456_v59  ;;  %v2342_v58 = vmax.f32 %v2340_v53, %v1702_v50  ;;  %v1710_v59 = vld [vmem:[%s4178_s16 + $0x1a0] sm:$0xff] }
  0xf6   : > { %2931 = vmatmul.msk.f32.gmra.mxu0 %vm711_vm2, %v437_v60  ;;  %2951 = vmatmul.msk.f32.gmra.mxu2 %vm711_vm2, %v457_v61 }
  0xf7   : > { %2972 = vmatmul.msk.f32.gmra.mxu1 %vm711_vm2, %v437_v60  ;;  %2992 = vmatmul.msk.f32.gmra.mxu3 %vm711_vm2, %v457_v61  ;;  %v2343_v60 = vmax.f32 %v2341_v55, %v1704_v52  ;;  %v443_v61 = vld [vmem:[%s6568_s2 + $0x80] sm:$0xff]  ;;  %v2371_v55 = vmax.f32 %v2369_v44, %v4348_v36 }
  0xfe   : > { %2932 = vmatmul.msk.f32.gmra.mxu0 %vm711_vm2, %v438_v62  ;;  %2952 = vmatmul.msk.f32.gmra.mxu2 %vm711_vm2, %v458_v63 }
  0xff   : > { %2973 = vmatmul.msk.f32.gmra.mxu1 %vm711_vm2, %v438_v62  ;;  %2993 = vmatmul.msk.f32.gmra.mxu3 %vm711_vm2, %v458_v63  ;;  %v463_v62 = vld [vmem:[%s6568_s2 + $0x120] sm:$0xff] }
 0x106   : > { %2933 = vmatmul.msk.f32.gmra.mxu0 %vm711_vm2, %v439_v0  ;;  %2953 = vmatmul.msk.f32.gmra.mxu2 %vm711_vm2, %v459_v1 }
 0x107   : > { %2974 = vmatmul.msk.f32.gmra.mxu1 %vm711_vm2, %v439_v0  ;;  %2994 = vmatmul.msk.f32.gmra.mxu3 %vm711_vm2, %v459_v1  ;;  %v1712_v0 = vld [vmem:[%s4178_s16 + $0x1b0] sm:$0xff]  ;;  %v2344_v1 = vmax.f32 %v2342_v58, %v1706_v54  ;;  %v4365_v54 = vld [vmem:[%s4178_s16 + $0x88] sm:$0xff] }
 0x108   : > { %v464_v58 = vld [vmem:[%s6568_s2 + $0x128] sm:$0xff] }
 0x109   : > { %v2346_v19 = vmax.f32 %v2344_v1, %v1710_v59  ;;  %v4374_v59 = vpop.permute.xlu1 %549  ;;  %v1730_v1 = vld [vmem:[%s4178_s16 + $0x240] sm:$0xff] }
 0x10a   : > { %6788 = vst [vmem:[#allocation7_spill] sm:$0xff] %v4374_v59 }
 0x10e   : > { %2934 = vmatmul.msk.f32.gmra.mxu0 %vm711_vm2, %v440_v2  ;;  %2954 = vmatmul.msk.f32.gmra.mxu2 %vm711_vm2, %v460_v3 }
 0x10f   : > { %2975 = vmatmul.msk.f32.gmra.mxu1 %vm711_vm2, %v440_v2  ;;  %2995 = vmatmul.msk.f32.gmra.mxu3 %vm711_vm2, %v460_v3  ;;  %v1714_v2 = vld [vmem:[%s4178_s16 + $0x1c0] sm:$0xff]  ;;  %v2345_v3 = vmax.f32 %v2343_v60, %v1708_v57  ;;  %v444_v57 = vld [vmem:[%s6568_s2 + $0x88] sm:$0xff]  ;;  %v1728_v60 = vld [vmem:[%s4178_s16 + $0x230] sm:$0xff] }
 0x110   : > { %v2348_v29 = vmax.f32 %v2346_v19, %v1714_v2  ;;  %v1736_v2 = vld [vmem:[%s4178_s16 + $0x270] sm:$0x1] }
 0x112   : > { %v2350_v50 = vmax.f32 %v2348_v29, %v1718_v15  ;;  %v2373_v15 = vmax.f32 %v2371_v55, %v4361_v51 }
 0x116   : > { %2935 = vmatmul.msk.f32.gmra.mxu0 %vm711_vm2, %v441_v20  ;;  %2955 = vmatmul.msk.f32.gmra.mxu2 %vm711_vm2, %v461_v21 }
 0x117   : > { %2976 = vmatmul.msk.f32.gmra.mxu1 %vm711_vm2, %v441_v20  ;;  %2996 = vmatmul.msk.f32.gmra.mxu3 %vm711_vm2, %v461_v21  ;;  %v2347_v20 = vmax.f32 %v2345_v3, %v1712_v0  ;;  %v4329_v21 = vld [vmem:[%s4178_s16 + $0x8] sm:$0xff] }
 0x118   : > { %v2368_v38 = vmax.f32 %v4329_v21, %v4335_v25 }
 0x11a   : > { %v2370_v52 = vmax.f32 %v2368_v38, %v4345_v34 }
 0x11c   : > { %v2372_v0 = vmax.f32 %v2370_v52, %v4354_v42  ;;  %v2359_v52 = vsel %vm6724_vm3, %v1736_v2, -inf }
 0x11e   : > { %2936 = vmatmul.msk.f32.gmra.mxu0 %vm711_vm2, %v442_v39  ;;  %2956 = vmatmul.msk.f32.gmra.mxu2 %vm711_vm2, %v462_v40  ;;  %v2374_v29 = vmax.f32 %v2372_v0, %v4365_v54 }
 0x11f   : > { %2977 = vmatmul.msk.f32.gmra.mxu1 %vm711_vm2, %v442_v39  ;;  %2997 = vmatmul.msk.f32.gmra.mxu3 %vm711_vm2, %v462_v40  ;;  %v1722_v39 = vld [vmem:[%s4178_s16 + $0x200] sm:$0xff]  ;;  %v2349_v40 = vmax.f32 %v2347_v20, %v1716_v13  ;;  %v4384_v13 = vld [vmem:[%s4178_s16 + $0xa8] sm:$0xff]  ;;  %v4389_v20 = vld [vmem:[%s4178_s16 + $0xb8] sm:$0xff] }
 0x120   : > { %v2376_v55 = vmax.f32 %v2374_v29, %v4384_v13  ;;  %v4425_v29 = vld [vmem:[%s4178_s16 + $0x108] sm:$0xff] }
 0x121   : > { %v2351_v53 = vmax.f32 %v2349_v40, %v1720_v17  ;;  %v1732_v17 = vld [vmem:[%s4178_s16 + $0x250] sm:$0xff]  ;;  %v4395_v40 = vld [vmem:[%s4178_s16 + $0xc8] sm:$0xff]  ;;  %6794 = vst [vmem:[#allocation13_spill] sm:$0xff] %v4425_v29 }
 0x122   : > { %6789 = vst [vmem:[#allocation8_spill] sm:$0xff] %v4395_v40 }
 0x123   : > { %v4317_v63 = vpop.f32.mrf.mxu0  ;;  %v2353_v3 = vmax.f32 %v2351_v53, %v1724_v46  ;;  %v4403_v53 = vld [vmem:[%s4178_s16 + $0xd8] sm:$0xff] }
 0x124   : > { %v4321_v11 = vpop.f32.mrf.mxu1  ;;  %6790 = vst [vmem:[#allocation9_spill] sm:$0xff] %v4403_v53 }
 0x126   : > { %2937 = vmatmul.msk.f32.gmra.mxu0 %vm711_vm2, %v443_v61  ;;  %2957 = vmatmul.msk.f32.gmra.mxu2 %vm711_vm2, %v463_v62 }
 0x127   : > { %2978 = vmatmul.msk.f32.gmra.mxu1 %vm711_vm2, %v443_v61  ;;  %2998 = vmatmul.msk.f32.gmra.mxu3 %vm711_vm2, %v463_v62  ;;  %v2352_v61 = vmax.f32 %v2350_v50, %v1722_v39  ;;  %v4378_v62 = vld [vmem:[%s4178_s16 + $0x98] sm:$0xff]  ;;  %v2355_v39 = vmax.f32 %v2353_v3, %v1728_v60 }
 0x128   : > { %v2375_v44 = vmax.f32 %v2373_v15, %v4378_v62  ;;  %v4416_v3 = vld [vmem:[%s4178_s16 + $0xf8] sm:$0xff]  ;;  %v855_v15 = vadd.f32 %v4317_v63, %v4195_v7  ;;  %v4439_v63 = vld [vmem:[%s4178_s16 + $0x128] sm:$0xff] }
 0x129   : > { %v2354_v19 = vmax.f32 %v2352_v61, %v1726_v49  ;;  %v1734_v49 = vld [vmem:[%s4178_s16 + $0x260] sm:$0xff]  ;;  %v2357_v60 = vmax.f32 %v2355_v39, %v1732_v17  ;;  %v4407_v61 = vld [vmem:[%s4178_s16 + $0xe8] sm:$0xff]  ;;  %6793 = vst [vmem:[#allocation12_spill] sm:$0xff] %v4416_v3  ;;  %v445_v39 = vld [vmem:[%s6568_s2 + $0x90] sm:$0xff] }
 0x12a   : > { %6791 = vst [vmem:[#allocation10_spill] sm:$0xff] %v4407_v61  ;;  %v2377_v0 = vmax.f32 %v2375_v44, %v4389_v20  ;;  %v465_v44 = vld [vmem:[%s6568_s2 + $0x130] sm:$0xff]  ;;  %vm3013_vm4 = vcmp.lt.s32.totalorder %v855_v15, 0 }
 0x12b   : > { %v857_v38 = vpop.f32.mrf.mxu0  ;;  %v2356_v50 = vmax.f32 %v2354_v19, %v1730_v1  ;;  %v2378_v1 = vmax.f32 %v2376_v55, %v4395_v40  ;;  %v2360_v19 = vmax.f32 %v2357_v60, %v2359_v52  ;;  %6796 = vst [vmem:[#allocation15_spill] sm:$0xff] %v4439_v63  ;;  %v992_v52 = vadd.f32 %v4321_v11, %v4195_v7  ;;  %v4447_v55 = vld [vmem:[%s4178_s16 + $0x138] sm:$0xff] }
 0x12c   : > { %v994_v46 = vpop.f32.mrf.mxu1  ;;  %6798 = vst [vmem:[#allocation17_spill] sm:$0xff] %v4447_v55  ;;  %v4459_v7 = vld [vmem:[%s4178_s16 + $0x158] sm:$0xff] }
 0x12d   : > { %v4420_v2 = vadd.f32 %v994_v46, %v4259_v32  ;;  %v2358_v17 = vmax.f32 %v2356_v50, %v1734_v49  ;;  %v2380_v46 = vmax.f32 %v2378_v1, %v4407_v61  ;;  %v4442_v50 = vpop.permute.xlu1 %564  ;;  %v3015_v1 = vfloor.f32 %v855_v15  ;;  %6800 = vst [vmem:[#allocation19_spill] sm:$0xff] %v4459_v7 }
 0x12e   : > { %2938 = vmatmul.msk.f32.gmra.mxu0 %vm711_vm2, %v444_v57  ;;  %2958 = vmatmul.msk.f32.gmra.mxu2 %vm711_vm2, %v464_v58  ;;  %6797 = vst [vmem:[#allocation16_spill] sm:$0xff] %v4442_v50  ;;  %vm3018_vm5 = vcmp.lt.s32.totalorder %v992_v52, 0 }
 0x12f   : > { %2979 = vmatmul.msk.f32.gmra.mxu1 %vm711_vm2, %v444_v57  ;;  %2999 = vmatmul.msk.f32.gmra.mxu3 %vm711_vm2, %v464_v58  ;;  %v4411_v57 = vadd.f32 %v857_v38, %v4259_v32  ;;  %v4413_v58 = vpop.permute.xlu2 %539  ;;  %v2379_v38 = vmax.f32 %v2377_v0, %v4403_v53  ;;  %v4435_v32 = vld [vmem:[%s4178_s16 + $0x118] sm:$0xff]  ;;  %v2382_v60 = vmax.f32 %v2380_v46, %v4425_v29  ;;  %v3014_v0 = vceil.f32 %v855_v15  ;;  %v4463_v46 = vld [vmem:[%s4178_s16 + $0x168] sm:$0xff] }
 0x130   : > { %6792 = vst [vmem:[#allocation11_spill] sm:$0xff] %v4413_v58  ;;  %v2361_v59 = vmax.f32 %v2358_v17, %v2360_v19  ;;  %v3019_v17 = vceil.f32 %v992_v52  ;;  %v1705_v19 = vld [vmem:[%s4178_s16 + $0x178] sm:$0xff]  ;;  %vm3028_vm13 = vcmp.lt.s32.totalorder %v4420_v2, 0 }
 0x131   : > { %6795 = vst [vmem:[#allocation14_spill] sm:$0xff] %v4435_v32  ;;  %v2381_v49 = vmax.f32 %v2379_v38, %v4416_v3  ;;  %v4453_v38 = vld [vmem:[%s4178_s16 + $0x148] sm:$0xff]  ;;  %v2384_v11 = vmax.f32 %v2382_v60, %v4439_v63  ;;  %vm3023_vm12 = vcmp.lt.s32.totalorder %v4411_v57, 0 }
 0x132   : > { %6799 = vst [vmem:[#allocation18_spill] sm:$0xff] %v4453_v38  ;;  %v1715_v63 = vld [vmem:[%s4178_s16 + $0x1c8] sm:$0xff] }
 0x133   : > { %v2383_v50 = vmax.f32 %v2381_v49, %v4435_v32  ;;  %6801 = vst [vmem:[#allocation20_spill] sm:$0xff] %v4463_v46  ;;  %v2386_v56 = vmax.f32 %v2384_v11, %v4453_v38  ;;  %v3016_v49 = vsel %vm3013_vm4, %v3014_v0, %v3015_v1  ;;  %v3020_v32 = vfloor.f32 %v992_v52  ;;  %v860_v29 = vpop.f32.mrf.mxu0  ;;  %v4477_v11 = vld [vmem:[%s4178_s16 + $0x1a8] sm:$0xff]  ;;  %v1713_v38 = vld [vmem:[%s4178_s16 + $0x1b8] sm:$0xff] }
 0x134   : > { %v997_v3 = vpop.f32.mrf.mxu1  ;;  %6804 = vst [vmem:[#allocation23_spill] sm:$0xff] %v4477_v11  ;;  %v3017_v1 = vcvt.f32.s32 %v3016_v49 }
 0x135   : > { %v2385_v58 = vmax.f32 %v2383_v50, %v4447_v55  ;;  %v1709_v50 = vld [vmem:[%s4178_s16 + $0x198] sm:$0xff]  ;;  %v2388_v55 = vmax.f32 %v2386_v56, %v4463_v46  ;;  %v998_v45 = vadd.f32 %v997_v3, %v4291_v47  ;;  %v4484_v40 = vpop.permute.xlu1 %579  ;;  %v6806_v56 = vlaneseq }
 0x136   : > { %2939 = vmatmul.msk.f32.gmra.mxu0 %vm711_vm2, %v445_v39  ;;  %2959 = vmatmul.msk.f32.gmra.mxu2 %vm711_vm2, %v465_v44  ;;  %6805 = vst [vmem:[#allocation24_spill] sm:$0xff] %v4484_v40 }
 0x137   : > { %2980 = vmatmul.msk.f32.gmra.mxu1 %vm711_vm2, %v445_v39  ;;  %3000 = vmatmul.msk.f32.gmra.mxu3 %vm711_vm2, %v465_v44  ;;  %v2362_v39 = vrot.slane %v2361_v59, 4  ;;  %v4469_v44 = vld [vmem:[%s4178_s16 + $0x188] sm:$0xff]  ;;  %v2387_v15 = vmax.f32 %v2385_v58, %v4459_v7  ;;  %v4472_v60 = vpop.permute.xlu2 %554  ;;  %v861_v58 = vadd.f32 %v860_v29, %v4291_v47  ;;  %v4487_v46 = vshrl.u32 %v6806_v56, 7  ;;  %v1721_v47 = vld [vmem:[%s4178_s16 + $0x1f8] sm:$0xff] }
 0x138   : > { %6802 = vst [vmem:[#allocation21_spill] sm:$0xff] %v4469_v44  ;;  %v2390_v61 = vmax.f32 %v2388_v55, %v4469_v44  ;;  %v4491_v55 = vpop.permute.xlu0 %529  ;;  %v1723_v56 = vld [vmem:[%s4178_s16 + $0x208] sm:$0xff]  ;;  %vm3038_vm7 = vcmp.lt.s32.totalorder %v998_v45, 0 }
 0x139   : > { %6803 = vst [vmem:[#allocation22_spill] sm:$0xff] %v4472_v60  ;;  %v2389_v0 = vmax.f32 %v2387_v15, %v1705_v19  ;;  %v2363_v53 = vmax.f32 %v2361_v59, %v2362_v39  ;;  %v3021_v60 = vsel %vm3018_vm5, %v3019_v17, %v3020_v32  ;;  %v1717_v19 = vld [vmem:[%s4178_s16 + $0x1d8] sm:$0xff]  ;;  %vm3033_vm6 = vcmp.lt.s32.totalorder %v861_v58, 0  ;;  %v1719_v59 = vld [vmem:[%s4178_s16 + $0x1e8] sm:$0xff] }
 0x13a   : > { %v2392_v49 = vmax.f32 %v2390_v61, %v4477_v11  ;;  %6807 = vst [vmem:[#allocation25_spill] sm:$0xff] %v4491_v55  ;;  %v3034_v32 = vceil.f32 %v861_v58  ;;  %v3035_v17 = vfloor.f32 %v861_v58  ;;  %v3022_v39 = vcvt.f32.s32 %v3021_v60  ;;  %v1725_v11 = vld [vmem:[%s4178_s16 + $0x218] sm:$0xff]  ;;  %v1727_v58 = vld [vmem:[%s4178_s16 + $0x228] sm:$0xff] }
 0x13b   : > { %v2391_v52 = vmax.f32 %v2389_v0, %v1709_v50  ;;  %v1194_v15 = vadd.s32 16, %v4487_v46  ;;  %v1232_v50 = vmul.u32 512, %v3017_v1  ;;  %v2364_v0 = vrot.slane %v2363_v53, 2 }
 0x13c   : > { %v2394_v3 = vmax.f32 %v2392_v49, %v1715_v63  ;;  %v3036_v61 = vsel %vm3033_vm6, %v3034_v32, %v3035_v17  ;;  %v1729_v49 = vld [vmem:[%s4178_s16 + $0x238] sm:$0xff] }
 0x13d   : > { %v2393_v29 = vmax.f32 %v2391_v52, %v1713_v38  ;;  %v3037_v55 = vcvt.f32.s32 %v3036_v61  ;;  %v3039_v38 = vceil.f32 %v998_v45  ;;  %v3040_v52 = vfloor.f32 %v998_v45  ;;  %v1737_v32 = vld [vmem:[%s4178_s16 + $0x278] sm:$0x1] }
 0x13e   : > { %v2396_v44 = vmax.f32 %v2394_v3, %v1719_v59  ;;  %v2365_v41 = vmax.f32 %v2363_v53, %v2364_v0  ;;  %v4505_v59 = vadd.s32 %v1232_v50, %v4487_v46  ;;  %v1733_v3 = vld [vmem:[%s4178_s16 + $0x258] sm:$0xff]  ;;  %v2405_v53 = vsel %vm6724_vm3, %v1737_v32, -inf }
 0x13f   : > { %v2395_v40 = vmax.f32 %v2393_v29, %v1717_v19  ;;  %v4499_v63 = vpop.permute.xlu2 %569  ;;  %v1236_v43 = vmul.u32 512, %v3037_v55  ;;  %v1233_v19 = vmul.u32 512, %v3022_v39  ;;  %v1731_v29 = vld [vmem:[%s4178_s16 + $0x248] sm:$0xff]  ;;  %v3041_v7 = vsel %vm3038_vm7, %v3039_v38, %v3040_v52 }
 0x140   : > { %6808 = vst [vmem:[#allocation26_spill] sm:$0xff] %v4499_v63  ;;  %v2398_v1 = vmax.f32 %v2396_v44, %v1723_v56  ;;  %v3042_v45 = vcvt.f32.s32 %v3041_v7  ;;  %v4511_v63 = vpop.permute.xlu1 %594  ;;  %v4516_v56 = vpop.permute.xlu0 %544  ;;  %v2366_v55 = vrot.slane %v2365_v41, 1 }
 0x141   : > { %v2397_v60 = vmax.f32 %v2395_v40, %v1721_v47  ;;  %6809 = vst [vmem:[#allocation27_spill] sm:$0xff] %v4505_v59  ;;  %v4508_v37 = vadd.s32 %v1236_v43, %v1194_v15  ;;  %v1735_v40 = vld [vmem:[%s4178_s16 + $0x268] sm:$0xff]  ;;  %v4523_v7 = vadd.s32 %v1233_v19, %v4487_v46  ;;  %v446_v19 = vld [vmem:[%s6568_s2 + $0x98] sm:$0xff] }
 0x142   : > { %v2400_v61 = vmax.f32 %v2398_v1, %v1727_v58  ;;  %v4529_v58 = vmax.f32 %v2365_v41, %v2366_v55  ;;  %2940 = vmatmul.msk.f32.gmra.mxu0 %vm711_vm2, %v446_v19  ;;  %2981 = vmatmul.msk.f32.gmra.mxu1 %vm711_vm2, %v446_v19 }
 0x143   : > { %v2399_v17 = vmax.f32 %v2397_v60, %v1725_v11  ;;  %6810 = vst [vmem:[#allocation28_spill] sm:$0xff] %v4508_v37  ;;  %vm1392_vm8 = vcmp.lt.s32.totalorder %v4505_v59, %v4508_v37  ;;  %v1237_v11 = vmul.u32 512, %v3042_v45 }
 0x144   : > { %v2402_v44 = vmax.f32 %v2400_v61, %v1731_v29  ;;  %v4520_v43 = vsel %vm1392_vm8, %v4505_v59, %v4508_v37  ;;  %6811 = vst [vmem:[#allocation29_spill] sm:$0xff] %v4523_v7  ;;  %v2414_v41 = vsub.f32 %v4187_v4, %v4529_v58  ;;  %v2418_v55 = vsub.f32 %v4193_v6, %v4529_v58 }
 0x145   : > { %v2401_v47 = vmax.f32 %v2399_v17, %v1729_v49  ;;  %v4525_v0 = vadd.s32 %v1237_v11, %v1194_v15  ;;  %6813 = vst [vmem:[#allocation31_spill] sm:$0xff] %v4529_v58  ;;  %v466_v15 = vld [vmem:[%s6568_s2 + $0x138] sm:$0x1]  ;;  %v914_v17 = vpop.f32.mrf.mxu2  ;;  %v2420_v6 = vsub.f32 %v4200_v8, %v4529_v58 }
 0x146   : > { %v2404_v50 = vmax.f32 %v2402_v44, %v1735_v40  ;;  %2960 = vmatmul.msk.f32.gmra.mxu2 %vm711_vm2, %v466_v15  ;;  %3001 = vmatmul.msk.f32.gmra.mxu3 %vm711_vm2, %v466_v15  ;;  %v2494_v44 = vmul.f32 1.442695, %v2414_v41  ;;  %v3024_v15 = vceil.f32 %v4411_v57  ;;  %v3025_v41 = vfloor.f32 %v4411_v57 }
 0x147   : > { %v2403_v39 = vmax.f32 %v2401_v47, %v1733_v3  ;;  %6812 = vst [vmem:[#allocation30_spill] sm:$0xff] %v4525_v0  ;;  %vm1481_vm9 = vcmp.lt.s32.totalorder %v4523_v7, %v4525_v0  ;;  %v4535_v49 = vpop.permute.xlu2 %584  ;;  %v2416_v3 = vsub.f32 %v4190_v5, %v4529_v58  ;;  %v1051_v47 = vpop.f32.mrf.mxu3  ;;  %v2506_v57 = vmul.f32 1.442695, %v2420_v6 }
 0x148   : > { %v4533_v52 = vsel %vm1481_vm9, %v4523_v7, %v4525_v0  ;;  %v610_v32 = vpop.permute.xlu1 %609  ;;  %v4551_v61 = vpop.permute.xlu0 %559  ;;  %3442 = vpow2.f32 %v2494_v44  ;;  %v3026_v8 = vsel %vm3023_vm12, %v3024_v15, %v3025_v41 }
 0x149   : > { %v2406_v38 = vmax.f32 %v2403_v39, %v2405_v53  ;;  %v915_v40 = vadd.f32 %v914_v17, %v610_v32  ;;  %v1052_v4 = vadd.f32 %v1051_v47, %v610_v32  ;;  %v2498_v11 = vmul.f32 1.442695, %v2416_v3 }
 0x14b   : > { %v2407_v60 = vmax.f32 %v2404_v50, %v2406_v38  ;;  %vm3213_vm10 = vcmp.lt.s32.totalorder %v915_v40, 0  ;;  %v3214_v5 = vceil.f32 %v915_v40  ;;  %v3215_v38 = vfloor.f32 %v915_v40 }
 0x14c   : > { %vm3218_vm11 = vcmp.lt.s32.totalorder %v1052_v4, 0  ;;  %v3220_v19 = vfloor.f32 %v1052_v4  ;;  %3444 = vpow2.f32 %v2498_v11  ;;  %v3027_v40 = vcvt.f32.s32 %v3026_v8 }
 0x14d   : > { %v2408_v1 = vrot.slane %v2407_v60, 4  ;;  %v3216_v44 = vsel %vm3213_vm10, %v3214_v5, %v3215_v38  ;;  %v3030_v5 = vfloor.f32 %v4420_v2  ;;  %v917_v15 = vpop.f32.mrf.mxu2 }
 0x14e   : > { %v3217_v37 = vcvt.f32.s32 %v3216_v44 }
 0x14f   : > { %v2409_v29 = vmax.f32 %v2407_v60, %v2408_v1  ;;  %v4555_v50 = vpop.permute.xlu2 %599  ;;  %v3219_v60 = vceil.f32 %v1052_v4  ;;  %v3029_v4 = vceil.f32 %v4420_v2 }
 0x151   : > { %v2410_v45 = vrot.slane %v2409_v29, 2  ;;  %v4594_v8 = vsel %vm3028_vm13, %v3029_v4, %v3030_v5 }
 0x152   : > { %v3032_v4 = vcvt.f32.s32 %v4594_v8 }
 0x153   : > { %v2411_v53 = vmax.f32 %v2409_v29, %v2410_v45  ;;  %v2502_v29 = vmul.f32 1.442695, %v2418_v55  ;;  %v4570_v45 = vpop.permute.xlu0 %574  ;;  %v3443_v55 = vpop.eup %3442 }
 0x155   : > { %v2412_v39 = vrot.slane %v2411_v53, 1  ;;  %3446 = vpow2.f32 %v2502_v29  ;;  %v863_v29 = vpop.f32.mrf.mxu0 }
 0x157   : > { %v4557_v1 = vmax.f32 %v2411_v53, %v2412_v39  ;;  %v3221_v53 = vsel %vm3218_vm11, %v3219_v60, %v3220_v19  ;;  %v3445_v39 = vpop.eup %3444  ;;  %v615_v38 = vpop.permute.xlu2 %614  ;;  %v2424_v60 = vsub.f32 %v4206_v10, %v4529_v58 }
 0x158   : > { %v2654_v19 = vadd.f32 %v3445_v39, %v3443_v55  ;;  %v918_v44 = vadd.f32 %v917_v15, %v615_v38 }
 0x159   : > { %6814 = vst [vmem:[#allocation32_spill] sm:$0xff] %v4557_v1  ;;  %v2415_v32 = vsub.f32 %v4329_v21, %v4557_v1  ;;  %v2417_v17 = vsub.f32 %v4332_v23, %v4557_v1  ;;  %v2419_v3 = vsub.f32 %v4335_v25, %v4557_v1  ;;  %v2422_v21 = vsub.f32 %v4203_v9, %v4529_v58 }
 0x15a   : > { %v2421_v25 = vsub.f32 %v4342_v31, %v4557_v1  ;;  %v2423_v31 = vsub.f32 %v4345_v34, %v4557_v1  ;;  %v4597_v34 = vadd.s32 168, %v4487_v46  ;;  %v2514_v55 = vmul.f32 1.442695, %v2424_v60 }
 0x15b   : > { %v2496_v47 = vmul.f32 1.442695, %v2415_v32  ;;  %v2500_v11 = vmul.f32 1.442695, %v2417_v17  ;;  %v2504_v23 = vmul.f32 1.442695, %v2419_v3  ;;  %v3222_v32 = vcvt.f32.s32 %v3221_v53  ;;  %v3447_v6 = vpop.eup %3446  ;;  %v1054_v53 = vpop.f32.mrf.mxu3 }
 0x15c   : > { %v2510_v9 = vmul.f32 1.442695, %v2422_v21  ;;  %v2508_v41 = vmul.f32 1.442695, %v2421_v25  ;;  %v4585_v17 = vmul.u32 512, %v3217_v37  ;;  %v1055_v21 = vadd.f32 %v1054_v53, %v615_v38  ;;  %v4602_v25 = vpop.permute.xlu0 %589 }
 0x15d   : > { %3448 = vpow2.f32 %v2496_v47  ;;  %v4587_v3 = vmul.u32 512, %v3222_v32  ;;  %v4590_v47 = vadd.s32 8, %v4487_v46  ;;  %v2426_v37 = vsub.f32 %v4213_v12, %v4529_v58 }
 0x15e   : > { %3450 = vpow2.f32 %v2500_v11  ;;  %v1234_v11 = vmul.u32 512, %v3027_v40  ;;  %v2655_v39 = vadd.f32 %v3447_v6, %v2654_v19  ;;  %v2512_v32 = vmul.f32 1.442695, %v2423_v31 }
 0x15f   : > { %3452 = vpow2.f32 %v2506_v57  ;;  %v2425_v2 = vsub.f32 %v4348_v36, %v4557_v1  ;;  %v3224_v38 = vceil.f32 %v918_v44  ;;  %vm3223_vm14 = vcmp.lt.s32.totalorder %v918_v44, 0 }
 0x160   : > { %3454 = vpow2.f32 %v2504_v23  ;;  %v864_v23 = vadd.f32 %v863_v29, %v4339_v27  ;;  %v4608_v12 = vadd.s32 %v1234_v11, %v4590_v47  ;;  %vm3228_vm15 = vcmp.lt.s32.totalorder %v1055_v21, 0 }
 0x161   : > { %3456 = vpow2.f32 %v2510_v9  ;;  %v3225_v9 = vfloor.f32 %v918_v44  ;;  %v2428_v60 = vsub.f32 %v4218_v14, %v4529_v58  ;;  %v2427_v19 = vsub.f32 %v4354_v42, %v4557_v1 }
 0x162   : > { %3458 = vpow2.f32 %v2508_v41  ;;  %6815 = vst [vmem:[#allocation33_spill] sm:$0xff] %v4608_v12  ;;  %v2518_v36 = vmul.f32 1.442695, %v2426_v37  ;;  %v3044_v31 = vceil.f32 %v864_v23  ;;  %v1000_v41 = vpop.f32.mrf.mxu1  ;;  %v2516_v29 = vmul.f32 1.442695, %v2425_v2 }
 0x163   : > { %v3449_v10 = vpop.eup %3448  ;;  %3460 = vpow2.f32 %v2514_v55  ;;  %vm3043_vm0 = vcmp.lt.s32.totalorder %v864_v23, 0  ;;  %v3229_v11 = vceil.f32 %v1055_v21  ;;  %v3045_v44 = vfloor.f32 %v864_v23 }
 0x164   : > { %v3451_v57 = vpop.eup %3450  ;;  %3462 = vpow2.f32 %v2512_v32  ;;  %v3230_v59 = vfloor.f32 %v1055_v21  ;;  %v2430_v14 = vsub.f32 %v4222_v16, %v4529_v58  ;;  %v2522_v0 = vmul.f32 1.442695, %v2428_v60 }
 0x165   : > { %v3453_v40 = vpop.eup %3452  ;;  %v2700_v5 = vadd.f32 %v3451_v57, %v3449_v10  ;;  %v3226_v10 = vsel %vm3223_vm14, %v3224_v38, %v3225_v9  ;;  %v1001_v42 = vadd.f32 %v1000_v41, %v4339_v27  ;;  %v2429_v37 = vsub.f32 %v4361_v51, %v4557_v1 }
 0x166   : > { %v3455_v15 = vpop.eup %3454  ;;  %v2656_v6 = vadd.f32 %v3453_v40, %v2655_v39  ;;  %3464 = vpow2.f32 %v2518_v36  ;;  %v2520_v55 = vmul.f32 1.442695, %v2427_v19  ;;  %v3046_v39 = vsel %vm3043_vm0, %v3044_v31, %v3045_v44 }
 0x167   : > { %v3457_v53 = vpop.eup %3456  ;;  %v2701_v8 = vadd.f32 %v3455_v15, %v2700_v5  ;;  %3466 = vpow2.f32 %v2516_v29  ;;  %v3047_v2 = vcvt.f32.s32 %v3046_v39  ;;  %v1195_v40 = vadd.s32 24, %v4487_v46  ;;  %v4620_v15 = vpop.permute.xlu0 %604 }
 0x168   : > { %v3459_v57 = vpop.eup %3458  ;;  %v2657_v32 = vadd.f32 %v3457_v53, %v2656_v6  ;;  %vm3048_vm1 = vcmp.lt.s32.totalorder %v1001_v42, 0  ;;  %v3049_v38 = vceil.f32 %v1001_v42  ;;  %v3050_v9 = vfloor.f32 %v1001_v42 }
 0x169   : > { %v3461_v23 = vpop.eup %3460  ;;  %v2702_v5 = vadd.f32 %v3459_v57, %v2701_v8  ;;  %v3227_v27 = vcvt.f32.s32 %v3226_v10  ;;  %v3231_v60 = vsel %vm3228_vm15, %v3229_v11, %v3230_v59  ;;  %v2432_v51 = vsub.f32 %v4226_v18, %v4529_v58 }
 0x16a   : > { %v3463_v16 = vpop.eup %3462  ;;  %v1238_v19 = vmul.u32 512, %v3047_v2  ;;  %v2431_v36 = vsub.f32 %v4365_v54, %v4557_v1  ;;  %3468 = vpow2.f32 %v2522_v0  ;;  %v2526_v31 = vmul.f32 1.442695, %v2430_v14 }
 0x16b   : > { %v3051_v41 = vsel %vm3048_vm1, %v3049_v38, %v3050_v9  ;;  %3470 = vpow2.f32 %v2520_v55  ;;  %v2524_v29 = vmul.f32 1.442695, %v2429_v37  ;;  %v2658_v6 = vadd.f32 %v3461_v23, %v2657_v32 }
 0x16c   : > { %v4627_v53 = vadd.s32 %v1238_v19, %v1195_v40  ;;  %v3465_v8 = vpop.eup %3464  ;;  %v1235_v44 = vmul.u32 512, %v3032_v4  ;;  %v3232_v10 = vcvt.f32.s32 %v3231_v60  ;;  %v2703_v21 = vadd.f32 %v3463_v16, %v2702_v5  ;;  %v920_v16 = vpop.f32.mrf.mxu2 }
 0x16d   : > { %v3052_v59 = vcvt.f32.s32 %v3051_v41  ;;  %v3467_v11 = vpop.eup %3466  ;;  %v1274_v57 = vmul.u32 512, %v3227_v27  ;;  %v2456_v18 = vsub.f32 %v4296_v48, %v4529_v58  ;;  %v2434_v54 = vsub.f32 %v4236_v22, %v4529_v58  ;;  %v1057_v27 = vpop.f32.mrf.mxu3 }
 0x16e   : > { %6816 = vst [vmem:[#allocation34_spill] sm:$0xff] %v4627_v53  ;;  %vm1394_vm2 = vcmp.lt.s32.totalorder %v4608_v12, %v4627_v53  ;;  %3472 = vpow2.f32 %v2526_v31  ;;  %v2530_v0 = vmul.f32 1.442695, %v2432_v51  ;;  %v2433_v42 = vsub.f32 %v4378_v62, %v4557_v1 }
 0x16f   : > { %v4637_v14 = vsel %vm1394_vm2, %v4608_v12, %v4627_v53  ;;  %v1239_v4 = vmul.u32 512, %v3052_v59  ;;  %3474 = vpow2.f32 %v2524_v29  ;;  %v2528_v37 = vmul.f32 1.442695, %v2431_v36 }
 0x170   : > { %v2659_v55 = vadd.f32 %v3465_v8, %v2658_v6  ;;  %v3469_v48 = vpop.eup %3468  ;;  %v4642_v39 = vadd.s32 %v1235_v44, %v4590_v47  ;;  %v1275_v22 = vmul.u32 512, %v3232_v10  ;;  %v2704_v32 = vadd.f32 %v3467_v11, %v2703_v21 }
 0x171   : > { %v4644_v2 = vadd.s32 %v1239_v4, %v1195_v40  ;;  %v3471_v23 = vpop.eup %3470  ;;  %v4647_v5 = vadd.s32 %v1274_v57, %v4597_v34  ;;  %v2578_v38 = vmul.f32 1.442695, %v2456_v18  ;;  %v1212_v9 = vadd.s32 160, %v4487_v46  ;;  %v620_v40 = vpop.permute.xlu0 %619  ;;  %v6822_v4 = vld [vmem:[#allocation19_spill] sm:$0xff] }
 0x172   : > { %6817 = vst [vmem:[#allocation35_spill] sm:$0xff] %v4642_v39  ;;  %v2436_v62 = vsub.f32 %v4240_v24, %v4529_v58  ;;  %v2435_v47 = vsub.f32 %v4384_v13, %v4557_v1  ;;  %3476 = vpow2.f32 %v2530_v0  ;;  %v2534_v60 = vmul.f32 1.442695, %v2434_v54 }
 0x173   : > { %6818 = vst [vmem:[#allocation36_spill] sm:$0xff] %v4644_v2  ;;  %vm1483_vm4 = vcmp.lt.s32.totalorder %v4642_v39, %v4644_v2  ;;  %3478 = vpow2.f32 %v2528_v37  ;;  %v2532_v51 = vmul.f32 1.442695, %v2433_v42  ;;  %v2660_v19 = vadd.f32 %v3469_v48, %v2659_v55  ;;  %v6824_v55 = vld [vmem:[#allocation4_spill] sm:$0xff] }
 0x174   : > { %v4658_v36 = vsel %vm1483_vm4, %v4642_v39, %v4644_v2  ;;  %v3473_v31 = vpop.eup %3472  ;;  %v4661_v24 = vadd.s32 %v1275_v22, %v4597_v34  ;;  %v2705_v41 = vadd.f32 %v3471_v23, %v2704_v32  ;;  %v921_v29 = vadd.f32 %v920_v16, %v620_v40  ;;  %v3609_v2 = vld [vmem:[%s4178_s16 + $0x170] sm:$0xff] }
 0x175   : > { %v4663_v13 = vadd.f32 %v1057_v27, %v620_v40  ;;  %v3475_v6 = vpop.eup %3474  ;;  %3480 = vpow2.f32 %v2578_v38  ;;  %v4666_v8 = vadd.s32 %v4585_v17, %v1212_v9  ;;  %v4669_v44 = vadd.s32 %v4587_v3, %v1212_v9  ;;  %v6825_v38 = vld [vmem:[#allocation8_spill] sm:$0xff] }
 0x176   : > { %6819 = vst [vmem:[#allocation37_spill] sm:$0xff] %v4661_v24  ;;  %v2438_v10 = vsub.f32 %v4244_v26, %v4529_v58  ;;  %v2440_v21 = vsub.f32 %v4250_v28, %v4529_v58  ;;  %v2442_v34 = vsub.f32 %v4256_v30, %v4529_v58  ;;  %3482 = vpow2.f32 %v2534_v60  ;;  %v6821_v28 = vld [vmem:[#allocation2_spill] sm:$0xff] }
 0x177   : > { %6820 = vst [vmem:[#allocation38_spill] sm:$0xff] %v4669_v44  ;;  %v2538_v59 = vmul.f32 1.442695, %v2436_v62  ;;  %v2437_v11 = vsub.f32 %v4389_v20, %v4557_v1  ;;  %3484 = vpow2.f32 %v2532_v51  ;;  %v2536_v17 = vmul.f32 1.442695, %v2435_v47  ;;  %v6823_v20 = vld [vmem:[#allocation3_spill] sm:$0xff] }
 0x178   : > { %v2661_v57 = vadd.f32 %v3473_v31, %v2660_v19  ;;  %v3477_v18 = vpop.eup %3476  ;;  %v2444_v3 = vsub.f32 %v4262_v33, %v4529_v58  ;;  %v2446_v26 = vsub.f32 %v4266_v35, %v4529_v58  ;;  %v2448_v54 = vsub.f32 %v6821_v28, %v4529_v58 }
 0x179   : > { %v2706_v0 = vadd.f32 %v3475_v6, %v2705_v41  ;;  %v3479_v30 = vpop.eup %3478  ;;  %v2457_v42 = vsub.f32 %v6822_v4, %v4557_v1  ;;  %v2450_v37 = vsub.f32 %v6823_v20, %v4529_v58  ;;  %v2452_v48 = vsub.f32 %v6824_v55, %v4529_v58  ;;  %v6826_v41 = vld [vmem:[#allocation5_spill] sm:$0xff]  ;;  %v6829_v4 = vld [vmem:[#allocation10_spill] sm:$0xff]  ;;  %v6830_v20 = vld [vmem:[#allocation12_spill] sm:$0xff]  ;;  %v4738_v6 = vpop.f32.mrf.mxu3 }
 0x17a   : > { %v3234_v22 = vceil.f32 %v921_v29  ;;  %3486 = vpow2.f32 %v2538_v59  ;;  %v2542_v33 = vmul.f32 1.442695, %v2438_v10  ;;  %v2546_v32 = vmul.f32 1.442695, %v2440_v21  ;;  %v866_v21 = vpop.f32.mrf.mxu0 }
 0x17b   : > { %v2550_v23 = vmul.f32 1.442695, %v2442_v34  ;;  %v4691_v35 = vpop.eup %3480  ;;  %v2439_v9 = vsub.f32 %v6825_v38, %v4557_v1  ;;  %3488 = vpow2.f32 %v2536_v17  ;;  %v2540_v62 = vmul.f32 1.442695, %v2437_v11  ;;  %v6827_v11 = vld [vmem:[#allocation9_spill] sm:$0xff] }
 0x17c   : > { %v2662_v16 = vadd.f32 %v3477_v18, %v2661_v57  ;;  %v3483_v27 = vpop.eup %3482  ;;  %v4695_v47 = vmul.f32 1.442695, %v2444_v3  ;;  %v4697_v60 = vmul.f32 1.442695, %v2446_v26  ;;  %v2707_v40 = vadd.f32 %v3479_v30, %v2706_v0  ;;  %v6831_v38 = vld [vmem:[#allocation13_spill] sm:$0xff] }
 0x17d   : > { %v3235_v51 = vfloor.f32 %v921_v29  ;;  %v3485_v19 = vpop.eup %3484  ;;  %v2580_v31 = vmul.f32 1.442695, %v2457_v42  ;;  %v4701_v10 = vmul.f32 1.442695, %v2448_v54  ;;  %vm3233_vm5 = vcmp.lt.s32.totalorder %v921_v29, 0  ;;  %v6828_v54 = vld [vmem:[#allocation25_spill] sm:$0xff] }
 0x17e   : > { %3490 = vpow2.f32 %v2542_v33  ;;  %v4703_v34 = vmul.f32 1.442695, %v2450_v37  ;;  %v4705_v59 = vmul.f32 1.442695, %v2452_v48  ;;  %vm3238_vm6 = vcmp.lt.s32.totalorder %v4663_v13, 0  ;;  %v1003_v48 = vpop.f32.mrf.mxu1 }
 0x17f   : > { %v2441_v17 = vsub.f32 %v6827_v11, %v4557_v1  ;;  %3492 = vpow2.f32 %v2540_v62  ;;  %v2544_v57 = vmul.f32 1.442695, %v2439_v9  ;;  %v2663_v18 = vadd.f32 %v3483_v27, %v2662_v16 }
 0x180   : > { %v3487_v3 = vpop.eup %3486  ;;  %v2708_v26 = vadd.f32 %v3485_v19, %v2707_v40  ;;  %v4710_v28 = vsel %vm3233_vm5, %v3234_v22, %v3235_v51  ;;  %v3239_v29 = vceil.f32 %v4663_v13  ;;  %v867_v0 = vadd.f32 %v866_v21, %v6828_v54  ;;  %v6832_v40 = vld [vmem:[#allocation14_spill] sm:$0xff] }
 0x181   : > { %v3489_v30 = vpop.eup %3488  ;;  %3494 = vpow2.f32 %v2580_v31  ;;  %v2443_v42 = vsub.f32 %v6829_v4, %v4557_v1  ;;  %v2445_v37 = vsub.f32 %v6830_v20, %v4557_v1  ;;  %v3240_v55 = vfloor.f32 %v4663_v13  ;;  %v4723_v31 = vpop.f32.mrf.mxu2  ;;  %v6833_v4 = vld [vmem:[#allocation15_spill] sm:$0xff]  ;;  %v6835_v13 = vld [vmem:[#allocation18_spill] sm:$0xff] }
 0x182   : > { %3496 = vpow2.f32 %v2546_v32  ;;  %vm3053_vm7 = vcmp.lt.s32.totalorder %v867_v0, 0  ;;  %v3054_v33 = vceil.f32 %v867_v0  ;;  %v3055_v22 = vfloor.f32 %v867_v0 }
 0x183   : > { %v2447_v9 = vsub.f32 %v6831_v38, %v4557_v1  ;;  %3498 = vpow2.f32 %v2544_v57  ;;  %v2548_v62 = vmul.f32 1.442695, %v2441_v17  ;;  %v2664_v16 = vadd.f32 %v3487_v3, %v2663_v18 }
 0x184   : > { %v3491_v27 = vpop.eup %3490  ;;  %v2449_v51 = vsub.f32 %v6832_v40, %v4557_v1  ;;  %v2709_v19 = vadd.f32 %v3489_v30, %v2708_v26  ;;  %v3056_v21 = vsel %vm3053_vm7, %v3054_v33, %v3055_v22  ;;  %v1004_v11 = vadd.f32 %v1003_v48, %v6828_v54  ;;  %v6834_v30 = vld [vmem:[#allocation17_spill] sm:$0xff]  ;;  %v869_v22 = vpop.f32.mrf.mxu0 }
 0x185   : > { %v3493_v32 = vpop.eup %3492  ;;  %v2451_v0 = vsub.f32 %v6833_v4, %v4557_v1  ;;  %v3241_v20 = vsel %vm3238_vm6, %v3239_v29, %v3240_v55  ;;  %v3057_v57 = vcvt.f32.s32 %v3056_v21  ;;  %v1196_v17 = vadd.s32 32, %v4487_v46 }
 0x186   : > { %3500 = vpow2.f32 %v2550_v23  ;;  %vm3058_vm8 = vcmp.lt.s32.totalorder %v1004_v11, 0  ;;  %v3059_v18 = vceil.f32 %v1004_v11  ;;  %v3060_v3 = vfloor.f32 %v1004_v11 }
 0x187   : > { %v4731_v26 = vpop.eup %3494  ;;  %v2453_v33 = vsub.f32 %v6834_v30, %v4557_v1  ;;  %3502 = vpow2.f32 %v2548_v62  ;;  %v2665_v54 = vadd.f32 %v3491_v27, %v2664_v16  ;;  %v1240_v48 = vmul.u32 512, %v3057_v57  ;;  %v6837_v27 = vld [vmem:[#allocation6_spill] sm:$0xff] }
 0x188   : > { %v3497_v38 = vpop.eup %3496  ;;  %v2455_v29 = vsub.f32 %v6835_v13, %v4557_v1  ;;  %v2552_v55 = vmul.f32 1.442695, %v2443_v42  ;;  %v2710_v40 = vadd.f32 %v3493_v32, %v2709_v19  ;;  %v3061_v21 = vsel %vm3058_vm8, %v3059_v18, %v3060_v3  ;;  %v1006_v19 = vpop.f32.mrf.mxu1 }
 0x189   : > { %v3499_v23 = vpop.eup %3498  ;;  %v3237_v4 = vcvt.f32.s32 %v4710_v28  ;;  %v3242_v11 = vcvt.f32.s32 %v3241_v20  ;;  %v4740_v53 = vadd.s32 %v1240_v48, %v1196_v17  ;;  %v3062_v30 = vcvt.f32.s32 %v3061_v21 }
 0x18a   : > { %3504 = vpow2.f32 %v4695_v47  ;;  %v2556_v62 = vmul.f32 1.442695, %v2445_v37  ;;  %v2560_v16 = vmul.f32 1.442695, %v2447_v9  ;;  %v870_v57 = vadd.f32 %v869_v22, %v6837_v27 }
 0x18b   : > { %6836 = vst [vmem:[#allocation2_spill] sm:$0xff] %v4740_v53  ;;  %v2564_v12 = vmul.f32 1.442695, %v2449_v51  ;;  %v2666_v13 = vadd.f32 %v3497_v38, %v2665_v54  ;;  %vm1396_vm9 = vcmp.lt.s32.totalorder %v4520_v43, %v4740_v53  ;;  %v1241_v42 = vmul.u32 512, %v3062_v30  ;;  %v4753_v51 = vpop.f32.mrf.mxu2 }
 0x18c   : > { %v3501_v28 = vpop.eup %3500  ;;  %3506 = vpow2.f32 %v2552_v55  ;;  %v2568_v32 = vmul.f32 1.442695, %v2451_v0  ;;  %v2711_v20 = vadd.f32 %v3499_v23, %v2710_v40  ;;  %v4748_v18 = vsel %vm1396_vm9, %v4520_v43, %v4740_v53 }
 0x18d   : > { %v3503_v47 = vpop.eup %3502  ;;  %v1276_v37 = vmul.u32 512, %v3237_v4  ;;  %v1277_v9 = vmul.u32 512, %v3242_v11  ;;  %v4750_v3 = vadd.s32 %v1241_v42, %v1196_v17  ;;  %vm3063_vm10 = vcmp.lt.s32.totalorder %v870_v57, 0 }
 0x18e   : > { %3508 = vpow2.f32 %v4697_v60  ;;  %v3064_v54 = vceil.f32 %v870_v57  ;;  %v3065_v48 = vfloor.f32 %v870_v57  ;;  %v1007_v22 = vadd.f32 %v1006_v19, %v6837_v27  ;;  %v4772_v19 = vpop.f32.mrf.mxu3 }
 0x18f   : > { %6838 = vst [vmem:[#allocation19_spill] sm:$0xff] %v4750_v3  ;;  %3510 = vpow2.f32 %v2556_v62  ;;  %v2667_v0 = vadd.f32 %v3501_v28, %v2666_v13  ;;  %v1214_v38 = vadd.s32 176, %v4487_v46  ;;  %vm1485_vm11 = vcmp.lt.s32.totalorder %v4533_v52, %v4750_v3 }
 0x190   : > { %v3505_v43 = vpop.eup %3504  ;;  %v2712_v55 = vadd.f32 %v3503_v47, %v2711_v20  ;;  %v4761_v17 = vsel %vm1485_vm11, %v4533_v52, %v4750_v3  ;;  %v3066_v60 = vsel %vm3063_vm10, %v3064_v54, %v3065_v48  ;;  %v1197_v40 = vadd.s32 40, %v4487_v46  ;;  %v872_v52 = vpop.f32.mrf.mxu0 }
 0x191   : > { %v3067_v21 = vcvt.f32.s32 %v3066_v60  ;;  %vm3068_vm12 = vcmp.lt.s32.totalorder %v1007_v22, 0  ;;  %v3069_v23 = vceil.f32 %v1007_v22  ;;  %v3070_v4 = vfloor.f32 %v1007_v22 }
 0x192   : > { %v3507_v11 = vpop.eup %3506  ;;  %3512 = vpow2.f32 %v4701_v10  ;;  %v2572_v30 = vmul.f32 1.442695, %v2453_v33  ;;  %v6839_v62 = vsub.f32 %v6826_v41, %v4529_v58  ;;  %v4768_v57 = vmul.f32 1.442695, %v2455_v29  ;;  %v3606_v10 = vld [vmem:[%s4178_s16 + $0x160] sm:$0xff] }
 0x193   : > { %v2668_v13 = vadd.f32 %v3505_v43, %v2667_v0  ;;  %v4770_v42 = vadd.s32 %v1276_v37, %v1214_v38  ;;  %v1242_v28 = vmul.u32 512, %v3067_v21  ;;  %v3071_v20 = vsel %vm3068_vm12, %v3069_v23, %v3070_v4  ;;  %v6841_v37 = vld [vmem:[#allocation20_spill] sm:$0xff]  ;;  %v3607_v43 = vld [vmem:[%s4178_s16 + $0x180] sm:$0xff]  ;;  %v1009_v23 = vpop.f32.mrf.mxu1 }
 0x194   : > { %v2574_v27 = vmul.f32 1.442695, %v6839_v62  ;;  %v3509_v47 = vpop.eup %3508  ;;  %3514 = vpow2.f32 %v2560_v16  ;;  %v4774_v54 = vadd.s32 %v1277_v9, %v1214_v38  ;;  %v2458_v33 = vsub.f32 %v3606_v10, %v4529_v58  ;;  %v6843_v9 = vld [vmem:[#allocation21_spill] sm:$0xff] }
 0x195   : > { %v3072_v41 = vcvt.f32.s32 %v3071_v20  ;;  %v3511_v48 = vpop.eup %3510  ;;  %3516 = vpow2.f32 %v2564_v12  ;;  %v2713_v29 = vadd.f32 %v3507_v11, %v2712_v55  ;;  %v2459_v22 = vsub.f32 %v6841_v37, %v4557_v1  ;;  %v6844_v12 = vld [vmem:[#allocation11_spill] sm:$0xff]  ;;  %v4792_v11 = vld [vmem:[%s4178_s16 + $0x1a0] sm:$0xff] }
 0x196   : > { %6840 = vst [vmem:[#allocation3_spill] sm:$0xff] %v4774_v54  ;;  %v4780_v0 = vadd.s32 %v1242_v28, %v1197_v40  ;;  %3518 = vpow2.f32 %v4703_v34  ;;  %v2462_v16 = vsub.f32 %v3607_v43, %v4529_v58  ;;  %v2669_v21 = vadd.f32 %v3509_v47, %v2668_v13  ;;  %v4802_v13 = vpop.f32.mrf.mxu2  ;;  %v625_v28 = vpop.permute.xlu1 %624 }
 0x197   : > { %v1243_v60 = vmul.u32 512, %v3072_v41  ;;  %3520 = vpow2.f32 %v2568_v32  ;;  %v873_v55 = vadd.f32 %v872_v52, %v6844_v12  ;;  %v2714_v52 = vadd.f32 %v3511_v48, %v2713_v29 }
 0x198   : > { %6842 = vst [vmem:[#allocation4_spill] sm:$0xff] %v4780_v0  ;;  %vm1398_vm13 = vcmp.lt.s32.totalorder %v4637_v14, %v4780_v0  ;;  %v3513_v4 = vpop.eup %3512  ;;  %3522 = vpow2.f32 %v4705_v59  ;;  %v924_v59 = vadd.f32 %v4723_v31, %v625_v28  ;;  %v1010_v41 = vadd.f32 %v1009_v23, %v6844_v12  ;;  %v875_v34 = vpop.f32.mrf.mxu0 }
 0x199   : > { %v4798_v62 = vsel %vm1398_vm13, %v4637_v14, %v4780_v0  ;;  %v4800_v32 = vadd.s32 %v1243_v60, %v1197_v40  ;;  %3524 = vpow2.f32 %v2572_v30  ;;  %vm3073_vm14 = vcmp.lt.s32.totalorder %v873_v55, 0  ;;  %v4814_v12 = vpop.f32.mrf.mxu3 }
 0x19a   : > { %v3074_v20 = vceil.f32 %v873_v55  ;;  %v3515_v47 = vpop.eup %3514  ;;  %v3075_v10 = vfloor.f32 %v873_v55  ;;  %3526 = vpow2.f32 %v2574_v27  ;;  %v2670_v40 = vadd.f32 %v3513_v4, %v2669_v21 }
 0x19b   : > { %6845 = vst [vmem:[#allocation8_spill] sm:$0xff] %v4800_v32  ;;  %vm1487_vm15 = vcmp.lt.s32.totalorder %v4658_v36, %v4800_v32  ;;  %v3517_v14 = vpop.eup %3516  ;;  %vm3078_vm0 = vcmp.lt.s32.totalorder %v1010_v41, 0  ;;  %v3079_v31 = vceil.f32 %v1010_v41  ;;  %v3080_v60 = vfloor.f32 %v1010_v41 }
 0x19c   : > { %v4812_v30 = vsel %vm1487_vm15, %v4658_v36, %v4800_v32  ;;  %v3519_v48 = vpop.eup %3518  ;;  %v3076_v29 = vsel %vm3073_vm14, %v3074_v20, %v3075_v10  ;;  %v2715_v55 = vadd.f32 %v3515_v47, %v2714_v52  ;;  %v2582_v0 = vmul.f32 1.442695, %v2458_v33 }
 0x19d   : > { %v3521_v38 = vpop.eup %3520  ;;  %v3077_v27 = vcvt.f32.s32 %v3076_v29  ;;  %v1198_v21 = vadd.s32 48, %v4487_v46  ;;  %v3244_v4 = vceil.f32 %v924_v59  ;;  %v3245_v43 = vfloor.f32 %v924_v59 }
 0x19e   : > { %v3523_v23 = vpop.eup %3522  ;;  %v1061_v36 = vadd.f32 %v4738_v6, %v625_v28  ;;  %v3081_v53 = vsel %vm3078_vm0, %v3079_v31, %v3080_v60  ;;  %vm3243_vm1 = vcmp.lt.s32.totalorder %v924_v59, 0  ;;  %v876_v32 = vadd.f32 %v875_v34, %v4516_v56  ;;  %v1012_v28 = vpop.f32.mrf.mxu1 }
 0x19f   : > { %v3525_v20 = vpop.eup %3524  ;;  %v1244_v10 = vmul.u32 512, %v3077_v27  ;;  %v3082_v41 = vcvt.f32.s32 %v3081_v53  ;;  %3528 = vpow2.f32 %v4768_v57  ;;  %v2671_v33 = vadd.f32 %v3519_v48, %v2670_v40  ;;  %v4824_v59 = vpop.f32.mrf.mxu2 }
 0x1a0   : > { %v2584_v52 = vmul.f32 1.442695, %v2459_v22  ;;  %v2590_v47 = vmul.f32 1.442695, %v2462_v16  ;;  %v3527_v29 = vpop.eup %3526  ;;  %v2716_v3 = vadd.f32 %v3517_v14, %v2715_v55  ;;  %v2460_v39 = vsub.f32 %v3609_v2, %v4529_v58 }
 0x1a1   : > { %v4822_v7 = vadd.s32 %v1244_v10, %v1198_v21  ;;  %v1245_v6 = vmul.u32 512, %v3082_v41  ;;  %v3246_v31 = vsel %vm3243_vm1, %v3244_v4, %v3245_v43  ;;  %vm3083_vm2 = vcmp.lt.s32.totalorder %v876_v32, 0 }
 0x1a2   : > { %v3084_v53 = vceil.f32 %v876_v32  ;;  %v3085_v34 = vfloor.f32 %v876_v32  ;;  %v3249_v60 = vceil.f32 %v1061_v36  ;;  %v3250_v57 = vfloor.f32 %v1061_v36 }
 0x1a3   : > { %6847 = vst [vmem:[#allocation5_spill] sm:$0xff] %v4822_v7  ;;  %vm1400_vm4 = vcmp.lt.s32.totalorder %v4748_v18, %v4822_v7  ;;  %v4828_v22 = vadd.s32 %v1245_v6, %v1198_v21  ;;  %v2672_v16 = vadd.f32 %v3523_v23, %v2671_v33  ;;  %v1013_v40 = vadd.f32 %v1012_v28, %v4516_v56  ;;  %v3610_v6 = vld [vmem:[%s4178_s16 + $0x178] sm:$0xff] }
 0x1a4   : > { %v4832_v2 = vsel %vm1400_vm4, %v4748_v18, %v4822_v7  ;;  %v3086_v14 = vsel %vm3083_vm2, %v3084_v53, %v3085_v34  ;;  %v2717_v43 = vadd.f32 %v3521_v38, %v2716_v3  ;;  %v1199_v48 = vadd.s32 56, %v4487_v46  ;;  %v4845_v38 = vpop.f32.mrf.mxu3  ;;  %v878_v53 = vpop.f32.mrf.mxu0 }
 0x1a5   : > { %6848 = vst [vmem:[#allocation9_spill] sm:$0xff] %v4828_v22  ;;  %vm1489_vm5 = vcmp.lt.s32.totalorder %v4761_v17, %v4828_v22  ;;  %v3087_v32 = vcvt.f32.s32 %v3086_v14  ;;  %v3529_v55 = vpop.eup %3528  ;;  %vm3088_vm6 = vcmp.lt.s32.totalorder %v1013_v40, 0  ;;  %v3089_v21 = vceil.f32 %v1013_v40  ;;  %v630_v34 = vpop.permute.xlu2 %629 }
 0x1a6   : > { %v4840_v27 = vsel %vm1489_vm5, %v4761_v17, %v4828_v22  ;;  %v3090_v18 = vfloor.f32 %v1013_v40  ;;  %3530 = vpow2.f32 %v2582_v0  ;;  %v6849_v56 = vsub.f32 %v6843_v9, %v4557_v1 }
 0x1a7   : > { %vm3248_vm7 = vcmp.lt.s32.totalorder %v1061_v36, 0  ;;  %v1246_v23 = vmul.u32 512, %v3087_v32  ;;  %v6850_v4 = vsub.f32 %v4792_v11, %v4529_v58  ;;  %v3247_v41 = vcvt.f32.s32 %v3246_v31 }
 0x1a8   : > { %v2592_v3 = vmul.f32 1.442695, %v6849_v56  ;;  %v2586_v17 = vmul.f32 1.442695, %v2460_v39  ;;  %v3091_v33 = vsel %vm3088_vm6, %v3089_v21, %v3090_v18  ;;  %3532 = vpow2.f32 %v2584_v52  ;;  %v1015_v52 = vpop.f32.mrf.mxu1 }
 0x1a9   : > { %v4850_v10 = vmul.f32 1.442695, %v6850_v4  ;;  %v2461_v0 = vsub.f32 %v3610_v6, %v4557_v1  ;;  %v4854_v28 = vadd.s32 %v1246_v23, %v1199_v48  ;;  %v3092_v9 = vcvt.f32.s32 %v3091_v33 }
 0x1aa   : > { %v2673_v14 = vadd.f32 %v3527_v29, %v2672_v16  ;;  %v2718_v40 = vadd.f32 %v3525_v20, %v2717_v43  ;;  %3534 = vpow2.f32 %v2590_v47  ;;  %v3251_v32 = vsel %vm3248_vm7, %v3249_v60, %v3250_v57  ;;  %v4865_v20 = vpop.f32.mrf.mxu2 }
 0x1ab   : > { %6851 = vst [vmem:[#allocation25_spill] sm:$0xff] %v4850_v10  ;;  %3536 = vpow2.f32 %v2592_v3  ;;  %v927_v11 = vadd.f32 %v4753_v51, %v630_v34  ;;  %vm1402_vm8 = vcmp.lt.s32.totalorder %v4798_v62, %v4854_v28  ;;  %v1247_v39 = vmul.u32 512, %v3092_v9  ;;  %v6854_v51 = vld [vmem:[#allocation7_spill] sm:$0xff] }
 0x1ac   : > { %6852 = vst [vmem:[#allocation10_spill] sm:$0xff] %v4854_v28  ;;  %v1215_v31 = vadd.s32 184, %v4487_v46  ;;  %v1278_v21 = vmul.u32 512, %v3247_v41  ;;  %3538 = vpow2.f32 %v2586_v17  ;;  %v4863_v18 = vsel %vm1402_vm8, %v4798_v62, %v4854_v28  ;;  %v3531_v36 = vpop.eup %3530  ;;  %v4883_v33 = vpop.f32.mrf.mxu3 }
 0x1ad   : > { %v3252_v47 = vcvt.f32.s32 %v3251_v32  ;;  %v2588_v29 = vmul.f32 1.442695, %v2461_v0  ;;  %v4867_v60 = vadd.s32 %v1247_v39, %v1199_v48  ;;  %v879_v57 = vadd.f32 %v878_v53, %v6854_v51  ;;  %v635_v32 = vpop.permute.xlu0 %634 }
 0x1ae   : > { %v2719_v16 = vadd.f32 %v3529_v55, %v2718_v40  ;;  %v2674_v43 = vadd.f32 %v4691_v35, %v2673_v14  ;;  %v1064_v56 = vadd.f32 %v4772_v19, %v630_v34  ;;  %v1016_v3 = vadd.f32 %v1015_v52, %v6854_v51  ;;  %v3533_v23 = vpop.eup %3532 }
 0x1af   : > { %6853 = vst [vmem:[#allocation12_spill] sm:$0xff] %v4867_v60  ;;  %v3254_v4 = vceil.f32 %v927_v11  ;;  %vm1491_vm9 = vcmp.lt.s32.totalorder %v4812_v30, %v4867_v60  ;;  %vm3093_vm10 = vcmp.lt.s32.totalorder %v879_v57, 0  ;;  %v3094_v62 = vceil.f32 %v879_v57 }
 0x1b0   : > { %v4875_v41 = vpop.eup %3534  ;;  %v3255_v48 = vfloor.f32 %v927_v11  ;;  %v4879_v17 = vsel %vm1491_vm9, %v4812_v30, %v4867_v60  ;;  %v3095_v55 = vfloor.f32 %v879_v57  ;;  %vm3098_vm11 = vcmp.lt.s32.totalorder %v1016_v3, 0 }
 0x1b1   : > { %6855 = vst [vmem:[#allocation13_spill] sm:$0xff] %v4875_v41  ;;  %v4881_v35 = vpop.eup %3536  ;;  %v1279_v19 = vmul.u32 512, %v3252_v47  ;;  %vm3253_vm12 = vcmp.lt.s32.totalorder %v927_v11, 0  ;;  %v3099_v6 = vceil.f32 %v1016_v3  ;;  %v3100_v0 = vfloor.f32 %v1016_v3  ;;  %v881_v47 = vpop.f32.mrf.mxu0 }
 0x1b2   : > { %6856 = vst [vmem:[#allocation14_spill] sm:$0xff] %v4881_v35  ;;  %v3539_v9 = vpop.eup %3538  ;;  %v2675_v53 = vadd.f32 %v3531_v36, %v2674_v43  ;;  %v2720_v34 = vadd.f32 %v4731_v26, %v2719_v16  ;;  %v3259_v14 = vceil.f32 %v1064_v56  ;;  %v3096_v40 = vsel %vm3093_vm10, %v3094_v62, %v3095_v55  ;;  %v4899_v3 = vpop.f32.mrf.mxu2  ;;  %v6859_v62 = vld [vmem:[#allocation22_spill] sm:$0xff] }
 0x1b3   : > { %v3260_v30 = vfloor.f32 %v1064_v56  ;;  %v3097_v39 = vcvt.f32.s32 %v3096_v40  ;;  %v1200_v52 = vadd.s32 64, %v4487_v46  ;;  %v3101_v51 = vsel %vm3098_vm11, %v3099_v6, %v3100_v0  ;;  %v640_v0 = vpop.permute.xlu1 %639 }
 0x1b4   : > { %v3256_v11 = vsel %vm3253_vm12, %v3254_v4, %v3255_v48  ;;  %vm3258_vm13 = vcmp.lt.s32.totalorder %v1064_v56, 0  ;;  %v930_v28 = vadd.f32 %v4802_v13, %v635_v32  ;;  %v3102_v7 = vcvt.f32.s32 %v3101_v51  ;;  %v4925_v40 = vpop.f32.mrf.mxu3 }
 0x1b5   : > { %v4890_v60 = vadd.s32 %v1278_v21, %v1215_v31  ;;  %v4892_v36 = vadd.s32 %v1279_v19, %v1215_v31  ;;  %3540 = vpow2.f32 %v2588_v29  ;;  %v1248_v26 = vmul.u32 512, %v3097_v39  ;;  %v1018_v31 = vpop.f32.mrf.mxu1 }
 0x1b6   : > { %v4894_v57 = vadd.f32 %v3533_v23, %v2720_v34  ;;  %v4897_v16 = vadd.s32 192, %v4487_v46  ;;  %v1249_v43 = vmul.u32 512, %v3102_v7  ;;  %v882_v4 = vadd.f32 %v881_v47, %v6859_v62 }
 0x1b7   : > { %6857 = vst [vmem:[#allocation15_spill] sm:$0xff] %v4892_v36  ;;  %v4902_v56 = vadd.f32 %v3539_v9, %v2675_v53  ;;  %v3257_v13 = vcvt.f32.s32 %v3256_v11  ;;  %v3261_v48 = vsel %vm3258_vm13, %v3259_v14, %v3260_v30  ;;  %v4904_v21 = vadd.s32 %v1248_v26, %v1200_v52 }
 0x1b8   : > { %6858 = vst [vmem:[#allocation17_spill] sm:$0xff] %v4894_v57  ;;  %v3264_v55 = vceil.f32 %v930_v28  ;;  %v4906_v29 = vadd.s32 %v1249_v43, %v1200_v52  ;;  %vm3103_vm14 = vcmp.lt.s32.totalorder %v882_v4, 0  ;;  %v3104_v23 = vceil.f32 %v882_v4 }
 0x1b9   : > { %6860 = vst [vmem:[#allocation18_spill] sm:$0xff] %v4902_v56  ;;  %v3265_v19 = vfloor.f32 %v930_v28  ;;  %v1067_v6 = vadd.f32 %v4814_v12, %v635_v32  ;;  %vm1404_vm15 = vcmp.lt.s32.totalorder %v4832_v2, %v4904_v21  ;;  %v3105_v7 = vfloor.f32 %v882_v4  ;;  %v884_v26 = vpop.f32.mrf.mxu0 }
 0x1ba   : > { %6861 = vst [vmem:[#allocation6_spill] sm:$0xff] %v4904_v21  ;;  %vm3263_vm0 = vcmp.lt.s32.totalorder %v930_v28, 0  ;;  %v4913_v9 = vsel %vm1404_vm15, %v4832_v2, %v4904_v21  ;;  %vm1493_vm1 = vcmp.lt.s32.totalorder %v4840_v27, %v4906_v29  ;;  %v1019_v53 = vadd.f32 %v1018_v31, %v6859_v62  ;;  %v4935_v28 = vpop.f32.mrf.mxu2 }
 0x1bb   : > { %6862 = vst [vmem:[#allocation20_spill] sm:$0xff] %v4906_v29  ;;  %v4918_v34 = vpop.eup %3540  ;;  %v933_v14 = vadd.f32 %v4824_v59, %v640_v0  ;;  %v4923_v12 = vsel %vm1493_vm1, %v4840_v27, %v4906_v29  ;;  %v3106_v32 = vsel %vm3103_vm14, %v3104_v23, %v3105_v7  ;;  %v1201_v30 = vadd.s32 72, %v4487_v46 }
 0x1bc   : > { %6863 = vst [vmem:[#allocation21_spill] sm:$0xff] %v4918_v34  ;;  %v3107_v2 = vcvt.f32.s32 %v3106_v32  ;;  %vm3108_vm2 = vcmp.lt.s32.totalorder %v1019_v53, 0  ;;  %v3109_v39 = vceil.f32 %v1019_v53  ;;  %v3110_v52 = vfloor.f32 %v1019_v53  ;;  %v3611_v53 = vld [vmem:[%s4178_s16 + $0x190] sm:$0xff] }
 0x1bd   : > { %v1280_v51 = vmul.u32 512, %v3257_v13  ;;  %v3262_v47 = vcvt.f32.s32 %v3261_v48  ;;  %v3266_v11 = vsel %vm3263_vm0, %v3264_v55, %v3265_v19  ;;  %vm3268_vm4 = vcmp.lt.s32.totalorder %v1067_v6, 0  ;;  %v645_v55 = vpop.permute.xlu2 %644 }
 0x1be   : > { %v3269_v59 = vceil.f32 %v1067_v6  ;;  %v3270_v43 = vfloor.f32 %v1067_v6  ;;  %v1250_v27 = vmul.u32 512, %v3107_v2  ;;  %v3111_v62 = vsel %vm3108_vm2, %v3109_v39, %v3110_v52  ;;  %v3612_v39 = vld [vmem:[%s4178_s16 + $0x198] sm:$0xff] }
 0x1bf   : > { %v3274_v4 = vceil.f32 %v933_v14  ;;  %v3275_v31 = vfloor.f32 %v933_v14  ;;  %v1070_v23 = vadd.f32 %v4845_v38, %v640_v0  ;;  %v3112_v7 = vcvt.f32.s32 %v3111_v62 }
 0x1c0   : > { %v4931_v32 = vadd.s32 200, %v4487_v46  ;;  %vm3273_vm5 = vcmp.lt.s32.totalorder %v933_v14, 0  ;;  %v4933_v13 = vadd.s32 %v1250_v27, %v1201_v30  ;;  %v885_v48 = vadd.f32 %v884_v26, %v4551_v61  ;;  %v1021_v27 = vpop.f32.mrf.mxu1 }
 0x1c1   : > { %v1281_v19 = vmul.u32 512, %v3262_v47  ;;  %v2464_v2 = vsub.f32 %v3611_v53, %v4529_v58  ;;  %v2465_v52 = vsub.f32 %v3612_v39, %v4557_v1  ;;  %v1251_v38 = vmul.u32 512, %v3112_v7 }
 0x1c2   : > { %6864 = vst [vmem:[#allocation11_spill] sm:$0xff] %v4933_v13  ;;  %v3267_v0 = vcvt.f32.s32 %v3266_v11  ;;  %v3271_v62 = vsel %vm3268_vm4, %v3269_v59, %v3270_v43  ;;  %v936_v21 = vadd.f32 %v4865_v20, %v645_v55  ;;  %vm1406_vm6 = vcmp.lt.s32.totalorder %v4863_v18, %v4933_v13  ;;  %v4956_v20 = vpop.f32.mrf.mxu3 }
 0x1c3   : > { %v3276_v26 = vsel %vm3273_vm5, %v3274_v4, %v3275_v31  ;;  %vm3278_vm7 = vcmp.lt.s32.totalorder %v1070_v23, 0  ;;  %v4949_v47 = vsel %vm1406_vm6, %v4863_v18, %v4933_v13  ;;  %v4951_v53 = vadd.s32 %v1251_v38, %v1201_v30 }
 0x1c4   : > { %v3279_v39 = vceil.f32 %v1070_v23  ;;  %v1073_v11 = vadd.f32 %v4883_v33, %v645_v55  ;;  %vm3113_vm8 = vcmp.lt.s32.totalorder %v885_v48, 0  ;;  %v3114_v6 = vceil.f32 %v885_v48 }
 0x1c5   : > { %6865 = vst [vmem:[#allocation7_spill] sm:$0xff] %v4951_v53  ;;  %v3280_v59 = vfloor.f32 %v1070_v23  ;;  %vm1495_vm9 = vcmp.lt.s32.totalorder %v4879_v17, %v4951_v53  ;;  %v3115_v14 = vfloor.f32 %v885_v48  ;;  %v1022_v43 = vadd.f32 %v1021_v27, %v4551_v61 }
 0x1c6   : > { %vm3283_vm10 = vcmp.lt.s32.totalorder %v936_v21, 0  ;;  %v3284_v4 = vceil.f32 %v936_v21  ;;  %v3285_v18 = vfloor.f32 %v936_v21  ;;  %v4961_v30 = vsel %vm1495_vm9, %v4879_v17, %v4951_v53  ;;  %v944_v53 = vpop.f32.mrf.mxu2 }
 0x1c7   : > { %v3116_v31 = vsel %vm3113_vm8, %v3114_v6, %v3115_v14  ;;  %vm3118_vm11 = vcmp.lt.s32.totalorder %v1022_v43, 0  ;;  %v3119_v33 = vceil.f32 %v1022_v43  ;;  %v3120_v7 = vfloor.f32 %v1022_v43  ;;  %v650_v6 = vpop.permute.xlu0 %649 }
 0x1c8   : > { %v3289_v55 = vceil.f32 %v1073_v11  ;;  %v3290_v38 = vfloor.f32 %v1073_v11  ;;  %v3117_v13 = vcvt.f32.s32 %v3116_v31  ;;  %v1202_v29 = vadd.s32 80, %v4487_v46 }
 0x1c9   : > { %v1282_v22 = vmul.u32 512, %v3267_v0  ;;  %v3272_v48 = vcvt.f32.s32 %v3271_v62  ;;  %vm3288_vm12 = vcmp.lt.s32.totalorder %v1073_v11, 0  ;;  %v3121_v61 = vsel %vm3118_vm11, %v3119_v33, %v3120_v7  ;;  %v887_v62 = vpop.f32.mrf.mxu0 }
 0x1ca   : > { %v4965_v27 = vadd.s32 %v1280_v51, %v4897_v16  ;;  %v3277_v35 = vcvt.f32.s32 %v3276_v26  ;;  %v1252_v34 = vmul.u32 512, %v3117_v13  ;;  %v3122_v17 = vcvt.f32.s32 %v3121_v61 }
 0x1cb   : > { %v4968_v14 = vadd.s32 %v1281_v19, %v4897_v16  ;;  %v4970_v43 = vmul.f32 1.442695, %v2464_v2  ;;  %v3281_v31 = vsel %vm3278_vm7, %v3279_v39, %v3280_v59  ;;  %v3286_v0 = vsel %vm3283_vm10, %v3284_v4, %v3285_v18  ;;  %v1024_v2 = vpop.f32.mrf.mxu1 }
 0x1cc   : > { %v3291_v11 = vsel %vm3288_vm12, %v3289_v55, %v3290_v38  ;;  %v939_v33 = vadd.f32 %v4899_v3, %v650_v6  ;;  %v4975_v51 = vadd.s32 %v1252_v34, %v1202_v29  ;;  %v1253_v26 = vmul.u32 512, %v3122_v17  ;;  %v655_v55 = vpop.permute.xlu1 %654 }
 0x1cd   : > { %6866 = vst [vmem:[#allocation22_spill] sm:$0xff] %v4968_v14  ;;  %v4978_v13 = vadd.s32 %v1282_v22, %v4931_v32  ;;  %v1283_v7 = vmul.u32 512, %v3272_v48  ;;  %v4980_v61 = vmul.f32 1.442695, %v2465_v52  ;;  %v1218_v16 = vadd.s32 208, %v4487_v46  ;;  %v1081_v52 = vpop.f32.mrf.mxu3 }
 0x1ce   : > { %6867 = vst [vmem:[#allocation39_spill] sm:$0xff] %v4970_v43  ;;  %v1284_v19 = vmul.u32 512, %v3277_v35  ;;  %v3282_v23 = vcvt.f32.s32 %v3281_v31  ;;  %vm1408_vm13 = vcmp.lt.s32.totalorder %v4913_v9, %v4975_v51  ;;  %v4985_v21 = vadd.s32 %v1253_v26, %v1202_v29  ;;  %v6871_v35 = vld [vmem:[#allocation16_spill] sm:$0xff] }
 0x1cf   : > { %6868 = vst [vmem:[#allocation40_spill] sm:$0xff] %v4975_v51  ;;  %v3287_v3 = vcvt.f32.s32 %v3286_v0  ;;  %v3292_v34 = vcvt.f32.s32 %v3291_v11  ;;  %v1076_v39 = vadd.f32 %v4925_v40, %v650_v6  ;;  %v4990_v22 = vsel %vm1408_vm13, %v4913_v9, %v4975_v51 }
 0x1d0   : > { %6869 = vst [vmem:[#allocation41_spill] sm:$0xff] %v4980_v61  ;;  %v3294_v59 = vceil.f32 %v939_v33  ;;  %v3295_v4 = vfloor.f32 %v939_v33  ;;  %vm1497_vm14 = vcmp.lt.s32.totalorder %v4923_v12, %v4985_v21  ;;  %v888_v18 = vadd.f32 %v887_v62, %v6871_v35 }
 0x1d1   : > { %6870 = vst [vmem:[#allocation42_spill] sm:$0xff] %v4985_v21  ;;  %v4996_v29 = vadd.s32 %v1283_v7, %v4931_v32  ;;  %vm3293_vm15 = vcmp.lt.s32.totalorder %v939_v33, 0  ;;  %v5000_v40 = vsel %vm1497_vm14, %v4923_v12, %v4985_v21  ;;  %v1025_v9 = vadd.f32 %v1024_v2, %v6871_v35  ;;  %v947_v7 = vpop.f32.mrf.mxu2  ;;  %v660_v12 = vpop.permute.xlu2 %659 }
 0x1d2   : > { %v5003_v38 = vadd.s32 %v1284_v19, %v1218_v16  ;;  %v1285_v48 = vmul.u32 512, %v3282_v23  ;;  %v1219_v17 = vadd.s32 216, %v4487_v46  ;;  %v942_v6 = vadd.f32 %v4935_v28, %v655_v55  ;;  %v890_v23 = vpop.f32.mrf.mxu0  ;;  %v665_v28 = vpop.permute.xlu0 %664 }
 0x1d3   : > { %6872 = vst [vmem:[#allocation16_spill] sm:$0xff] %v4996_v29  ;;  %v1286_v31 = vmul.u32 512, %v3287_v3  ;;  %v1287_v0 = vmul.u32 512, %v3292_v34  ;;  %vm3298_vm0 = vcmp.lt.s32.totalorder %v1076_v39, 0  ;;  %v3299_v62 = vceil.f32 %v1076_v39 }
 0x1d4   : > { %v3296_v32 = vsel %vm3293_vm15, %v3294_v59, %v3295_v4  ;;  %v3300_v11 = vfloor.f32 %v1076_v39  ;;  %v3124_v33 = vceil.f32 %v888_v18  ;;  %v3125_v26 = vfloor.f32 %v888_v18 }
 0x1d5   : > { %v1079_v51 = vadd.f32 %v4956_v20, %v655_v55  ;;  %vm3123_vm1 = vcmp.lt.s32.totalorder %v888_v18, 0  ;;  %v3129_v19 = vceil.f32 %v1025_v9  ;;  %v3130_v2 = vfloor.f32 %v1025_v9  ;;  %v1084_v37 = vpop.f32.mrf.mxu3 }
 0x1d6   : > { %v3304_v35 = vceil.f32 %v942_v6  ;;  %v3305_v21 = vfloor.f32 %v942_v6  ;;  %v945_v57 = vadd.f32 %v944_v53, %v660_v12  ;;  %vm3128_vm2 = vcmp.lt.s32.totalorder %v1025_v9, 0 }
 0x1d7   : > { %v5008_v3 = vadd.s32 %v1285_v48, %v1218_v16  ;;  %v5010_v34 = vadd.s32 %v1286_v31, %v1219_v17  ;;  %vm3303_vm4 = vcmp.lt.s32.totalorder %v942_v6, 0  ;;  %v1082_v59 = vadd.f32 %v1081_v52, %v660_v12  ;;  %v1027_v52 = vpop.f32.mrf.mxu1 }
 0x1d8   : > { %v5012_v4 = vadd.s32 %v1287_v0, %v1219_v17  ;;  %v3297_v41 = vcvt.f32.s32 %v3296_v32  ;;  %v3126_v56 = vsel %vm3123_vm1, %v3124_v33, %v3125_v26  ;;  %v948_v20 = vadd.f32 %v947_v7, %v665_v28 }
 0x1d9   : > { %6873 = vst [vmem:[#allocation43_spill] sm:$0xff] %v5008_v3  ;;  %v3301_v18 = vsel %vm3298_vm0, %v3299_v62, %v3300_v11  ;;  %v3309_v55 = vceil.f32 %v1079_v51  ;;  %v3310_v61 = vfloor.f32 %v1079_v51  ;;  %v3131_v1 = vsel %vm3128_vm2, %v3129_v19, %v3130_v2  ;;  %v6875_v62 = vld [vmem:[#allocation26_spill] sm:$0xff]  ;;  %v950_v12 = vpop.f32.mrf.mxu2 }
 0x1da   : > { %6874 = vst [vmem:[#allocation44_spill] sm:$0xff] %v5012_v4  ;;  %v3306_v53 = vsel %vm3303_vm4, %v3304_v35, %v3305_v21  ;;  %vm3308_vm5 = vcmp.lt.s32.totalorder %v1079_v51, 0  ;;  %vm3313_vm6 = vcmp.lt.s32.totalorder %v945_v57, 0  ;;  %v3314_v16 = vceil.f32 %v945_v57  ;;  %v893_v35 = vpop.f32.mrf.mxu0  ;;  %v680_v4 = vpop.permute.xlu0 %679 }
 0x1db   : > { %v3315_v9 = vfloor.f32 %v945_v57  ;;  %v3319_v48 = vceil.f32 %v1082_v59  ;;  %v3320_v31 = vfloor.f32 %v1082_v59  ;;  %v3127_v6 = vcvt.f32.s32 %v3126_v56 }
 0x1dc   : > { %vm3318_vm7 = vcmp.lt.s32.totalorder %v1082_v59, 0  ;;  %v3132_v17 = vcvt.f32.s32 %v3131_v1  ;;  %v3324_v0 = vceil.f32 %v948_v20  ;;  %v3325_v32 = vfloor.f32 %v948_v20 }
 0x1dd   : > { %v3311_v33 = vsel %vm3308_vm5, %v3309_v55, %v3310_v61  ;;  %vm3323_vm8 = vcmp.lt.s32.totalorder %v948_v20, 0  ;;  %v1085_v39 = vadd.f32 %v1084_v37, %v665_v28  ;;  %v891_v11 = vadd.f32 %v890_v23, %v6875_v62 }
 0x1de   : > { %v1220_v26 = vadd.s32 224, %v4487_v46  ;;  %v1288_v21 = vmul.u32 512, %v3297_v41  ;;  %v3302_v51 = vcvt.f32.s32 %v3301_v18  ;;  %v1203_v7 = vadd.s32 88, %v4487_v46 }
 0x1df   : > { %v3316_v19 = vsel %vm3313_vm6, %v3314_v16, %v3315_v9  ;;  %v3321_v56 = vsel %vm3318_vm7, %v3319_v48, %v3320_v31  ;;  %v1254_v2 = vmul.u32 512, %v3127_v6  ;;  %v1028_v1 = vadd.f32 %v1027_v52, %v6875_v62  ;;  %v1087_v31 = vpop.f32.mrf.mxu3 }
 0x1e0   : > { %v3307_v59 = vcvt.f32.s32 %v3306_v53  ;;  %v3312_v61 = vcvt.f32.s32 %v3311_v33  ;;  %v1255_v55 = vmul.u32 512, %v3132_v17  ;;  %v3326_v37 = vsel %vm3323_vm8, %v3324_v0, %v3325_v32  ;;  %v1030_v33 = vpop.f32.mrf.mxu1 }
 0x1e1   : > { %v3329_v23 = vceil.f32 %v1085_v39  ;;  %v3330_v28 = vfloor.f32 %v1085_v39  ;;  %v3134_v10 = vceil.f32 %v891_v11  ;;  %v3135_v41 = vfloor.f32 %v891_v11 }
 0x1e2   : > { %v3317_v18 = vcvt.f32.s32 %v3316_v19  ;;  %v3322_v58 = vcvt.f32.s32 %v3321_v56  ;;  %vm3328_vm9 = vcmp.lt.s32.totalorder %v1085_v39, 0  ;;  %vm3133_vm10 = vcmp.lt.s32.totalorder %v891_v11, 0 }
 0x1e3   : > { %v1289_v57 = vmul.u32 512, %v3302_v51  ;;  %v5021_v16 = vadd.s32 %v1254_v2, %v1203_v7  ;;  %v3139_v9 = vceil.f32 %v1028_v1  ;;  %v3140_v48 = vfloor.f32 %v1028_v1  ;;  %v670_v2 = vpop.permute.xlu1 %669 }
 0x1e4   : > { %v1221_v53 = vadd.s32 232, %v4487_v46  ;;  %v5024_v6 = vadd.s32 %v1255_v55, %v1203_v7  ;;  %v3327_v20 = vcvt.f32.s32 %v3326_v37  ;;  %vm3138_vm11 = vcmp.lt.s32.totalorder %v1028_v1, 0  ;;  %v896_v37 = vpop.f32.mrf.mxu0 }
 0x1e5   : > { %6876 = vst [vmem:[#allocation26_spill] sm:$0xff] %v5021_v16  ;;  %v1290_v52 = vmul.u32 512, %v3307_v59  ;;  %v1291_v17 = vmul.u32 512, %v3312_v61  ;;  %v3331_v0 = vsel %vm3328_vm9, %v3329_v23, %v3330_v28  ;;  %v3136_v32 = vsel %vm3133_vm10, %v3134_v10, %v3135_v41  ;;  %v953_v59 = vpop.f32.mrf.mxu2 }
 0x1e6   : > { %6877 = vst [vmem:[#allocation45_spill] sm:$0xff] %v5024_v6  ;;  %v5026_v62 = vadd.s32 %v1288_v21, %v1220_v26  ;;  %v1222_v39 = vadd.s32 240, %v4487_v46  ;;  %v1292_v11 = vmul.u32 512, %v3317_v18  ;;  %v1293_v51 = vmul.u32 512, %v3322_v58 }
 0x1e7   : > { %v5029_v19 = vadd.s32 %v1289_v57, %v1220_v26  ;;  %vm1410_vm12 = vcmp.lt.s32.totalorder %v4949_v47, %v5021_v16  ;;  %v1223_v7 = vadd.s32 248, %v4487_v46  ;;  %v3141_v56 = vsel %vm3138_vm11, %v3139_v9, %v3140_v48 }
 0x1e8   : > { %6878 = vst [vmem:[#allocation46_spill] sm:$0xff] %v5026_v62  ;;  %vm1499_vm13 = vcmp.lt.s32.totalorder %v4961_v30, %v5024_v6  ;;  %v1294_v10 = vmul.u32 512, %v3327_v20  ;;  %v3332_v1 = vcvt.f32.s32 %v3331_v0  ;;  %v3137_v21 = vcvt.f32.s32 %v3136_v32 }
 0x1e9   : > { %6879 = vst [vmem:[#allocation47_spill] sm:$0xff] %v5029_v19  ;;  %v5036_v61 = vadd.s32 %v1290_v52, %v1221_v53  ;;  %v5038_v55 = vadd.s32 %v1291_v17, %v1221_v53  ;;  %v951_v58 = vadd.f32 %v950_v12, %v670_v2  ;;  %v894_v26 = vadd.f32 %v893_v35, %v4570_v45  ;;  %v6885_v52 = vld [vmem:[#allocation24_spill] sm:$0xff] }
 0x1ea   : > { %v5041_v23 = vadd.s32 %v1292_v11, %v1222_v39  ;;  %v5043_v28 = vadd.s32 %v1293_v51, %v1222_v39  ;;  %v3142_v41 = vcvt.f32.s32 %v3141_v56  ;;  %v1031_v18 = vadd.f32 %v1030_v33, %v4570_v45  ;;  %v1090_v39 = vpop.f32.mrf.mxu3 }
 0x1eb   : > { %6880 = vst [vmem:[#allocation48_spill] sm:$0xff] %v5036_v61  ;;  %v5051_v57 = vsel %vm1410_vm12, %v4949_v47, %v5021_v16  ;;  %v5055_v12 = vsel %vm1499_vm13, %v4961_v30, %v5024_v6  ;;  %v1204_v35 = vadd.s32 96, %v4487_v46  ;;  %v1088_v9 = vadd.f32 %v1087_v31, %v670_v2  ;;  %v675_v47 = vpop.permute.xlu2 %674  ;;  %v1033_v2 = vpop.f32.mrf.mxu1 }
 0x1ec   : > { %6881 = vst [vmem:[#allocation49_spill] sm:$0xff] %v5038_v55  ;;  %v5058_v48 = vadd.s32 %v1294_v10, %v1223_v7  ;;  %v1295_v53 = vmul.u32 512, %v3332_v1  ;;  %v1256_v20 = vmul.u32 512, %v3137_v21  ;;  %v897_v45 = vadd.f32 %v896_v37, %v6885_v52 }
 0x1ed   : > { %6882 = vst [vmem:[#allocation50_spill] sm:$0xff] %v5041_v23  ;;  %v3334_v17 = vceil.f32 %v951_v58  ;;  %v3335_v0 = vfloor.f32 %v951_v58  ;;  %v3144_v32 = vceil.f32 %v894_v26  ;;  %v3145_v33 = vfloor.f32 %v894_v26 }
 0x1ee   : > { %6883 = vst [vmem:[#allocation51_spill] sm:$0xff] %v5043_v28  ;;  %v1257_v11 = vmul.u32 512, %v3142_v41  ;;  %vm3143_vm14 = vcmp.lt.s32.totalorder %v894_v26, 0  ;;  %v3149_v51 = vceil.f32 %v1031_v18  ;;  %v3150_v30 = vfloor.f32 %v1031_v18 }
 0x1ef   : > { %6884 = vst [vmem:[#allocation52_spill] sm:$0xff] %v5058_v48  ;;  %v3339_v56 = vceil.f32 %v1088_v9  ;;  %v3340_v16 = vfloor.f32 %v1088_v9  ;;  %vm3148_vm15 = vcmp.lt.s32.totalorder %v1031_v18, 0  ;;  %v954_v31 = vadd.f32 %v953_v59, %v675_v47  ;;  %v956_v48 = vpop.f32.mrf.mxu2 }
 0x1f0   : > { %vm3333_vm0 = vcmp.lt.s32.totalorder %v951_v58, 0  ;;  %vm3338_vm1 = vcmp.lt.s32.totalorder %v1088_v9, 0  ;;  %v3154_v10 = vceil.f32 %v897_v45  ;;  %v3155_v1 = vfloor.f32 %v897_v45 }
 0x1f1   : > { %v5061_v21 = vadd.s32 %v1295_v53, %v1223_v7  ;;  %v1224_v37 = vadd.s32 256, %v4487_v46  ;;  %v3146_v6 = vsel %vm3143_vm14, %v3144_v32, %v3145_v33  ;;  %vm3153_vm2 = vcmp.lt.s32.totalorder %v897_v45, 0 }
 0x1f2   : > { %v5064_v43 = vadd.s32 %v1256_v20, %v1204_v35  ;;  %v3151_v26 = vsel %vm3148_vm15, %v3149_v51, %v3150_v30  ;;  %v1091_v41 = vadd.f32 %v1090_v39, %v675_v47  ;;  %v1034_v55 = vadd.f32 %v1033_v2, %v6885_v52  ;;  %v899_v52 = vpop.f32.mrf.mxu0 }
 0x1f3   : > { %6886 = vst [vmem:[#allocation24_spill] sm:$0xff] %v5061_v21  ;;  %v5067_v18 = vadd.s32 %v1257_v11, %v1204_v35  ;;  %v3336_v59 = vsel %vm3333_vm0, %v3334_v17, %v3335_v0  ;;  %v3341_v58 = vsel %vm3338_vm1, %v3339_v56, %v3340_v16  ;;  %v3344_v9 = vceil.f32 %v954_v31  ;;  %v1093_v17 = vpop.f32.mrf.mxu3 }
 0x1f4   : > { %6887 = vst [vmem:[#allocation53_spill] sm:$0xff] %v5064_v43  ;;  %v3147_v29 = vcvt.f32.s32 %v3146_v6  ;;  %v3156_v7 = vsel %vm3153_vm2, %v3154_v10, %v3155_v1  ;;  %v3159_v53 = vceil.f32 %v1034_v55  ;;  %v3160_v21 = vfloor.f32 %v1034_v55 }
 0x1f5   : > { %6888 = vst [vmem:[#allocation54_spill] sm:$0xff] %v5067_v18  ;;  %v3152_v36 = vcvt.f32.s32 %v3151_v26  ;;  %v3345_v32 = vfloor.f32 %v954_v31  ;;  %vm3158_vm4 = vcmp.lt.s32.totalorder %v1034_v55, 0  ;;  %v957_v20 = vadd.f32 %v956_v48, %v680_v4 }
 0x1f6   : > { %v3337_v45 = vcvt.f32.s32 %v3336_v59  ;;  %vm3343_vm5 = vcmp.lt.s32.totalorder %v954_v31, 0  ;;  %v3349_v33 = vceil.f32 %v1091_v41  ;;  %v3350_v39 = vfloor.f32 %v1091_v41 }
 0x1f7   : > { %vm1412_vm6 = vcmp.lt.s32.totalorder %v4990_v22, %v5064_v43  ;;  %v3342_v35 = vcvt.f32.s32 %v3341_v58  ;;  %vm3348_vm7 = vcmp.lt.s32.totalorder %v1091_v41, 0  ;;  %v3157_v16 = vcvt.f32.s32 %v3156_v7  ;;  %v1036_v41 = vpop.f32.mrf.mxu1 }
 0x1f8   : > { %vm1501_vm8 = vcmp.lt.s32.totalorder %v5000_v40, %v5067_v18  ;;  %v1205_v6 = vadd.s32 104, %v4487_v46  ;;  %v1258_v0 = vmul.u32 512, %v3147_v29  ;;  %v3161_v55 = vsel %vm3158_vm4, %v3159_v53, %v3160_v21 }
 0x1f9   : > { %v1259_v48 = vmul.u32 512, %v3152_v36  ;;  %v3346_v47 = vsel %vm3343_vm5, %v3344_v9, %v3345_v32  ;;  %v3354_v11 = vceil.f32 %v957_v20  ;;  %v3355_v51 = vfloor.f32 %v957_v20  ;;  %v959_v32 = vpop.f32.mrf.mxu2 }
 0x1fa   : > { %v1296_v30 = vmul.u32 512, %v3337_v45  ;;  %v3351_v56 = vsel %vm3348_vm7, %v3349_v33, %v3350_v39  ;;  %vm3353_vm9 = vcmp.lt.s32.totalorder %v957_v20, 0  ;;  %v900_v31 = vadd.f32 %v899_v52, %v4535_v49 }
 0x1fb   : > { %v1297_v2 = vmul.u32 512, %v3342_v35  ;;  %v1206_v10 = vadd.s32 112, %v4487_v46  ;;  %v1260_v1 = vmul.u32 512, %v3157_v16  ;;  %v3162_v26 = vcvt.f32.s32 %v3161_v55 }
 0x1fc   : > { %v1413_v36 = vsel %vm1412_vm6, %v4990_v22, %v5064_v43  ;;  %v5086_v29 = vsel %vm1501_vm8, %v5000_v40, %v5067_v18  ;;  %v5088_v21 = vadd.s32 %v1258_v0, %v1205_v6  ;;  %v3347_v59 = vcvt.f32.s32 %v3346_v47  ;;  %v5494_v18 = vld [vmem:[%s4178_s16 + $0x238] sm:$0xff] }
 0x1fd   : > { %v5090_v58 = vadd.s32 %v1259_v48, %v1205_v6  ;;  %v3352_v9 = vcvt.f32.s32 %v3351_v56  ;;  %v3356_v7 = vsel %vm3353_vm9, %v3354_v11, %v3355_v51  ;;  %v1094_v53 = vadd.f32 %v1093_v17, %v680_v4  ;;  %v902_v17 = vpop.f32.mrf.mxu0 }
 0x1fe   : > { %6889 = vst [vmem:[#allocation55_spill] sm:$0xff] %v5088_v21  ;;  %v5092_v20 = vadd.s32 %v1296_v30, %v1224_v37  ;;  %v3164_v45 = vceil.f32 %v900_v31  ;;  %v3165_v22 = vfloor.f32 %v900_v31  ;;  %v1037_v33 = vadd.f32 %v1036_v41, %v4535_v49  ;;  %v685_v30 = vpop.permute.xlu1 %684 }
 0x1ff   : > { %6890 = vst [vmem:[#allocation56_spill] sm:$0xff] %v5090_v58  ;;  %v5095_v39 = vadd.s32 %v1297_v2, %v1224_v37  ;;  %v5097_v52 = vadd.s32 %v1260_v1, %v1206_v10  ;;  %v1261_v40 = vmul.u32 512, %v3162_v26  ;;  %vm3163_vm10 = vcmp.lt.s32.totalorder %v900_v31, 0  ;;  %v1096_v37 = vpop.f32.mrf.mxu3 }
 0x200   : > { %6891 = vst [vmem:[#allocation57_spill] sm:$0xff] %v5092_v20  ;;  %vm1414_vm11 = vcmp.lt.s32.totalorder %v5051_v57, %v5088_v21  ;;  %v1225_v35 = vadd.s32 264, %v4487_v46  ;;  %v1298_v16 = vmul.u32 512, %v3347_v59  ;;  %v3357_v4 = vcvt.f32.s32 %v3356_v7 }
 0x201   : > { %6892 = vst [vmem:[#allocation58_spill] sm:$0xff] %v5095_v39  ;;  %vm1503_vm12 = vcmp.lt.s32.totalorder %v5055_v12, %v5090_v58  ;;  %v1299_v6 = vmul.u32 512, %v3352_v9  ;;  %v3359_v0 = vceil.f32 %v1094_v53  ;;  %v3360_v49 = vfloor.f32 %v1094_v53  ;;  %v1039_v9 = vpop.f32.mrf.mxu1 }
 0x202   : > { %6893 = vst [vmem:[#allocation59_spill] sm:$0xff] %v5097_v52  ;;  %vm3358_vm13 = vcmp.lt.s32.totalorder %v1094_v53, 0  ;;  %v3166_v55 = vsel %vm3163_vm10, %v3164_v45, %v3165_v22  ;;  %v3169_v48 = vceil.f32 %v1037_v33  ;;  %v3170_v47 = vfloor.f32 %v1037_v33 }
 0x203   : > { %vm1416_vm14 = vcmp.lt.s32.totalorder %v1413_v36, %v5097_v52  ;;  %v5105_v11 = vadd.s32 %v1261_v40, %v1206_v10  ;;  %vm3168_vm15 = vcmp.lt.s32.totalorder %v1037_v33, 0  ;;  %v903_v51 = vadd.f32 %v902_v17, %v4602_v25 }
 0x204   : > { %v5113_v56 = vsel %vm1414_vm11, %v5051_v57, %v5088_v21  ;;  %v5115_v31 = vadd.s32 %v1298_v16, %v1225_v35  ;;  %v1226_v2 = vadd.s32 272, %v4487_v46  ;;  %v1300_v1 = vmul.u32 512, %v3357_v4  ;;  %v690_v4 = vpop.permute.xlu2 %689 }
 0x205   : > { %6894 = vst [vmem:[#allocation60_spill] sm:$0xff] %v5105_v11  ;;  %v5123_v10 = vsel %vm1503_vm12, %v5055_v12, %v5090_v58  ;;  %v3361_v26 = vsel %vm3358_vm13, %v3359_v0, %v3360_v49  ;;  %v3167_v41 = vcvt.f32.s32 %v3166_v55  ;;  %v960_v59 = vadd.f32 %v959_v32, %v685_v30  ;;  %v962_v12 = vpop.f32.mrf.mxu2 }
 0x206   : > { %6895 = vst [vmem:[#allocation61_spill] sm:$0xff] %v5115_v31  ;;  %v5125_v7 = vadd.s32 %v1299_v6, %v1225_v35  ;;  %v5128_v57 = vsel %vm1416_vm14, %v1413_v36, %v5097_v52  ;;  %v3171_v53 = vsel %vm3168_vm15, %v3169_v48, %v3170_v47  ;;  %v1097_v45 = vadd.f32 %v1096_v37, %v685_v30  ;;  %v905_v48 = vpop.f32.mrf.mxu0 }
 0x207   : > { %vm1505_vm0 = vcmp.lt.s32.totalorder %v5086_v29, %v5105_v11  ;;  %v1207_v22 = vadd.s32 120, %v4487_v46  ;;  %vm3173_vm1 = vcmp.lt.s32.totalorder %v903_v51, 0  ;;  %v3174_v33 = vceil.f32 %v903_v51 }
 0x208   : > { %6896 = vst [vmem:[#allocation62_spill] sm:$0xff] %v5125_v7  ;;  %v5133_v40 = vadd.s32 %v1300_v1, %v1226_v2  ;;  %v3362_v16 = vcvt.f32.s32 %v3361_v26  ;;  %v3175_v32 = vfloor.f32 %v903_v51  ;;  %v1040_v35 = vadd.f32 %v1039_v9, %v4602_v25  ;;  %v1099_v1 = vpop.f32.mrf.mxu3 }
 0x209   : > { %v1262_v17 = vmul.u32 512, %v3167_v41  ;;  %v3172_v36 = vcvt.f32.s32 %v3171_v53  ;;  %v3364_v6 = vceil.f32 %v960_v59  ;;  %v3365_v0 = vfloor.f32 %v960_v59 }
 0x20a   : > { %6897 = vst [vmem:[#allocation63_spill] sm:$0xff] %v5133_v40  ;;  %vm3363_vm2 = vcmp.lt.s32.totalorder %v960_v59, 0  ;;  %v3369_v49 = vceil.f32 %v1097_v45  ;;  %v3176_v37 = vsel %vm3173_vm1, %v3174_v33, %v3175_v32  ;;  %v963_v55 = vadd.f32 %v962_v12, %v690_v4 }
 0x20b   : > { %v3370_v47 = vfloor.f32 %v1097_v45  ;;  %v3177_v30 = vcvt.f32.s32 %v3176_v37  ;;  %v3179_v58 = vceil.f32 %v1040_v35  ;;  %v3180_v52 = vfloor.f32 %v1040_v35 }
 0x20c   : > { %v5141_v25 = vsel %vm1505_vm0, %v5086_v29, %v5105_v11  ;;  %v1301_v51 = vmul.u32 512, %v3362_v16  ;;  %vm3368_vm4 = vcmp.lt.s32.totalorder %v1097_v45, 0  ;;  %vm3178_vm5 = vcmp.lt.s32.totalorder %v1040_v35, 0  ;;  %v1042_v11 = vpop.f32.mrf.mxu1 }
 0x20d   : > { %v5143_v26 = vadd.s32 %v1262_v17, %v1207_v22  ;;  %v1263_v41 = vmul.u32 512, %v3172_v36  ;;  %v3366_v9 = vsel %vm3363_vm2, %v3364_v6, %v3365_v0  ;;  %v906_v53 = vadd.f32 %v905_v48, %v4511_v63  ;;  %v965_v6 = vpop.f32.mrf.mxu2 }
 0x20e   : > { %v1208_v33 = vadd.s32 128, %v4487_v46  ;;  %v1264_v12 = vmul.u32 512, %v3177_v30  ;;  %v3374_v32 = vceil.f32 %v963_v55  ;;  %v3375_v37 = vfloor.f32 %v963_v55 }
 0x20f   : > { %v3371_v21 = vsel %vm3368_vm4, %v3369_v49, %v3370_v47  ;;  %v3181_v43 = vsel %vm3178_vm5, %v3179_v58, %v3180_v52  ;;  %vm3373_vm6 = vcmp.lt.s32.totalorder %v963_v55, 0  ;;  %v1100_v29 = vadd.f32 %v1099_v1, %v690_v4  ;;  %v695_v4 = vpop.permute.xlu0 %694 }
 0x210   : > { %v3367_v16 = vcvt.f32.s32 %v3366_v9  ;;  %v1227_v45 = vadd.s32 280, %v4487_v46  ;;  %vm3183_vm7 = vcmp.lt.s32.totalorder %v906_v53, 0  ;;  %v3184_v35 = vceil.f32 %v906_v53  ;;  %v908_v9 = vpop.f32.mrf.mxu0 }
 0x211   : > { %v5149_v17 = vadd.s32 %v1301_v51, %v1226_v2  ;;  %vm1418_vm8 = vcmp.lt.s32.totalorder %v5113_v56, %v5143_v26  ;;  %v5153_v59 = vadd.s32 %v1263_v41, %v1207_v22  ;;  %v3185_v36 = vfloor.f32 %v906_v53  ;;  %v1102_v41 = vpop.f32.mrf.mxu3 }
 0x212   : > { %v3372_v0 = vcvt.f32.s32 %v3371_v21  ;;  %v5155_v49 = vadd.s32 %v1264_v12, %v1208_v33  ;;  %v3182_v58 = vcvt.f32.s32 %v3181_v43  ;;  %v3376_v52 = vsel %vm3373_vm6, %v3374_v32, %v3375_v37 }
 0x213   : > { %6898 = vst [vmem:[#allocation64_spill] sm:$0xff] %v5149_v17  ;;  %v3379_v55 = vceil.f32 %v1100_v29  ;;  %v3380_v48 = vfloor.f32 %v1100_v29  ;;  %v3186_v47 = vsel %vm3183_vm7, %v3184_v35, %v3185_v36  ;;  %v1043_v30 = vadd.f32 %v1042_v11, %v4511_v63 }
 0x214   : > { %6899 = vst [vmem:[#allocation65_spill] sm:$0xff] %v5153_v59  ;;  %v1302_v2 = vmul.u32 512, %v3367_v16  ;;  %vm3378_vm9 = vcmp.lt.s32.totalorder %v1100_v29, 0  ;;  %v3187_v1 = vcvt.f32.s32 %v3186_v47  ;;  %v966_v51 = vadd.f32 %v965_v6, %v695_v4 }
 0x215   : > { %vm1507_vm10 = vcmp.lt.s32.totalorder %v5123_v10, %v5153_v59  ;;  %vm3188_vm11 = vcmp.lt.s32.totalorder %v1043_v30, 0  ;;  %v3189_v21 = vceil.f32 %v1043_v30  ;;  %v3190_v22 = vfloor.f32 %v1043_v30 }
 0x216   : > { %v1303_v43 = vmul.u32 512, %v3372_v0  ;;  %vm1420_vm12 = vcmp.lt.s32.totalorder %v5128_v57, %v5155_v49  ;;  %v1265_v53 = vmul.u32 512, %v3182_v58  ;;  %v3377_v12 = vcvt.f32.s32 %v3376_v52  ;;  %v1045_v52 = vpop.f32.mrf.mxu1 }
 0x217   : > { %v3381_v32 = vsel %vm3378_vm9, %v3379_v55, %v3380_v48  ;;  %v1209_v63 = vadd.s32 136, %v4487_v46  ;;  %v1266_v11 = vmul.u32 512, %v3187_v1  ;;  %v3191_v37 = vsel %vm3188_vm11, %v3189_v21, %v3190_v22 }
 0x218   : > { %v3192_v29 = vcvt.f32.s32 %v3191_v37  ;;  %v3384_v16 = vceil.f32 %v966_v51  ;;  %v3385_v35 = vfloor.f32 %v966_v51  ;;  %v1103_v36 = vadd.f32 %v1102_v41, %v695_v4 }
 0x219   : > { %v1419_v6 = vsel %vm1418_vm8, %v5113_v56, %v5143_v26  ;;  %v5168_v0 = vadd.s32 %v1302_v2, %v1227_v45  ;;  %vm3383_vm13 = vcmp.lt.s32.totalorder %v966_v51, 0  ;;  %v909_v58 = vadd.f32 %v908_v9, %v4555_v50 }
 0x21a   : > { %v1508_v55 = vsel %vm1507_vm10, %v5123_v10, %v5153_v59  ;;  %v5176_v48 = vadd.s32 %v1265_v53, %v1208_v33  ;;  %v1228_v4 = vadd.s32 288, %v4487_v46  ;;  %v3382_v47 = vcvt.f32.s32 %v3381_v32  ;;  %v6933_v59 = vld [vmem:[#allocation17_spill] sm:$0xff] }
 0x21b   : > { %6900 = vst [vmem:[#allocation66_spill] sm:$0xff] %v5168_v0  ;;  %v5179_v30 = vadd.s32 %v1303_v43, %v1227_v45  ;;  %v1421_v56 = vsel %vm1420_vm12, %v5128_v57, %v5155_v49  ;;  %v1304_v2 = vmul.u32 512, %v3377_v12  ;;  %v1267_v1 = vmul.u32 512, %v3192_v29  ;;  %v911_v57 = vpop.f32.mrf.mxu0 }
 0x21c   : > { %6901 = vst [vmem:[#allocation67_spill] sm:$0xff] %v5176_v48  ;;  %v5186_v51 = vadd.s32 %v1266_v11, %v1209_v63  ;;  %v3386_v9 = vsel %vm3383_vm13, %v3384_v16, %v3385_v35  ;;  %v3389_v21 = vceil.f32 %v1103_v36  ;;  %vm3193_vm14 = vcmp.lt.s32.totalorder %v909_v58, 0  ;;  %v968_v11 = vpop.f32.mrf.mxu2 }
 0x21d   : > { %6902 = vst [vmem:[#allocation68_spill] sm:$0xff] %v5179_v30  ;;  %v3390_v10 = vfloor.f32 %v1103_v36  ;;  %v3194_v33 = vceil.f32 %v909_v58  ;;  %v3195_v22 = vfloor.f32 %v909_v58  ;;  %v1046_v41 = vadd.f32 %v1045_v52, %v4555_v50 }
 0x21e   : > { %vm1509_vm15 = vcmp.lt.s32.totalorder %v5141_v25, %v5176_v48  ;;  %v1305_v45 = vmul.u32 512, %v3382_v47  ;;  %vm3388_vm0 = vcmp.lt.s32.totalorder %v1103_v36, 0  ;;  %v1210_v43 = vadd.s32 144, %v4487_v46 }
 0x21f   : > { %v5192_v53 = vadd.s32 %v1267_v1, %v1209_v63  ;;  %v3196_v12 = vsel %vm3193_vm14, %v3194_v33, %v3195_v22  ;;  %vm3198_vm1 = vcmp.lt.s32.totalorder %v1046_v41, 0  ;;  %v3199_v32 = vceil.f32 %v1046_v41  ;;  %v700_v63 = vpop.permute.xlu1 %699 }
 0x220   : > { %vm1422_vm2 = vcmp.lt.s32.totalorder %v1419_v6, %v5186_v51  ;;  %v3387_v37 = vcvt.f32.s32 %v3386_v9  ;;  %v3197_v29 = vcvt.f32.s32 %v3196_v12  ;;  %v3200_v16 = vfloor.f32 %v1046_v41  ;;  %v1105_v9 = vpop.f32.mrf.mxu3  ;;  %v1048_v41 = vpop.f32.mrf.mxu1 }
 0x221   : > { %6903 = vst [vmem:[#allocation69_spill] sm:$0xff] %v5192_v53  ;;  %v1510_v50 = vsel %vm1509_vm15, %v5141_v25, %v5176_v48  ;;  %v5197_v35 = vadd.s32 %v1304_v2, %v1228_v4  ;;  %v5199_v36 = vsel %vm3388_vm0, %v3389_v21, %v3390_v10  ;;  %v912_v58 = vadd.f32 %v911_v57, %v4620_v15 }
 0x222   : > { %v5202_v52 = vadd.s32 %v1305_v45, %v1228_v4  ;;  %v5205_v47 = vadd.s32 296, %v4487_v46  ;;  %v1268_v1 = vmul.u32 512, %v3197_v29  ;;  %v3201_v33 = vsel %vm3198_vm1, %v3199_v32, %v3200_v16 }
 0x223   : > { %6904 = vst [vmem:[#allocation70_spill] sm:$0xff] %v5197_v35  ;;  %v1423_v22 = vsel %vm1422_vm2, %v1419_v6, %v5186_v51  ;;  %vm1511_vm4 = vcmp.lt.s32.totalorder %v1508_v55, %v5192_v53  ;;  %v3202_v25 = vcvt.f32.s32 %v3201_v33  ;;  %v969_v2 = vadd.f32 %v968_v11, %v700_v63 }
 0x224   : > { %6905 = vst [vmem:[#allocation71_spill] sm:$0xff] %v5202_v52  ;;  %v5209_v21 = vmul.u32 512, %v3387_v37  ;;  %v5212_v57 = vadd.s32 %v1268_v1, %v1210_v43  ;;  %vm3203_vm5 = vcmp.lt.s32.totalorder %v912_v58, 0  ;;  %v5214_v45 = vadd.f32 %v1105_v9, %v700_v63  ;;  %v971_v10 = vpop.f32.mrf.mxu2 }
 0x225   : > { %v1269_v4 = vmul.u32 512, %v3202_v25  ;;  %v3204_v12 = vceil.f32 %v912_v58  ;;  %v3205_v32 = vfloor.f32 %v912_v58  ;;  %v5217_v29 = vsel %vm1511_vm4, %v1508_v55, %v5192_v53 }
 0x226   : > { %vm1424_vm6 = vcmp.lt.s32.totalorder %v1421_v56, %v5212_v57  ;;  %v1211_v6 = vadd.s32 152, %v4487_v46  ;;  %v1049_v11 = vadd.f32 %v1048_v41, %v4620_v15  ;;  %vm3393_vm7 = vcmp.lt.s32.totalorder %v969_v2, 0 }
 0x227   : > { %v1425_v37 = vsel %vm1424_vm6, %v1421_v56, %v5212_v57  ;;  %v5223_v16 = vadd.s32 %v1269_v4, %v1210_v43  ;;  %v3206_v1 = vsel %vm3203_vm5, %v3204_v12, %v3205_v32  ;;  %v3394_v63 = vceil.f32 %v969_v2  ;;  %v5231_v43 = vpop.permute.xlu2 %704 }
 0x228   : > { %vm1428_vm8 = vcmp.lt.s32.totalorder %v1425_v37, %v4666_v8  ;;  %v3395_v33 = vfloor.f32 %v969_v2  ;;  %v3207_v58 = vcvt.f32.s32 %v3206_v1  ;;  %v3209_v25 = vceil.f32 %v1049_v11 }
 0x229   : > { %6906 = vst [vmem:[#allocation72_spill] sm:$0xff] %v5223_v16  ;;  %v1429_v55 = vsel %vm1428_vm8, %v1425_v37, %v4666_v8  ;;  %vm1513_vm9 = vcmp.lt.s32.totalorder %v1510_v50, %v5223_v16  ;;  %vm3208_vm11 = vcmp.lt.s32.totalorder %v1049_v11, 0  ;;  %v3400_v4 = vfloor.f32 %v5214_v45 }
 0x22a   : > { %vm1432_vm10 = vcmp.lt.s32.totalorder %v1429_v55, %v4770_v42  ;;  %v1514_v15 = vsel %vm1513_vm9, %v1510_v50, %v5223_v16  ;;  %v1270_v56 = vmul.u32 512, %v3207_v58  ;;  %v3210_v12 = vfloor.f32 %v1049_v11 }
 0x22b   : > { %v1433_v41 = vsel %vm1432_vm10, %v1429_v55, %v4770_v42  ;;  %vm1517_vm12 = vcmp.lt.s32.totalorder %v1514_v15, %v4669_v44  ;;  %v972_v1 = vadd.f32 %v971_v10, %v5231_v43  ;;  %v3396_v58 = vsel %vm3393_vm7, %v3394_v63, %v3395_v33 }
 0x22c   : > { %vm1436_vm13 = vcmp.lt.s32.totalorder %v1433_v41, %v4965_v27  ;;  %v1518_v32 = vsel %vm1517_vm12, %v1514_v15, %v4669_v44  ;;  %v5238_v37 = vadd.s32 %v1270_v56, %v1211_v6  ;;  %v3211_v55 = vsel %vm3208_vm11, %v3209_v25, %v3210_v12  ;;  %v3645_v44 = vld [vmem:[%s4178_s16 + $0x80] sm:$0xff] }
 0x22d   : > { %v1437_v50 = vsel %vm1436_vm13, %v1433_v41, %v4965_v27  ;;  %vm1521_vm14 = vcmp.lt.s32.totalorder %v1518_v32, %v4774_v54  ;;  %v3212_v11 = vcvt.f32.s32 %v3211_v55  ;;  %vm3403_vm2 = vcmp.lt.s32.totalorder %v972_v1, 0 }
 0x22e   : > { %vm1440_vm15 = vcmp.lt.s32.totalorder %v1437_v50, %v5003_v38  ;;  %v1522_v9 = vsel %vm1521_vm14, %v1518_v32, %v4774_v54  ;;  %vm1426_vm0 = vcmp.lt.s32.totalorder %v1423_v22, %v5238_v37  ;;  %v3404_v56 = vceil.f32 %v972_v1  ;;  %v7004_v54 = vld [vmem:[#allocation48_spill] sm:$0xff] }
 0x22f   : > { %v1441_v15 = vsel %vm1440_vm15, %v1437_v50, %v5003_v38  ;;  %vm1525_vm1 = vcmp.lt.s32.totalorder %v1522_v9, %v4968_v14  ;;  %v1427_v10 = vsel %vm1426_vm0, %v1423_v22, %v5238_v37  ;;  %v1271_v63 = vmul.u32 512, %v3212_v11 }
 0x230   : > { %vm1444_vm4 = vcmp.lt.s32.totalorder %v1441_v15, %v5026_v62  ;;  %v1526_v2 = vsel %vm1525_vm1, %v1522_v9, %v4968_v14  ;;  %vm1430_vm5 = vcmp.lt.s32.totalorder %v1427_v10, %v4647_v5  ;;  %v3405_v32 = vfloor.f32 %v972_v1  ;;  %v3638_v14 = vld [vmem:[%s4178_s16 + $0x10] sm:$0xff] }
 0x231   : > { %vm1529_vm6 = vcmp.lt.s32.totalorder %v1526_v2, %v5008_v3  ;;  %v1445_v33 = vsel %vm1444_vm4, %v1441_v15, %v5026_v62  ;;  %v1431_v25 = vsel %vm1430_vm5, %v1427_v10, %v4647_v5  ;;  %v5259_v22 = vadd.s32 %v1271_v63, %v1211_v6 }
 0x232   : > { %v1530_v41 = vsel %vm1529_vm6, %v1526_v2, %v5008_v3  ;;  %vm1448_vm7 = vcmp.lt.s32.totalorder %v1445_v33, %v5041_v23  ;;  %vm1434_vm8 = vcmp.lt.s32.totalorder %v1431_v25, %v4890_v60  ;;  %v3397_v10 = vcvt.f32.s32 %v3396_v58  ;;  %v6998_v3 = vld [vmem:[#allocation59_spill] sm:$0xff] }
 0x233   : > { %6907 = vst [vmem:[#allocation73_spill] sm:$0xff] %v5259_v22  ;;  %vm1533_vm9 = vcmp.lt.s32.totalorder %v1530_v41, %v5029_v19  ;;  %v1449_v9 = vsel %vm1448_vm7, %v1445_v33, %v5041_v23  ;;  %v1435_v12 = vsel %vm1434_vm8, %v1431_v25, %v4890_v60  ;;  %vm1515_vm12 = vcmp.lt.s32.totalorder %v5217_v29, %v5259_v22  ;;  %v5387_v23 = vpop.permute.xlu2 %1962 }
 0x234   : > { %vm1452_vm10 = vcmp.lt.s32.totalorder %v1449_v9, %v5092_v20  ;;  %v1534_v50 = vsel %vm1533_vm9, %v1530_v41, %v5029_v19  ;;  %vm1438_vm11 = vcmp.lt.s32.totalorder %v1435_v12, %v4978_v13  ;;  %v1516_v11 = vsel %vm1515_vm12, %v5217_v29, %v5259_v22  ;;  %v6908_v29 = vld [vmem:[#allocation15_spill] sm:$0xff] }
 0x235   : > { %v1453_v55 = vsel %vm1452_vm10, %v1449_v9, %v5092_v20  ;;  %vm1537_vm13 = vcmp.lt.s32.totalorder %v1534_v50, %v5043_v28  ;;  %v1439_v6 = vsel %vm1438_vm11, %v1435_v12, %v4978_v13  ;;  %vm1519_vm0 = vcmp.lt.s32.totalorder %v1516_v11, %v4661_v24 }
 0x236   : > { %vm1456_vm14 = vcmp.lt.s32.totalorder %v1453_v55, %v5133_v40  ;;  %v1538_v15 = vsel %vm1537_vm13, %v1534_v50, %v5043_v28  ;;  %vm1442_vm15 = vcmp.lt.s32.totalorder %v1439_v6, %v5010_v34  ;;  %vm3398_vm1 = vcmp.lt.s32.totalorder %v5214_v45, 0  ;;  %v5546_v28 = vld [vmem:[%s4178_s16 + $0x240] sm:$0xff] }
 0x237   : > { %v1443_v2 = vsel %vm1442_vm15, %v1439_v6, %v5010_v34  ;;  %v1520_v63 = vsel %vm1519_vm0, %v1516_v11, %v4661_v24  ;;  %v1457_v33 = vsel %vm1456_vm14, %v1453_v55, %v5133_v40  ;;  %vm1541_vm4 = vcmp.lt.s32.totalorder %v1538_v15, %v5095_v39  ;;  %v6911_v55 = vld [vmem:[#allocation16_spill] sm:$0xff] }
 0x238   : > { %vm1446_vm5 = vcmp.lt.s32.totalorder %v1443_v2, %v5036_v61  ;;  %vm1523_vm6 = vcmp.lt.s32.totalorder %v1520_v63, %v6908_v29  ;;  %v6909_v25 = vcvt.f32.s32 %v5199_v36  ;;  %v5288_v9 = vadd.s32 304, %v4487_v46 }
 0x239   : > { %v1524_v58 = vsel %vm1523_vm6, %v1520_v63, %v6908_v29  ;;  %v3406_v12 = vsel %vm3403_vm2, %v3404_v56, %v3405_v32  ;;  %v6910_v50 = vceil.f32 %v5214_v45  ;;  %v1231_v40 = vadd.s32 312, %v4487_v46  ;;  %v6912_v63 = vld [vmem:[#allocation44_spill] sm:$0xff]  ;;  %v1108_v45 = vpop.f32.mrf.mxu3 }
 0x23a   : > { %v1307_v41 = vmul.u32 512, %v6909_v25  ;;  %vm1527_vm7 = vcmp.lt.s32.totalorder %v1524_v58, %v6911_v55  ;;  %v3407_v11 = vcvt.f32.s32 %v3406_v12  ;;  %vm1460_vm8 = vcmp.lt.s32.totalorder %v1457_v33, %v5197_v35  ;;  %v6913_v56 = vld [vmem:[#allocation52_spill] sm:$0xff] }
 0x23b   : > { %v3401_v6 = vsel %vm3398_vm1, %v6910_v50, %v3400_v4  ;;  %v1542_v36 = vsel %vm1541_vm4, %v1538_v15, %v5095_v39  ;;  %v1528_v25 = vsel %vm1527_vm7, %v1524_v58, %v6911_v55  ;;  %v1447_v16 = vsel %vm1446_vm5, %v1443_v2, %v5036_v61 }
 0x23c   : > { %v1308_v53 = vmul.u32 512, %v3397_v10  ;;  %vm1531_vm9 = vcmp.lt.s32.totalorder %v1528_v25, %v6912_v63  ;;  %v1310_v1 = vmul.u32 512, %v3407_v11  ;;  %vm1450_vm2 = vcmp.lt.s32.totalorder %v1447_v16, %v6913_v56  ;;  %v6915_v10 = vld [vmem:[#allocation49_spill] sm:$0xff] }
 0x23d   : > { %v5304_v4 = vadd.s32 %v5209_v21, %v5205_v47  ;;  %v3402_v46 = vcvt.f32.s32 %v3401_v6  ;;  %v1532_v32 = vsel %vm1531_vm9, %v1528_v25, %v6912_v63  ;;  %v1451_v15 = vsel %vm1450_vm2, %v1447_v16, %v6913_v56  ;;  %v6996_v63 = vld [vmem:[#allocation53_spill] sm:$0xff] }
 0x23e   : > { %v1461_v58 = vsel %vm1460_vm8, %v1457_v33, %v5197_v35  ;;  %vm1545_vm10 = vcmp.lt.s32.totalorder %v1542_v36, %v5149_v17  ;;  %vm1535_vm11 = vcmp.lt.s32.totalorder %v1532_v32, %v6915_v10  ;;  %vm1454_vm12 = vcmp.lt.s32.totalorder %v1451_v15, %v5115_v31  ;;  %v6919_v33 = vld [vmem:[#allocation24_spill] sm:$0xff] }
 0x23f   : > { %6914 = vst [vmem:[#allocation74_spill] sm:$0xff] %v5304_v4  ;;  %v5312_v2 = vadd.s32 %v1310_v1, %v1231_v40  ;;  %v1455_v12 = vsel %vm1454_vm12, %v1451_v15, %v5115_v31  ;;  %v1109_v21 = vadd.f32 %v1108_v45, %v5231_v43  ;;  %v1536_v50 = vsel %vm1535_vm11, %v1532_v32, %v6915_v10  ;;  %v3615_v31 = vld [vmem:[%s4178_s16 + $0x1b8] sm:$0xff]  ;;  %v5554_v10 = vld [vmem:[%s4178_s16 + $0x248] sm:$0xff] }
 0x240   : > { %v5318_v6 = vadd.s32 %v1307_v41, %v5205_v47  ;;  %v5321_v16 = vadd.s32 %v1308_v53, %v5288_v9  ;;  %vm1458_vm13 = vcmp.lt.s32.totalorder %v1455_v12, %v5168_v0  ;;  %vm1539_vm14 = vcmp.lt.s32.totalorder %v1536_v50, %v6919_v33 }
 0x241   : > { %6916 = vst [vmem:[#allocation75_spill] sm:$0xff] %v5312_v2  ;;  %v1546_v11 = vsel %vm1545_vm10, %v1542_v36, %v5149_v17  ;;  %v1459_v25 = vsel %vm1458_vm13, %v1455_v12, %v5168_v0  ;;  %vm3408_vm15 = vcmp.lt.s32.totalorder %v1109_v21, 0  ;;  %v3409_v1 = vceil.f32 %v1109_v21 }
 0x242   : > { %6917 = vst [vmem:[#allocation76_spill] sm:$0xff] %v5318_v6  ;;  %vm1464_vm0 = vcmp.lt.s32.totalorder %v1461_v58, %v5321_v16  ;;  %vm1462_vm1 = vcmp.lt.s32.totalorder %v1459_v25, %v5304_v4  ;;  %v3410_v47 = vfloor.f32 %v1109_v21  ;;  %v1540_v43 = vsel %vm1539_vm14, %v1536_v50, %v6919_v33  ;;  %v5340_v50 = vld [vmem:[%s4178_s16 + $0x1b0] sm:$0xff] }
 0x243   : > { %6918 = vst [vmem:[#allocation77_spill] sm:$0xff] %v5321_v16  ;;  %v1309_v53 = vmul.u32 512, %v3402_v46  ;;  %v1463_v41 = vsel %vm1462_vm1, %v1459_v25, %v5304_v4  ;;  %v1467_v45 = vsel %vm6724_vm3, %v5312_v2, 2147483647  ;;  %vm1543_vm4 = vcmp.lt.s32.totalorder %v1540_v43, %v5125_v7  ;;  %v6920_v46 = vld [vmem:[#allocation39_spill] sm:$0xff]  ;;  %v6927_v4 = vld [vmem:[#allocation32_spill] sm:$0xff] }
 0x244   : > { %vm1549_vm5 = vcmp.lt.s32.totalorder %v1546_v11, %v5202_v52  ;;  %vm1468_vm6 = vcmp.lt.s32.totalorder %v1463_v41, %v1467_v45  ;;  %v3411_v36 = vsel %vm3408_vm15, %v3409_v1, %v3410_v47  ;;  %v1544_v32 = vsel %vm1543_vm4, %v1540_v43, %v5125_v7  ;;  %6921 = vst [vmem:[#allocation39_spill] sm:$0xff] %v5340_v50  ;;  %v6922_v25 = vld [vmem:[#allocation31_spill] sm:$0xff]  ;;  %v5345_v47 = vpop.permute.xlu0 %1952 }
 0x245   : > { %v1465_v15 = vsel %vm1464_vm0, %v1461_v58, %v5321_v16  ;;  %v1469_v12 = vsel %vm1468_vm6, %v1463_v41, %v1467_v45  ;;  %v3412_v21 = vcvt.f32.s32 %v3411_v36  ;;  %vm1547_vm7 = vcmp.lt.s32.totalorder %v1544_v32, %v5179_v30  ;;  %v5352_v45 = vld [vmem:[%s4178_s16 + $0x1c0] sm:$0xff] }
 0x246   : > { %3542 = vpow2.f32 %v6920_v46  ;;  %v2468_v2 = vsub.f32 %v5340_v50, %v6922_v25  ;;  %vm1470_vm8 = vcmp.lt.s32.totalorder %v1465_v15, %v1469_v12  ;;  %v1548_v1 = vsel %vm1547_vm7, %v1544_v32, %v5179_v30  ;;  %6923 = vst [vmem:[#allocation78_spill] sm:$0xff] %v5352_v45  ;;  %v6925_v16 = vld [vmem:[#allocation25_spill] sm:$0xff]  ;;  %v6926_v32 = vld [vmem:[#allocation23_spill] sm:$0xff]  ;;  %v5578_v30 = vld [vmem:[%s4178_s16 + $0x278] sm:$0x1] }
 0x247   : > { %v1550_v43 = vsel %vm1549_vm5, %v1546_v11, %v5202_v52  ;;  %v5348_v58 = vsel %vm1470_vm8, %v1465_v15, %v1469_v12  ;;  %v1311_v41 = vmul.u32 512, %v3412_v21  ;;  %vm1551_vm9 = vcmp.lt.s32.totalorder %v1548_v1, %v5318_v6  ;;  %v6930_v21 = vld [vmem:[#allocation41_spill] sm:$0xff]  ;;  %6973 = vst [vmem:[#allocation89_spill] sm:$0xff] %v5578_v30 }
 0x248   : > { %v2470_v36 = vsub.f32 %v5352_v45, %v6922_v25  ;;  %v5357_v46 = vadd.s32 %v1309_v53, %v5288_v9  ;;  %3544 = vpow2.f32 %v6925_v16  ;;  %v6928_v35 = vsub.f32 %v6926_v32, %v6927_v4  ;;  %v6931_v9 = vld [vmem:[#allocation18_spill] sm:$0xff]  ;;  %v6932_v53 = vld [vmem:[#allocation13_spill] sm:$0xff]  ;;  %6937 = vst [vmem:[#allocation41_spill] sm:$0xff] %v5387_v23 }
 0x249   : > { %v5363_v15 = vadd.s32 %v1311_v41, %v1231_v40  ;;  %v1552_v12 = vsel %vm1551_vm9, %v1548_v1, %v5318_v6  ;;  %3546 = vpow2.f32 %v6930_v21  ;;  %v2602_v0 = vmul.f32 1.442695, %v2468_v2  ;;  %v6934_v45 = vld [vmem:[#allocation21_spill] sm:$0xff]  ;;  %v3616_v1 = vld [vmem:[%s4178_s16 + $0x1c8] sm:$0xff] }
 0x24a   : > { %6924 = vst [vmem:[#allocation79_spill] sm:$0xff] %v5357_v46  ;;  %v2600_v11 = vmul.f32 1.442695, %v6928_v35  ;;  %v2469_v48 = vsub.f32 %v3615_v31, %v6927_v4  ;;  %vm1553_vm2 = vcmp.lt.s32.totalorder %v1550_v43, %v5357_v46  ;;  %v2677_v16 = vadd.f32 %v6932_v53, %v6931_v9  ;;  %v5380_v9 = vld [vmem:[%s4178_s16 + $0x1d0] sm:$0xff]  ;;  %v5384_v53 = vpop.permute.xlu1 %1957 }
 0x24b   : > { %6929 = vst [vmem:[#allocation25_spill] sm:$0xff] %v5363_v15  ;;  %v2722_v32 = vadd.f32 %v6934_v45, %v6933_v59  ;;  %v1555_v40 = vsel %vm6724_vm3, %v5363_v15, 2147483647  ;;  %v2471_v41 = vsub.f32 %v3616_v1, %v6927_v4  ;;  %v2606_v2 = vmul.f32 1.442695, %v2470_v36  ;;  %v6936_v1 = vld [vmem:[#allocation14_spill] sm:$0xff] }
 0x24c   : > { %v3543_v35 = vpop.eup %3542  ;;  %vm1556_vm10 = vcmp.lt.s32.totalorder %v1552_v12, %v1555_v40  ;;  %3548 = vpow2.f32 %v2600_v11  ;;  %v1554_v31 = vsel %vm1553_vm2, %v1550_v43, %v5357_v46  ;;  %v2604_v50 = vmul.f32 1.442695, %v2469_v48  ;;  %6935 = vst [vmem:[#allocation23_spill] sm:$0xff] %v5380_v9  ;;  %v5389_v43 = vpop.permute.xlu0 %1967 }
 0x24d   : > { %v1557_v21 = vsel %vm1556_vm10, %v1552_v12, %v1555_v40  ;;  %3550 = vpow2.f32 %v2602_v0  ;;  %v2472_v59 = vsub.f32 %v5380_v9, %v6922_v25  ;;  %v2723_v20 = vadd.f32 %v6936_v1, %v2722_v32  ;;  %6938 = vst [vmem:[#allocation18_spill] sm:$0xff] %v5389_v43  ;;  %v5392_v0 = vld [vmem:[%s4178_s16 + $0x1e0] sm:$0xff]  ;;  %v3619_v9 = vld [vmem:[%s4178_s16 + $0x1d8] sm:$0xff] }
 0x24e   : > { %vm1558_vm11 = vcmp.lt.s32.totalorder %v1554_v31, %v1557_v21  ;;  %v3545_v45 = vpop.eup %3544  ;;  %v2678_v11 = vadd.f32 %v3543_v35, %v2677_v16  ;;  %6939 = vst [vmem:[#allocation13_spill] sm:$0xff] %v5392_v0  ;;  %v2474_v48 = vsub.f32 %v5392_v0, %v6922_v25  ;;  %3552 = vpow2.f32 %v2606_v2 }
 0x24f   : > { %v1559_v36 = vsel %vm1558_vm11, %v1554_v31, %v1557_v21  ;;  %v3547_v56 = vpop.eup %3546  ;;  %v2608_v12 = vmul.f32 1.442695, %v2471_v41  ;;  %3554 = vpow2.f32 %v2604_v50  ;;  %v2610_v40 = vmul.f32 1.442695, %v2472_v59 }
 0x250   : > { %v2473_v61 = vsub.f32 %v3619_v9, %v6927_v4  ;;  %v2679_v16 = vadd.f32 %v3545_v45, %v2678_v11  ;;  %v2724_v35 = vadd.f32 %v3547_v56, %v2723_v20  ;;  %v1560_v21 = vrot.slane %v1559_v36, 4  ;;  %v5400_v9 = vpop.permute.xlu2 %1977  ;;  %v3620_v20 = vld [vmem:[%s4178_s16 + $0x1e8] sm:$0xff] }
 0x251   : > { %3556 = vpow2.f32 %v2608_v12  ;;  %v2614_v1 = vmul.f32 1.442695, %v2474_v48  ;;  %6941 = vst [vmem:[#allocation21_spill] sm:$0xff] %v5400_v9  ;;  %v2475_v56 = vsub.f32 %v3620_v20, %v6927_v4  ;;  %v5407_v48 = vld [vmem:[%s4178_s16 + $0x1f0] sm:$0xff]  ;;  %v3624_v9 = vld [vmem:[%s4178_s16 + $0x208] sm:$0xff]  ;;  %v2486_v39 = vsub.f32 %v5546_v28, %v6922_v25 }
 0x252   : > { %v3549_v32 = vpop.eup %3548  ;;  %3558 = vpow2.f32 %v2610_v40  ;;  %v2612_v43 = vmul.f32 1.442695, %v2473_v61  ;;  %vm1561_vm12 = vcmp.lt.s32.totalorder %v1559_v36, %v1560_v21  ;;  %v5398_v50 = vpop.permute.xlu1 %1972  ;;  %6943 = vst [vmem:[#allocation80_spill] sm:$0xff] %v5407_v48  ;;  %v2476_v12 = vsub.f32 %v5407_v48, %v6922_v25 }
 0x253   : > { %v3551_v31 = vpop.eup %3550  ;;  %v2725_v0 = vadd.f32 %v3549_v32, %v2724_v35  ;;  %6940 = vst [vmem:[#allocation17_spill] sm:$0xff] %v5398_v50  ;;  %3560 = vpow2.f32 %v2614_v1  ;;  %v1562_v40 = vsel %vm1561_vm12, %v1559_v36, %v1560_v21  ;;  %v1472_v1 = vrot.slane %v5348_v58, 4 }
 0x254   : > { %v3553_v23 = vpop.eup %3552  ;;  %v2680_v2 = vadd.f32 %v3551_v31, %v2679_v16  ;;  %3562 = vpow2.f32 %v2612_v43  ;;  %v5404_v45 = vpop.permute.xlu0 %1982  ;;  %v3622_v16 = vld [vmem:[%s4178_s16 + $0x1f8] sm:$0xff]  ;;  %v5414_v31 = vld [vmem:[%s4178_s16 + $0x200] sm:$0xff]  ;;  %v2487_v52 = vsub.f32 %v5554_v10, %v6927_v4 }
 0x255   : > { %v3555_v41 = vpop.eup %3554  ;;  %6942 = vst [vmem:[#allocation14_spill] sm:$0xff] %v5404_v45  ;;  %v2477_v35 = vsub.f32 %v3622_v16, %v6927_v4  ;;  %v2478_v43 = vsub.f32 %v5414_v31, %v6922_v25  ;;  %v2618_v45 = vmul.f32 1.442695, %v2476_v12  ;;  %v2479_v16 = vsub.f32 %v3624_v9, %v6927_v4 }
 0x256   : > { %v2681_v61 = vadd.f32 %v3553_v23, %v2680_v2  ;;  %v2726_v11 = vadd.f32 %v3555_v41, %v2725_v0  ;;  %6944 = vst [vmem:[#allocation81_spill] sm:$0xff] %v5414_v31  ;;  %v2616_v23 = vmul.f32 1.442695, %v2475_v56  ;;  %v1563_v0 = vrot.slane %v1562_v40, 2 }
 0x257   : > { %v3557_v59 = vpop.eup %3556  ;;  %v2620_v36 = vmul.f32 1.442695, %v2477_v35  ;;  %v2622_v21 = vmul.f32 1.442695, %v2478_v43  ;;  %vm1473_vm14 = vcmp.lt.s32.totalorder %v5348_v58, %v1472_v1  ;;  %v6950_v43 = vld [vmem:[#allocation29_spill] sm:$0xff] }
 0x258   : > { %v3559_v32 = vpop.eup %3558  ;;  %v2727_v41 = vadd.f32 %v3557_v59, %v2726_v11  ;;  %vm1564_vm13 = vcmp.lt.s32.totalorder %v1562_v40, %v1563_v0  ;;  %3564 = vpow2.f32 %v2616_v23  ;;  %v5431_v11 = vld [vmem:[%s4178_s16 + $0x210] sm:$0xff]  ;;  %v5436_v12 = vsel %vm1473_vm14, %v5348_v58, %v1472_v1  ;;  %v6952_v1 = vld [vmem:[#allocation30_spill] sm:$0xff] }
 0x259   : > { %v3561_v2 = vpop.eup %3560  ;;  %v2682_v20 = vadd.f32 %v3559_v32, %v2681_v61  ;;  %v1565_v50 = vsel %vm1564_vm13, %v1562_v40, %v1563_v0  ;;  %3566 = vpow2.f32 %v2618_v45  ;;  %v5428_v61 = vpop.permute.xlu2 %1992  ;;  %6947 = vst [vmem:[#allocation84_spill] sm:$0xff] %v5431_v11  ;;  %v2480_v9 = vsub.f32 %v5431_v11, %v6922_v25  ;;  %v5441_v32 = vld [vmem:[%s4178_s16 + $0x218] sm:$0xff]  ;;  %v6951_v58 = vld [vmem:[#allocation35_spill] sm:$0xff] }
 0x25a   : > { %v3563_v48 = vpop.eup %3562  ;;  %v1566_v31 = vrot.slane %v1565_v50, 1  ;;  %v5422_v56 = vpop.permute.xlu1 %1987  ;;  %6946 = vst [vmem:[#allocation83_spill] sm:$0xff] %v5428_v61  ;;  %3568 = vpow2.f32 %v2620_v36  ;;  %v2481_v45 = vsub.f32 %v5441_v32, %v6927_v4  ;;  %v1475_v23 = vrot.slane %v5436_v12, 2  ;;  %v6953_v0 = vld [vmem:[#allocation36_spill] sm:$0xff]  ;;  %v5477_v61 = vld [vmem:[%s4178_s16 + $0x220] sm:$0xff]  ;;  %v5482_v36 = vld [vmem:[%s4178_s16 + $0x228] sm:$0xff] }
 0x25b   : > { %6945 = vst [vmem:[#allocation82_spill] sm:$0xff] %v5422_v56  ;;  %v5424_v62 = vadd.f32 %v3563_v48, %v2727_v41  ;;  %v5426_v59 = vadd.f32 %v3561_v2, %v2682_v20  ;;  %3570 = vpow2.f32 %v2622_v21  ;;  %v2624_v48 = vmul.f32 1.442695, %v2479_v16  ;;  %v6956_v20 = vld [vmem:[#allocation9_spill] sm:$0xff]  ;;  %v5487_v56 = vld [vmem:[%s4178_s16 + $0x230] sm:$0xff] }
 0x25c   : > { %vm1567_vm15 = vcmp.lt.s32.totalorder %v1565_v50, %v1566_v31  ;;  %v5438_v40 = vpop.permute.xlu0 %1997  ;;  %6949 = vst [vmem:[#allocation86_spill] sm:$0xff] %v5441_v32  ;;  %v2626_v41 = vmul.f32 1.442695, %v2480_v9  ;;  %v2482_v21 = vsub.f32 %v5477_v61, %v6922_v25  ;;  %v2483_v32 = vsub.f32 %v5482_v36, %v6927_v4 }
 0x25d   : > { %6948 = vst [vmem:[#allocation85_spill] sm:$0xff] %v5438_v40  ;;  %v5445_v35 = vsel %vm1567_vm15, %v1565_v50, %v1566_v31  ;;  %v6954_v50 = vld [vmem:[#allocation19_spill] sm:$0xff]  ;;  %v6955_v31 = vld [vmem:[#allocation8_spill] sm:$0xff]  ;;  %v2628_v40 = vmul.f32 1.442695, %v2481_v45  ;;  %v2484_v15 = vsub.f32 %v5487_v56, %v6922_v25  ;;  %v2485_v45 = vsub.f32 %v5494_v18, %v6927_v4 }
 0x25e   : > { %vm6770_vm1 = vcmp.eq.s32.totalorder %v6950_v43, %v5445_v35  ;;  %vm6765_vm4 = vcmp.eq.s32.totalorder %v6951_v58, %v5445_v35  ;;  %v3565_v2 = vpop.eup %3564  ;;  %6962 = vst [vmem:[#allocation29_spill] sm:$0xff] %v5477_v61  ;;  %vm5499_vm15 = vcmp.lt.s32.totalorder %v5436_v12, %v1475_v23  ;;  %3572 = vpow2.f32 %v2624_v48 }
 0x25f   : > { %v3567_v16 = vpop.eup %3566  ;;  %6963 = vst [vmem:[#allocation35_spill] sm:$0xff] %v5482_v36  ;;  %v2630_v33 = vmul.f32 1.442695, %v2482_v21  ;;  %v2729_v7 = vadd.f32 %v3565_v2, %v5424_v62  ;;  %v2632_v17 = vmul.f32 1.442695, %v2483_v32  ;;  %v1477_v48 = vsel %vm5499_vm15, %v5436_v12, %v1475_v23  ;;  %v5568_v2 = vld [vmem:[%s4178_s16 + $0x258] sm:$0xff] }
 0x260   : > { %v3569_v9 = vpop.eup %3568  ;;  %6964 = vst [vmem:[#allocation30_spill] sm:$0xff] %v5487_v56  ;;  %3574 = vpow2.f32 %v2626_v41  ;;  %v2634_v21 = vmul.f32 1.442695, %v2484_v15  ;;  %v2684_v62 = vadd.f32 %v3567_v16, %v5426_v59  ;;  %v2636_v32 = vmul.f32 1.442695, %v2485_v45 }
 0x261   : > { %v5491_v11 = vpop.eup %3570  ;;  %6965 = vst [vmem:[#allocation36_spill] sm:$0xff] %v5494_v18  ;;  %v5525_v56 = vpop.permute.xlu2 %2007  ;;  %3576 = vpow2.f32 %v2628_v40  ;;  %v2638_v61 = vmul.f32 1.442695, %v2486_v39  ;;  %v1478_v12 = vrot.slane %v1477_v48, 1  ;;  %v5573_v23 = vld [vmem:[%s4178_s16 + $0x270] sm:$0x1]  ;;  %v2730_v41 = vadd.f32 %v3569_v9, %v2729_v7 }
 0x262   : > { %v5515_v18 = vpop.permute.xlu1 %2002  ;;  %6968 = vst [vmem:[#allocation19_spill] sm:$0xff] %v5546_v28  ;;  %v5562_v28 = vld [vmem:[%s4178_s16 + $0x250] sm:$0xff]  ;;  %3578 = vpow2.f32 %v2630_v33  ;;  %v2492_v15 = vsub.f32 %v5573_v23, %v6922_v25  ;;  %v2493_v59 = vsub.f32 %v5578_v30, %v6927_v4  ;;  %v2685_v9 = vadd.f32 %v5491_v11, %v2684_v62  ;;  %v6983_v62 = vld [vmem:[#allocation28_spill] sm:$0xff] }
 0x263   : > { %6969 = vst [vmem:[#allocation8_spill] sm:$0xff] %v5554_v10  ;;  %v2488_v6 = vsub.f32 %v5562_v28, %v6922_v25  ;;  %v2489_v10 = vsub.f32 %v5568_v2, %v6927_v4  ;;  %3580 = vpow2.f32 %v2632_v17  ;;  %vm1479_vm15 = vcmp.lt.s32.totalorder %v1477_v48, %v1478_v12  ;;  %v6981_v11 = vld [vmem:[#allocation27_spill] sm:$0xff]  ;;  %v7006_v4 = vld [vmem:[#allocation50_spill] sm:$0xff]  ;;  %v7007_v25 = vld [vmem:[#allocation52_spill] sm:$0xff] }
 0x264   : > { %v5535_v36 = vpop.permute.xlu0 %2012  ;;  %6970 = vst [vmem:[#allocation9_spill] sm:$0xff] %v5562_v28  ;;  %v2640_v28 = vmul.f32 1.442695, %v2487_v52  ;;  %v3573_v40 = vpop.eup %3572  ;;  %3582 = vpow2.f32 %v2634_v21  ;;  %v2650_v7 = vmul.f32 1.442695, %v2492_v15  ;;  %v2153_v29 = vsel %vm6765_vm4, %v5384_v53, 0.0 }
 0x265   : > { %6971 = vst [vmem:[#allocation87_spill] sm:$0xff] %v5568_v2  ;;  %v2642_v16 = vmul.f32 1.442695, %v2488_v6  ;;  %3584 = vpow2.f32 %v2636_v32  ;;  %v2644_v39 = vmul.f32 1.442695, %v2489_v10  ;;  %v5593_v10 = vsel %vm1479_vm15, %v1477_v48, %v1478_v12  ;;  %v6982_v48 = vld [vmem:[#allocation33_spill] sm:$0xff] }
 0x266   : > { %6972 = vst [vmem:[#allocation88_spill] sm:$0xff] %v5573_v23  ;;  %v3575_v33 = vpop.eup %3574  ;;  %3586 = vpow2.f32 %v2638_v61  ;;  %v2731_v23 = vadd.f32 %v3573_v40, %v2730_v41  ;;  %v2652_v30 = vmul.f32 1.442695, %v2493_v59  ;;  %vm1578_vm12 = vcmp.eq.s32.totalorder %v6981_v11, %v5593_v10  ;;  %v6984_v12 = vld [vmem:[#allocation34_spill] sm:$0xff]  ;;  %v6987_v41 = vld [vmem:[#allocation4_spill] sm:$0xff]  ;;  %v6988_v59 = vld [vmem:[#allocation5_spill] sm:$0xff] }
 0x267   : > { %v3577_v17 = vpop.eup %3576  ;;  %3588 = vpow2.f32 %v2640_v28  ;;  %v5599_v15 = vadd.f32 %v3575_v33, %v2685_v9  ;;  %vm1580_vm15 = vcmp.eq.s32.totalorder %v6982_v48, %v5593_v10  ;;  %vm1582_vm11 = vcmp.eq.s32.totalorder %v6983_v62, %v5593_v10  ;;  %v6989_v40 = vld [vmem:[#allocation10_spill] sm:$0xff]  ;;  %v6992_v33 = vld [vmem:[#allocation11_spill] sm:$0xff]  ;;  %v3639_v48 = vld [vmem:[%s4178_s16 + $0x20] sm:$0xff] }
 0x268   : > { %v5589_v21 = vpop.eup %3578  ;;  %3590 = vpow2.f32 %v2642_v16  ;;  %v5601_v19 = vadd.f32 %v3577_v17, %v2731_v23  ;;  %vm1584_vm3 = vcmp.eq.s32.totalorder %v6984_v12, %v5593_v10  ;;  %vm1588_vm13 = vcmp.eq.s32.totalorder %v6987_v41, %v5593_v10  ;;  %v6994_v17 = vld [vmem:[#allocation26_spill] sm:$0xff] }
 0x269   : > { %v5584_v2 = vpop.permute.xlu2 %2022  ;;  %6974 = vst [vmem:[#allocation90_spill] sm:$0xff] %v5589_v21  ;;  %v5591_v6 = vpop.eup %3580  ;;  %3592 = vpow2.f32 %v2644_v39  ;;  %vm1590_vm0 = vcmp.eq.s32.totalorder %v6988_v59, %v5593_v10  ;;  %vm6774_vm10 = vcmp.eq.s32.totalorder %v6989_v40, %v5593_v10  ;;  %v6991_v39 = vld [vmem:[#allocation6_spill] sm:$0xff]  ;;  %vm1618_vm8 = vcmp.eq.s32.totalorder %v4666_v8, %v5593_v10 }
 0x26a   : > { %v5582_v45 = vpop.permute.xlu1 %2017  ;;  %6975 = vst [vmem:[#allocation91_spill] sm:$0xff] %v5591_v6  ;;  %v5595_v32 = vpop.eup %3582  ;;  %3594 = vpow2.f32 %v2650_v7  ;;  %v6993_v7 = vld [vmem:[#allocation40_spill] sm:$0xff]  ;;  %vm1620_vm9 = vcmp.eq.s32.totalorder %v4647_v5, %v5593_v10  ;;  %vm1622_vm7 = vcmp.eq.s32.totalorder %v4770_v42, %v5593_v10  ;;  %vm1624_vm5 = vcmp.eq.s32.totalorder %v4890_v60, %v5593_v10  ;;  %v7003_v11 = vld [vmem:[#allocation46_spill] sm:$0xff] }
 0x26b   : > { %6976 = vst [vmem:[#allocation92_spill] sm:$0xff] %v5595_v32  ;;  %v5597_v61 = vpop.eup %3584  ;;  %3596 = vpow2.f32 %v2652_v30  ;;  %v6986_v30 = vld [vmem:[#allocation2_spill] sm:$0xff]  ;;  %vm1630_vm2 = vcmp.eq.s32.totalorder %v5003_v38, %v5593_v10  ;;  %v2150_v32 = vsel %vm1578_vm12, %v5345_v47, 0.0  ;;  %vm6782_vm6 = vcmp.eq.s32.totalorder %v7004_v54, %v5593_v10  ;;  %v3673_v60 = vld [vmem:[%s4178_s16 + $0x98] sm:$0xff] }
 0x26c   : > { %v5586_v52 = vpop.permute.xlu0 %2027  ;;  %6977 = vst [vmem:[#allocation93_spill] sm:$0xff] %v5597_v61  ;;  %v5605_v28 = vpop.eup %3586  ;;  %vm1586_vm14 = vcmp.eq.s32.totalorder %v6986_v30, %v5593_v10  ;;  %v5685_v61 = vsel %vm1580_vm15, %v3638_v14, 0.0  ;;  %v2151_v14 = vsel %vm6770_vm1, %v5345_v47, 0.0  ;;  %v5715_v6 = vsel %vm1582_vm11, %v3639_v48, 0.0  ;;  %v3640_v47 = vld [vmem:[%s4178_s16 + $0x30] sm:$0xff]  ;;  %v3672_v5 = vld [vmem:[%s4178_s16 + $0x88] sm:$0xff] }
 0x26d   : > { %6978 = vst [vmem:[#allocation94_spill] sm:$0xff] %v5599_v15  ;;  %v5615_v23 = vpop.eup %3588  ;;  %v3642_v15 = vld [vmem:[%s4178_s16 + $0x50] sm:$0xff]  ;;  %vm7010_vm1 = vcmp.eq.s32.totalorder %v6991_v39, %v5593_v10  ;;  %vm7012_vm4 = vcmp.eq.s32.totalorder %v6992_v33, %v5593_v10 }
 0x26e   : > { %6979 = vst [vmem:[#allocation95_spill] sm:$0xff] %v5601_v19  ;;  %v5625_v16 = vpop.eup %3590  ;;  %v3641_v19 = vld [vmem:[%s4178_s16 + $0x40] sm:$0xff]  ;;  %v5733_v48 = vsel %vm1588_vm13, %v3642_v15, 0.0  ;;  %v5755_v22 = vsel %vm7010_vm1, %v3645_v44, 0.0 }
 0x26f   : > { %6980 = vst [vmem:[#allocation96_spill] sm:$0xff] %v5605_v28  ;;  %v5635_v9 = vpop.eup %3592  ;;  %v5727_v21 = vsel %vm1586_vm14, %v3641_v19, 0.0  ;;  %v3644_v19 = vld [vmem:[%s4178_s16 + $0x70] sm:$0xff] }
 0x270   : > { %6985 = vst [vmem:[#allocation27_spill] sm:$0xff] %v5615_v23  ;;  %v5647_v23 = vpop.eup %3594  ;;  %v5749_v15 = vsel %vm6774_vm10, %v3644_v19, 0.0  ;;  %vm7016_vm10 = vcmp.eq.s32.totalorder %v6994_v17, %v5593_v10 }
 0x271   : > { %6990 = vst [vmem:[#allocation33_spill] sm:$0xff] %v5625_v16  ;;  %v6997_v16 = vld [vmem:[#allocation55_spill] sm:$0xff]  ;;  %v5649_v28 = vpop.permute.xlu2 %2037 }
 0x272   : > { %6995 = vst [vmem:[#allocation28_spill] sm:$0xff] %v5635_v9  ;;  %v5637_v46 = vpop.permute.xlu1 %2032  ;;  %v5659_v9 = vpop.eup %3596 }
 0x273   : > { %6999 = vst [vmem:[#allocation34_spill] sm:$0xff] %v5647_v23 }
 0x274   : > { %7000 = vst [vmem:[#allocation2_spill] sm:$0xff] %v5649_v28  ;;  %v5661_v55 = vpop.permute.xlu0 %2042  ;;  %v7018_v28 = vld [vmem:[#allocation57_spill] sm:$0xff] }
 0x275   : > { %7001 = vst [vmem:[#allocation4_spill] sm:$0xff] %v5659_v9  ;;  %v3637_v9 = vld [vmem:[%s4178_s16] sm:$0xff]  ;;  %vm6781_vm1 = vcmp.eq.s32.totalorder %v7018_v28, %v5593_v10  ;;  %v7086_v28 = vld [vmem:[#allocation7_spill] sm:$0xff] }
 0x276   : > { %7002 = vst [vmem:[#allocation5_spill] sm:$0xff] %v5661_v55  ;;  %v5679_v23 = vsel %vm1578_vm12, %v3637_v9, 0.0  ;;  %v2152_v9 = vsel %vm1580_vm15, %v5384_v53, 0.0  ;;  %vm1634_vm12 = vcmp.eq.s32.totalorder %v7003_v11, %v5593_v10  ;;  %v5721_v53 = vsel %vm1584_vm3, %v3640_v47, 0.0  ;;  %v3643_v47 = vld [vmem:[%s4178_s16 + $0x60] sm:$0xff]  ;;  %v3646_v55 = vld [vmem:[%s4178_s16 + $0x90] sm:$0xff] }
 0x277   : > { %7005 = vst [vmem:[#allocation10_spill] sm:$0xff] %v5733_v48  ;;  %v5743_v24 = vsel %vm1590_vm0, %v3643_v47, 0.0  ;;  %v5761_v47 = vsel %vm7012_vm4, %v3646_v55, 0.0  ;;  %vm7014_vm15 = vcmp.eq.s32.totalorder %v6993_v7, %v5593_v10  ;;  %v2276_v48 = vadd.f32 %v2153_v29, %v2151_v14  ;;  %v3649_v55 = vld [vmem:[%s4178_s16 + $0xc0] sm:$0xff] }
 0x278   : > { %7008 = vst [vmem:[#allocation6_spill] sm:$0xff] %v5743_v24  ;;  %v3647_v24 = vld [vmem:[%s4178_s16 + $0xa0] sm:$0xff]  ;;  %vm7019_vm4 = vcmp.eq.s32.totalorder %v6996_v63, %v5593_v10 }
 0x279   : > { %7009 = vst [vmem:[#allocation11_spill] sm:$0xff] %v5749_v15  ;;  %v5767_v19 = vsel %vm7014_vm15, %v3647_v24, 0.0  ;;  %v3648_v15 = vld [vmem:[%s4178_s16 + $0xb0] sm:$0xff]  ;;  %vm7021_vm15 = vcmp.eq.s32.totalorder %v6997_v16, %v5593_v10  ;;  %v7134_v11 = vld [vmem:[#allocation73_spill] sm:$0xff] }
 0x27a   : > { %7011 = vst [vmem:[#allocation40_spill] sm:$0xff] %v5755_v22  ;;  %v5773_v44 = vsel %vm7016_vm10, %v3648_v15, 0.0  ;;  %v2230_v22 = vadd.f32 %v2152_v9, %v2150_v32  ;;  %v3650_v24 = vld [vmem:[%s4178_s16 + $0xd0] sm:$0xff]  ;;  %v7023_v15 = vld [vmem:[#allocation41_spill] sm:$0xff]  ;;  %vm7024_vm10 = vcmp.eq.s32.totalorder %v6952_v1, %v5445_v35 }
 0x27b   : > { %7013 = vst [vmem:[#allocation26_spill] sm:$0xff] %v5761_v47  ;;  %v5781_v47 = vsel %vm7019_vm4, %v3649_v55, 0.0  ;;  %v2154_v29 = vsel %vm1582_vm11, %v7023_v15, 0.0  ;;  %v2155_v32 = vsel %vm7024_vm10, %v7023_v15, 0.0  ;;  %v3651_v9 = vld [vmem:[%s4178_s16 + $0xe0] sm:$0xff]  ;;  %vm7025_vm4 = vcmp.eq.s32.totalorder %v6998_v3, %v5593_v10  ;;  %v3652_v55 = vld [vmem:[%s4178_s16 + $0xf0] sm:$0xff] }
 0x27c   : > { %7015 = vst [vmem:[#allocation53_spill] sm:$0xff] %v5767_v19  ;;  %v5787_v19 = vsel %vm7021_vm15, %v3650_v24, 0.0  ;;  %v5801_v14 = vsel %vm7025_vm4, %v3651_v9, 0.0  ;;  %vm7027_vm15 = vcmp.eq.s32.totalorder %v5143_v26, %v5593_v10  ;;  %v2231_v62 = vadd.f32 %v2230_v22, %v2154_v29  ;;  %v3654_v9 = vld [vmem:[%s4178_s16 + $0x110] sm:$0xff]  ;;  %v5831_v29 = vpop.permute.xlu2 %2052 }
 0x27d   : > { %7017 = vst [vmem:[#allocation55_spill] sm:$0xff] %v5773_v44  ;;  %v5807_v24 = vsel %vm7027_vm15, %v3652_v55, 0.0  ;;  %v3653_v44 = vld [vmem:[%s4178_s16 + $0x100] sm:$0xff]  ;;  %vm7029_vm11 = vcmp.eq.s32.totalorder %v5155_v49, %v5593_v10  ;;  %vm7031_vm10 = vcmp.eq.s32.totalorder %v5186_v51, %v5593_v10  ;;  %v7033_v55 = vld [vmem:[#allocation18_spill] sm:$0xff]  ;;  %vm7034_vm4 = vcmp.eq.s32.totalorder %v6953_v0, %v5445_v35 }
 0x27e   : > { %7020 = vst [vmem:[#allocation59_spill] sm:$0xff] %v5781_v47  ;;  %v5809_v47 = vpop.permute.xlu1 %2047  ;;  %v5815_v15 = vsel %vm7029_vm11, %v3653_v44, 0.0  ;;  %v2156_v22 = vsel %vm1584_vm3, %v7033_v55, 0.0  ;;  %v3655_v44 = vld [vmem:[%s4178_s16 + $0x120] sm:$0xff]  ;;  %vm7036_vm15 = vcmp.eq.s32.totalorder %v5212_v57, %v5593_v10  ;;  %vm7038_vm11 = vcmp.eq.s32.totalorder %v5238_v37, %v5593_v10 }
 0x27f   : > { %7022 = vst [vmem:[#allocation46_spill] sm:$0xff] %v5787_v19  ;;  %v2277_v19 = vadd.f32 %v2276_v48, %v2155_v32  ;;  %v2157_v48 = vsel %vm7034_vm4, %v7033_v55, 0.0  ;;  %v5837_v32 = vsel %vm7036_vm15, %v3655_v44, 0.0  ;;  %v5845_v55 = vpop.permute.xlu0 %2057  ;;  %v3658_v44 = vld [vmem:[%s4178_s16 + $0x150] sm:$0xff]  ;;  %vm7043_vm3 = vcmp.eq.s32.totalorder %v6954_v50, %v5445_v35 }
 0x280   : > { %7026 = vst [vmem:[#allocation41_spill] sm:$0xff] %v5801_v14  ;;  %v5821_v14 = vsel %vm7031_vm10, %v3654_v9, 0.0  ;;  %v3656_v9 = vld [vmem:[%s4178_s16 + $0x130] sm:$0xff]  ;;  %vm7048_vm10 = vcmp.eq.s32.totalorder %v4978_v13, %v5593_v10  ;;  %vm7051_vm4 = vcmp.eq.s32.totalorder %v6955_v31, %v5445_v35  ;;  %vm7054_vm15 = vcmp.eq.s32.totalorder %v5010_v34, %v5593_v10 }
 0x281   : > { %7028 = vst [vmem:[#allocation97_spill] sm:$0xff] %v5807_v24  ;;  %v5843_v12 = vsel %vm7038_vm11, %v3656_v9, 0.0  ;;  %v3657_v24 = vld [vmem:[%s4178_s16 + $0x140] sm:$0xff]  ;;  %vm7063_vm11 = vcmp.eq.s32.totalorder %v7006_v4, %v5593_v10  ;;  %v3667_v4 = vld [vmem:[%s4178_s16 + $0x38] sm:$0xff] }
 0x282   : > { %7030 = vst [vmem:[#allocation98_spill] sm:$0xff] %v5815_v15  ;;  %v2278_v15 = vadd.f32 %v2277_v19, %v2157_v48  ;;  %v7042_v9 = vld [vmem:[#allocation17_spill] sm:$0xff]  ;;  %v3660_v48 = vld [vmem:[%s4178_s16 + $0x170] sm:$0xff] }
 0x283   : > { %7032 = vst [vmem:[#allocation99_spill] sm:$0xff] %v5821_v14  ;;  %v2232_v14 = vadd.f32 %v2231_v62, %v2156_v22  ;;  %v2158_v19 = vsel %vm1586_vm14, %v7042_v9, 0.0  ;;  %v2159_v62 = vsel %vm7043_vm3, %v7042_v9, 0.0  ;;  %v3659_v22 = vld [vmem:[%s4178_s16 + $0x160] sm:$0xff]  ;;  %vm7046_vm14 = vcmp.eq.s32.totalorder %v4965_v27, %v5593_v10  ;;  %v3662_v9 = vld [vmem:[%s4178_s16 + $0x190] sm:$0xff] }
 0x284   : > { %7035 = vst [vmem:[#allocation18_spill] sm:$0xff] %v5831_v29  ;;  %v5851_v29 = vsel %vm1618_vm8, %v3657_v24, 0.0  ;;  %v5871_v24 = vsel %vm1622_vm7, %v3659_v22, 0.0  ;;  %v2279_v30 = vadd.f32 %v2278_v15, %v2159_v62  ;;  %v5889_v22 = vsel %vm7048_vm10, %v3662_v9, 0.0  ;;  %v3663_v15 = vld [vmem:[%s4178_s16 + $0x1a0] sm:$0xff] }
 0x285   : > { %7037 = vst [vmem:[#allocation100_spill] sm:$0xff] %v5837_v32  ;;  %v5857_v32 = vsel %vm1620_vm9, %v3658_v44, 0.0  ;;  %v5877_v44 = vsel %vm1624_vm5, %v3660_v48, 0.0  ;;  %vm7066_vm3 = vcmp.eq.s32.totalorder %v7007_v25, %v5593_v10  ;;  %vm7072_vm10 = vcmp.eq.s32.totalorder %v6950_v43, %v5445_v35  ;;  %v7088_v25 = vld [vmem:[#allocation42_spill] sm:$0xff] }
 0x286   : > { %7039 = vst [vmem:[#allocation101_spill] sm:$0xff] %v5843_v12 }
 0x287   : > { %7040 = vst [vmem:[#allocation102_spill] sm:$0xff] %v5851_v29  ;;  %v3661_v29 = vld [vmem:[%s4178_s16 + $0x180] sm:$0xff] }
 0x288   : > { %7041 = vst [vmem:[#allocation103_spill] sm:$0xff] %v5857_v32  ;;  %v2233_v32 = vadd.f32 %v2232_v14, %v2158_v19  ;;  %v5883_v12 = vsel %vm7046_vm14, %v3661_v29, 0.0  ;;  %v5903_v29 = vsel %vm1630_vm2, %v3663_v15, 0.0  ;;  %v7053_v19 = vld [vmem:[#allocation39_spill] sm:$0xff] }
 0x289   : > { %7044 = vst [vmem:[#allocation17_spill] sm:$0xff] %v5871_v24  ;;  %v7050_v24 = vld [vmem:[#allocation21_spill] sm:$0xff]  ;;  %v5909_v62 = vsel %vm7054_vm15, %v7053_v19, 0.0 }
 0x28a   : > { %7045 = vst [vmem:[#allocation104_spill] sm:$0xff] %v5877_v44  ;;  %v2160_v48 = vsel %vm1588_vm13, %v7050_v24, 0.0  ;;  %v2161_v14 = vsel %vm7051_vm4, %v7050_v24, 0.0  ;;  %vm7061_vm13 = vcmp.eq.s32.totalorder %v6956_v20, %v5445_v35  ;;  %v3665_v44 = vld [vmem:[%s4178_s16 + $0x18] sm:$0xff]  ;;  %vm7073_vm4 = vcmp.eq.s32.totalorder %v6951_v58, %v5445_v35  ;;  %v5971_v58 = vpop.permute.xlu1 %2062 }
 0x28b   : > { %7047 = vst [vmem:[#allocation105_spill] sm:$0xff] %v5883_v12  ;;  %v2234_v41 = vadd.f32 %v2233_v32, %v2160_v48  ;;  %v2280_v9 = vadd.f32 %v2279_v30, %v2161_v14  ;;  %v7058_v12 = vld [vmem:[#allocation23_spill] sm:$0xff]  ;;  %v7062_v30 = vld [vmem:[#allocation13_spill] sm:$0xff]  ;;  %v7065_v48 = vld [vmem:[#allocation80_spill] sm:$0xff] }
 0x28c   : > { %7049 = vst [vmem:[#allocation106_spill] sm:$0xff] %v5889_v22  ;;  %v7056_v22 = vld [vmem:[#allocation78_spill] sm:$0xff]  ;;  %v5921_v15 = vsel %vm6782_vm6, %v7058_v12, 0.0  ;;  %v5941_v12 = vsel %vm7066_vm3, %v7065_v48, 0.0  ;;  %vm7081_vm3 = vcmp.eq.s32.totalorder %v6993_v7, %v5593_v10  ;;  %v1818_v7 = vadd.f32 %v5685_v61, %v5679_v23 }
 0x28d   : > { %7052 = vst [vmem:[#allocation21_spill] sm:$0xff] %v5903_v29  ;;  %v5915_v24 = vsel %vm1634_vm12, %v7056_v22, 0.0  ;;  %v7060_v29 = vld [vmem:[#allocation14_spill] sm:$0xff]  ;;  %v5935_v22 = vsel %vm7063_vm11, %v7062_v30, 0.0  ;;  %vm7080_vm11 = vcmp.eq.s32.totalorder %v6992_v33, %v5593_v10  ;;  %v7085_v33 = vld [vmem:[#allocation60_spill] sm:$0xff]  ;;  %v1570_v23 = vand.u32 511, %v5445_v35 }
 0x28e   : > { %7055 = vst [vmem:[#allocation39_spill] sm:$0xff] %v5909_v62  ;;  %v2162_v19 = vsel %vm1590_vm0, %v7060_v29, 0.0  ;;  %v2163_v32 = vsel %vm7061_vm13, %v7060_v29, 0.0  ;;  %vm7069_vm0 = vcmp.eq.s32.totalorder %v6989_v40, %v5593_v10  ;;  %v7070_v29 = vld [vmem:[#allocation12_spill] sm:$0xff]  ;;  %v3664_v30 = vld [vmem:[%s4178_s16 + $0x8] sm:$0xff]  ;;  %v7075_v40 = vld [vmem:[#allocation81_spill] sm:$0xff]  ;;  %vm7078_vm13 = vcmp.eq.s32.totalorder %v6991_v39, %v5593_v10 }
 0x28f   : > { %7057 = vst [vmem:[#allocation78_spill] sm:$0xff] %v5915_v24  ;;  %v2235_v14 = vadd.f32 %v2234_v41, %v2162_v19  ;;  %v2281_v59 = vadd.f32 %v2280_v9, %v2163_v32  ;;  %vm7071_vm14 = vcmp.eq.s32.totalorder %v7070_v29, %v5445_v35  ;;  %v1741_v41 = vsel %vm7073_vm4, %v3665_v44, 0.0  ;;  %v7074_v9 = vld [vmem:[#allocation56_spill] sm:$0xff]  ;;  %v7079_v44 = vld [vmem:[#allocation85_spill] sm:$0xff] }
 0x290   : > { %7059 = vst [vmem:[#allocation23_spill] sm:$0xff] %v5921_v15  ;;  %v7068_v15 = vld [vmem:[#allocation82_spill] sm:$0xff]  ;;  %vm1605_vm15 = vcmp.eq.s32.totalorder %v7074_v9, %v5445_v35  ;;  %v5965_v19 = vsel %vm6781_vm1, %v7075_v40, 0.0  ;;  %v2170_v40 = vsel %vm7081_vm3, %v5515_v18, 0.0  ;;  %vm7087_vm4 = vcmp.eq.s32.totalorder %v7086_v28, %v5445_v35 }
 0x291   : > { %7064 = vst [vmem:[#allocation14_spill] sm:$0xff] %v5935_v22  ;;  %v2164_v24 = vsel %vm7069_vm0, %v7068_v15, 0.0  ;;  %v2165_v62 = vsel %vm7071_vm14, %v7068_v15, 0.0  ;;  %v1739_v22 = vsel %vm7072_vm10, %v3664_v30, 0.0  ;;  %v7077_v15 = vld [vmem:[#allocation83_spill] sm:$0xff]  ;;  %v2168_v30 = vsel %vm7080_vm11, %v7079_v44, 0.0 }
 0x292   : > { %7067 = vst [vmem:[#allocation13_spill] sm:$0xff] %v5941_v12  ;;  %v2166_v43 = vsel %vm7078_vm13, %v7077_v15, 0.0  ;;  %v2236_v32 = vadd.f32 %v2235_v14, %v2164_v24  ;;  %v2282_v48 = vadd.f32 %v2281_v59, %v2165_v62  ;;  %vm7082_vm0 = vcmp.eq.s32.totalorder %v6994_v17, %v5593_v10  ;;  %v7083_v62 = vld [vmem:[#allocation20_spill] sm:$0xff]  ;;  %v5989_v14 = vpop.permute.xlu2 %2067  ;;  %v5996_v17 = vpop.permute.xlu0 %2072 }
 0x293   : > { %7076 = vst [vmem:[#allocation80_spill] sm:$0xff] %v5965_v19  ;;  %v2172_v39 = vsel %vm7082_vm0, %v5525_v56, 0.0  ;;  %vm7084_vm14 = vcmp.eq.s32.totalorder %v7083_v62, %v5445_v35  ;;  %vm1607_vm10 = vcmp.eq.s32.totalorder %v7085_v33, %v5445_v35  ;;  %v1864_v12 = vadd.f32 %v1741_v41, %v1739_v22  ;;  %v7091_v22 = vld [vmem:[#allocation65_spill] sm:$0xff] }
 0x294   : > { %v2167_v24 = vsel %vm7084_vm14, %v7077_v15, 0.0  ;;  %v2237_v59 = vadd.f32 %v2236_v32, %v2166_v43  ;;  %v2169_v15 = vsel %vm7087_vm4, %v7079_v44, 0.0  ;;  %vm7089_vm13 = vcmp.eq.s32.totalorder %v7088_v25, %v5445_v35  ;;  %v3666_v32 = vld [vmem:[%s4178_s16 + $0x28] sm:$0xff]  ;;  %v7157_v33 = vld [vmem:[#allocation61_spill] sm:$0xff] }
 0x295   : > { %v2283_v19 = vadd.f32 %v2282_v48, %v2167_v24  ;;  %v2171_v43 = vsel %vm7089_vm13, %v5515_v18, 0.0  ;;  %vm7090_vm11 = vcmp.eq.s32.totalorder %v6952_v1, %v5445_v35  ;;  %vm1609_vm3 = vcmp.eq.s32.totalorder %v7091_v22, %v5445_v35  ;;  %v7161_v22 = vld [vmem:[#allocation22_spill] sm:$0xff] }
 0x296   : > { %v1743_v61 = vsel %vm7090_vm11, %v3666_v32, 0.0  ;;  %v2238_v41 = vadd.f32 %v2237_v59, %v2168_v30  ;;  %v1819_v44 = vadd.f32 %v1818_v7, %v5715_v6  ;;  %vm7092_vm0 = vcmp.eq.s32.totalorder %v6953_v0, %v5445_v35  ;;  %v7096_v6 = vld [vmem:[#allocation67_spill] sm:$0xff]  ;;  %v7098_v7 = vld [vmem:[#allocation45_spill] sm:$0xff] }
 0x297   : > { %v2284_v48 = vadd.f32 %v2283_v19, %v2169_v15  ;;  %v1865_v24 = vadd.f32 %v1864_v12, %v1743_v61  ;;  %v1745_v18 = vsel %vm7092_vm0, %v3667_v4, 0.0  ;;  %v1571_v1 = vrot.slane %v1570_v23, 7  ;;  %v3668_v61 = vld [vmem:[%s4178_s16 + $0x48] sm:$0xff] }
 0x298   : > { %v7093_v32 = vlaneseq  ;;  %v1569_v19 = vand.u32 511, %v5593_v10  ;;  %vm1611_vm4 = vcmp.eq.s32.totalorder %v7096_v6, %v5445_v35  ;;  %v2239_v12 = vadd.f32 %v2238_v41, %v2170_v40 }
 0x299   : > { %v2285_v30 = vadd.f32 %v2284_v48, %v2171_v43  ;;  %v1820_v4 = vadd.f32 %v1819_v44, %v5721_v53  ;;  %v1866_v0 = vadd.f32 %v1865_v24, %v1745_v18  ;;  %vm7097_vm13 = vcmp.eq.s32.totalorder %v6996_v63, %v5593_v10  ;;  %v7102_v53 = vld [vmem:[#allocation69_spill] sm:$0xff]  ;;  %v7108_v44 = vld [vmem:[#allocation72_spill] sm:$0xff] }
 0x29a   : > { %vm6024_vm14 = vcmp.lt.s32.totalorder %v7093_v32, 256  ;;  %v2174_v59 = vsel %vm7097_vm13, %v5535_v36, 0.0  ;;  %vm7099_vm11 = vcmp.eq.s32.totalorder %v7098_v7, %v5445_v35  ;;  %vm7100_vm0 = vcmp.eq.s32.totalorder %v6954_v50, %v5445_v35  ;;  %v3669_v18 = vld [vmem:[%s4178_s16 + $0x58] sm:$0xff] }
 0x29b   : > { %v2173_v15 = vsel %vm7099_vm11, %v5525_v56, 0.0  ;;  %v1747_v23 = vsel %vm7100_vm0, %v3668_v61, 0.0  ;;  %vm7101_vm1 = vcmask 1040384   ;;  %vm1613_vm6 = vcmp.eq.s32.totalorder %v7102_v53, %v5445_v35 }
 0x29c   : > { %v1572_v40 = vsel %vm7101_vm1, %v1569_v19, %v1571_v1  ;;  %v2240_v43 = vadd.f32 %v2239_v12, %v2172_v39  ;;  %v2286_v41 = vadd.f32 %v2285_v30, %v2173_v15  ;;  %v1821_v63 = vadd.f32 %v1820_v4, %v5727_v21  ;;  %v7106_v21 = vld [vmem:[#allocation54_spill] sm:$0xff]  ;;  %v6076_v1 = vpop.permute.xlu1 %2077 }
 0x29d   : > { %v1867_v48 = vadd.f32 %v1866_v0, %v1747_v23  ;;  %1577 = vst.msk [vmem:[%s389_s13] sm:$0x3] %vm6024_vm14, %v1572_v40  ;;  %vm7103_vm13 = vcmp.eq.s32.totalorder %v6997_v16, %v5593_v10  ;;  %vm7104_vm1 = vcmp.eq.s32.totalorder %v6998_v3, %v5593_v10  ;;  %vm7105_vm11 = vcmp.eq.s32.totalorder %v5143_v26, %v5593_v10  ;;  %v7111_v19 = vld [vmem:[#allocation2_spill] sm:$0xff]  ;;  %v6087_v0 = vpop.permute.xlu2 %2082  ;;  %v6097_v40 = vpop.permute.xlu0 %2087 }
 0x29e   : > { %v2176_v56 = vsel %vm7103_vm13, %v5582_v45, 0.0  ;;  %v2178_v50 = vsel %vm7104_vm1, %v5584_v2, 0.0  ;;  %v2180_v39 = vsel %vm7105_vm11, %v5586_v52, 0.0  ;;  %vm7107_vm0 = vcmp.eq.s32.totalorder %v7106_v21, %v5445_v35  ;;  %v7113_v12 = vld [vmem:[#allocation10_spill] sm:$0xff] }
 0x29f   : > { %v2175_v54 = vsel %vm7107_vm0, %v5535_v36, 0.0  ;;  %vm1615_vm14 = vcmp.eq.s32.totalorder %v7108_v44, %v5445_v35  ;;  %vm7109_vm13 = vcmp.eq.s32.totalorder %v5155_v49, %v5593_v10  ;;  %v2241_v16 = vadd.f32 %v2240_v43, %v2174_v59  ;;  %v7118_v43 = vld [vmem:[#allocation6_spill] sm:$0xff] }
 0x2a0   : > { %v2182_v3 = vsel %vm7109_vm13, %v5637_v46, 0.0  ;;  %v2287_v24 = vadd.f32 %v2286_v41, %v2175_v54  ;;  %vm7110_vm1 = vcmp.eq.s32.totalorder %v6955_v31, %v5445_v35  ;;  %vm7112_vm11 = vcmp.eq.s32.totalorder %v5186_v51, %v5593_v10  ;;  %v7114_v31 = vld [vmem:[#allocation5_spill] sm:$0xff]  ;;  %v3670_v51 = vld [vmem:[%s4178_s16 + $0x68] sm:$0xff] }
 0x2a1   : > { %v1749_v26 = vsel %vm7110_vm1, %v3669_v18, 0.0  ;;  %v2184_v36 = vsel %vm7112_vm11, %v7111_v19, 0.0  ;;  %v2177_v49 = vsel %vm1605_vm15, %v5582_v45, 0.0  ;;  %v1822_v30 = vadd.f32 %v1821_v63, %v7113_v12 }
 0x2a2   : > { %v1868_v4 = vadd.f32 %v1867_v48, %v1749_v26  ;;  %vm7115_vm0 = vcmp.eq.s32.totalorder %v5212_v57, %v5593_v10  ;;  %v2242_v15 = vadd.f32 %v2241_v16, %v2176_v56  ;;  %v2288_v61 = vadd.f32 %v2287_v24, %v2177_v49  ;;  %v7119_v48 = vld [vmem:[#allocation18_spill] sm:$0xff]  ;;  %v3671_v16 = vld [vmem:[%s4178_s16 + $0x78] sm:$0xff]  ;;  %v7121_v24 = vld [vmem:[#allocation11_spill] sm:$0xff] }
 0x2a3   : > { %v2186_v59 = vsel %vm7115_vm0, %v7114_v31, 0.0  ;;  %vm7116_vm13 = vcmp.eq.s32.totalorder %v6956_v20, %v5445_v35  ;;  %vm7117_vm1 = vcmp.eq.s32.totalorder %v5238_v37, %v5593_v10  ;;  %v2179_v57 = vsel %vm1607_vm10, %v5584_v2, 0.0 }
 0x2a4   : > { %v1751_v23 = vsel %vm7116_vm13, %v3670_v51, 0.0  ;;  %v2188_v45 = vsel %vm7117_vm1, %v5809_v47, 0.0  ;;  %v1823_v41 = vadd.f32 %v1822_v30, %v7118_v43  ;;  %v2190_v20 = vsel %vm1618_vm8, %v7119_v48, 0.0  ;;  %v7123_v30 = vld [vmem:[#allocation40_spill] sm:$0xff] }
 0x2a5   : > { %v1869_v63 = vadd.f32 %v1868_v4, %v1751_v23  ;;  %v2243_v56 = vadd.f32 %v2242_v15, %v2178_v50  ;;  %v2289_v54 = vadd.f32 %v2288_v61, %v2179_v57  ;;  %vm7120_vm11 = vcmp.eq.s32.totalorder %v7070_v29, %v5445_v35  ;;  %v7127_v23 = vld [vmem:[#allocation26_spill] sm:$0xff] }
 0x2a6   : > { %v1753_v37 = vsel %vm7120_vm11, %v3671_v16, 0.0  ;;  %v6120_v2 = vsel %vm1620_vm9, %v5845_v55, 0.0  ;;  %v2181_v8 = vsel %vm1609_vm3, %v5586_v52, 0.0  ;;  %v1824_v50 = vadd.f32 %v1823_v41, %v7121_v24  ;;  %v3675_v24 = vld [vmem:[%s4178_s16 + $0xb8] sm:$0xff] }
 0x2a7   : > { %v1870_v18 = vadd.f32 %v1869_v63, %v1753_v37  ;;  %v6131_v29 = vsel %vm1622_vm7, %v5971_v58, 0.0  ;;  %v2244_v26 = vadd.f32 %v2243_v56, %v2180_v39  ;;  %v2290_v49 = vadd.f32 %v2289_v54, %v2181_v8  ;;  %v6179_v56 = vpop.permute.xlu1 %2092  ;;  %v6192_v37 = vpop.permute.xlu2 %2097 }
 0x2a8   : > { %vm7122_vm8 = vcmp.eq.s32.totalorder %v7083_v62, %v5445_v35  ;;  %v6141_v52 = vsel %vm1624_vm5, %v5989_v14, 0.0  ;;  %v2183_v42 = vsel %vm1611_vm4, %v5637_v46, 0.0  ;;  %v1825_v39 = vadd.f32 %v1824_v50, %v7123_v30 }
 0x2a9   : > { %v1755_v12 = vsel %vm7122_vm8, %v3672_v5, 0.0  ;;  %vm7124_vm7 = vcmp.eq.s32.totalorder %v4965_v27, %v5593_v10  ;;  %v2245_v15 = vadd.f32 %v2244_v26, %v2182_v3  ;;  %v2291_v61 = vadd.f32 %v2290_v49, %v2183_v42  ;;  %v7136_v49 = vld [vmem:[#allocation55_spill] sm:$0xff] }
 0x2aa   : > { %v1871_v4 = vadd.f32 %v1870_v18, %v1755_v12  ;;  %v6152_v62 = vsel %vm7124_vm7, %v5996_v17, 0.0  ;;  %vm7125_vm5 = vcmp.eq.s32.totalorder %v7086_v28, %v5445_v35  ;;  %vm7126_vm9 = vcmp.eq.s32.totalorder %v4978_v13, %v5593_v10  ;;  %v3674_v13 = vld [vmem:[%s4178_s16 + $0xa8] sm:$0xff]  ;;  %v7132_v18 = vld [vmem:[#allocation48_spill] sm:$0xff] }
 0x2ab   : > { %v1757_v51 = vsel %vm7125_vm5, %v3673_v60, 0.0  ;;  %v6162_v46 = vsel %vm7126_vm9, %v6076_v1, 0.0  ;;  %v2185_v27 = vsel %vm1613_vm6, %v7111_v19, 0.0  ;;  %v1826_v57 = vadd.f32 %v1825_v39, %v7127_v23  ;;  %v7142_v60 = vld [vmem:[#allocation37_spill] sm:$0xff] }
 0x2ac   : > { %v1872_v3 = vadd.f32 %v1871_v4, %v1757_v51  ;;  %v6173_v28 = vsel %vm1630_vm2, %v6087_v0, 0.0  ;;  %v2246_v43 = vadd.f32 %v2245_v15, %v2184_v36  ;;  %v2292_v41 = vadd.f32 %v2291_v61, %v2185_v27  ;;  %v7130_v36 = vld [vmem:[#allocation53_spill] sm:$0xff]  ;;  %v3676_v4 = vld [vmem:[%s4178_s16 + $0xc8] sm:$0xff]  ;;  %v7144_v27 = vld [vmem:[#allocation59_spill] sm:$0xff] }
 0x2ad   : > { %vm7128_vm0 = vcmp.eq.s32.totalorder %v7088_v25, %v5445_v35  ;;  %vm7129_vm13 = vcmp.eq.s32.totalorder %v5010_v34, %v5593_v10  ;;  %v2187_v38 = vsel %vm1615_vm14, %v7114_v31, 0.0  ;;  %v1827_v54 = vadd.f32 %v1826_v57, %v7130_v36  ;;  %v6204_v31 = vpop.permute.xlu0 %2102  ;;  %v7147_v36 = vld [vmem:[#allocation46_spill] sm:$0xff] }
 0x2ae   : > { %v1759_v63 = vsel %vm7128_vm0, %v3674_v13, 0.0  ;;  %v6185_v19 = vsel %vm7129_vm13, %v6097_v40, 0.0  ;;  %v6198_v25 = vsel %vm1634_vm12, %v6179_v56, 0.0  ;;  %v2247_v34 = vadd.f32 %v2246_v43, %v2186_v59  ;;  %v6237_v43 = vld [vmem:[%s4178_s16 + $0x260] sm:$0xff]  ;;  %v3678_v13 = vld [vmem:[%s4178_s16 + $0xd8] sm:$0xff] }
 0x2af   : > { %v1873_v16 = vadd.f32 %v1872_v3, %v1759_v63  ;;  %v2293_v8 = vadd.f32 %v2292_v41, %v2187_v38  ;;  %vm7131_vm2 = vcmp.eq.s32.totalorder %v7098_v7, %v5445_v35  ;;  %vm7133_vm1 = vcmp.eq.s32.totalorder %v7132_v18, %v5593_v10  ;;  %v7137_v7 = vld [vmem:[#allocation50_spill] sm:$0xff]  ;;  %v7146_v38 = vld [vmem:[#allocation32_spill] sm:$0xff] }
 0x2b0   : > { %v1761_v50 = vsel %vm7131_vm2, %v3675_v24, 0.0  ;;  %v6210_v26 = vsel %vm7133_vm1, %v6192_v37, 0.0  ;;  %vm7135_vm12 = vcmp.eq.s32.totalorder %v7134_v11, %v5445_v35  ;;  %v1828_v5 = vadd.f32 %v1827_v54, %v7136_v49  ;;  %v6246_v63 = vld [vmem:[%s4178_s16 + $0x268] sm:$0xff]  ;;  %v7151_v49 = vld [vmem:[#allocation91_spill] sm:$0xff] }
 0x2b1   : > { %v2189_v59 = vsel %vm7135_vm12, %v5809_v47, 0.0  ;;  %v1874_v12 = vadd.f32 %v1873_v16, %v1761_v50  ;;  %vm7138_vm11 = vcmp.eq.s32.totalorder %v7137_v7, %v5593_v10  ;;  %v2248_v30 = vadd.f32 %v2247_v34, %v2188_v45  ;;  %v7140_v47 = vld [vmem:[#allocation38_spill] sm:$0xff]  ;;  %vm7178_vm1 = vmmov %vm7135_vm12 }
 0x2b2   : > { %v6221_v42 = vsel %vm7138_vm11, %v6204_v31, 0.0  ;;  %v2294_v39 = vadd.f32 %v2293_v8, %v2189_v59  ;;  %vm7139_vm8 = vcmp.eq.s32.totalorder %v7106_v21, %v5445_v35  ;;  %vm7141_vm7 = vcmp.eq.s32.totalorder %v7140_v47, %v5445_v35  ;;  %v7145_v21 = vld [vmem:[#allocation31_spill] sm:$0xff]  ;;  %v7148_v16 = vld [vmem:[#allocation94_spill] sm:$0xff] }
 0x2b3   : > { %v1763_v15 = vsel %vm7139_vm8, %v3676_v4, 0.0  ;;  %v2191_v61 = vsel %vm7141_vm7, %v7119_v48, 0.0  ;;  %vm7143_vm5 = vcmp.eq.s32.totalorder %v7142_v60, %v5445_v35  ;;  %v1829_v23 = vadd.f32 %v1828_v5, %v7144_v27  ;;  %v7149_v34 = vld [vmem:[#allocation90_spill] sm:$0xff]  ;;  %v7150_v59 = vld [vmem:[#allocation95_spill] sm:$0xff]  ;;  %vm7184_vm8 = vmmov %vm7141_vm7 }
 0x2b4   : > { %v2193_v51 = vsel %vm7143_vm5, %v5845_v55, 0.0  ;;  %v1875_v45 = vadd.f32 %v1874_v12, %v1763_v15  ;;  %v2249_v57 = vadd.f32 %v2248_v30, %v2190_v20  ;;  %v2295_v3 = vadd.f32 %v2294_v39, %v2191_v61  ;;  %v3680_v18 = vld [vmem:[%s4178_s16 + $0xe8] sm:$0xff]  ;;  %v7152_v12 = vld [vmem:[#allocation3_spill] sm:$0xff]  ;;  %v7156_v39 = vld [vmem:[#allocation41_spill] sm:$0xff] }
 0x2b5   : > { %v2490_v41 = vsub.f32 %v6237_v43, %v7145_v21  ;;  %v1765_v48 = vsel %vm1605_vm15, %v3678_v13, 0.0  ;;  %v2491_v55 = vsub.f32 %v6246_v63, %v7146_v38  ;;  %v1830_v54 = vadd.f32 %v1829_v23, %v7147_v36  ;;  %v7154_v30 = vld [vmem:[#allocation15_spill] sm:$0xff]  ;;  %v3681_v23 = vld [vmem:[%s4178_s16 + $0xf8] sm:$0xff] }
 0x2b6   : > { %v1876_v20 = vadd.f32 %v1875_v45, %v1765_v48  ;;  %v2687_v8 = vadd.f32 %v7149_v34, %v7148_v16  ;;  %v2250_v24 = vadd.f32 %v2249_v57, %v6120_v2  ;;  %v2296_v50 = vadd.f32 %v2295_v3, %v2193_v51  ;;  %v7158_v57 = vld [vmem:[#allocation97_spill] sm:$0xff]  ;;  %v7159_v13 = vld [vmem:[#allocation92_spill] sm:$0xff] }
 0x2b7   : > { %v1767_v9 = vsel %vm1607_vm10, %v3680_v18, 0.0  ;;  %v2733_v5 = vadd.f32 %v7151_v49, %v7150_v59  ;;  %vm7153_vm15 = vcmp.eq.s32.totalorder %v7152_v12, %v5445_v35  ;;  %vm7155_vm9 = vcmp.eq.s32.totalorder %v7154_v30, %v5445_v35  ;;  %v7163_v34 = vld [vmem:[#allocation16_spill] sm:$0xff]  ;;  %v6298_v49 = vpop.permute.xlu1 %2107 }
 0x2b8   : > { %v2195_v7 = vsel %vm7153_vm15, %v5971_v58, 0.0  ;;  %v2197_v2 = vsel %vm7155_vm9, %v5989_v14, 0.0  ;;  %v1831_v4 = vadd.f32 %v1830_v54, %v7156_v39  ;;  %v1877_v15 = vadd.f32 %v1876_v20, %v1767_v9  ;;  %v3682_v20 = vld [vmem:[%s4178_s16 + $0x108] sm:$0xff]  ;;  %v3683_v9 = vld [vmem:[%s4178_s16 + $0x118] sm:$0xff] }
 0x2b9   : > { %vm1644_vm10 = vcmp.eq.s32.totalorder %v7157_v33, %v5593_v10  ;;  %v2251_v61 = vadd.f32 %v2250_v24, %v6131_v29  ;;  %v2297_v51 = vadd.f32 %v2296_v50, %v2195_v7  ;;  %v2646_v27 = vmul.f32 1.442695, %v2490_v41  ;;  %v7160_v41 = vld [vmem:[#allocation93_spill] sm:$0xff]  ;;  %v7165_v24 = vld [vmem:[#allocation98_spill] sm:$0xff] }
 0x2ba   : > { %v1769_v58 = vsel %vm1609_vm3, %v3681_v23, 0.0  ;;  %v2648_v45 = vmul.f32 1.442695, %v2491_v55  ;;  %v1832_v3 = vadd.f32 %v1831_v4, %v7158_v57  ;;  %v2688_v48 = vadd.f32 %v7159_v13, %v2687_v8  ;;  %v6312_v23 = vpop.permute.xlu2 %2112  ;;  %v7172_v57 = vld [vmem:[#allocation43_spill] sm:$0xff]  ;;  %v7175_v13 = vld [vmem:[#allocation66_spill] sm:$0xff] }
 0x2bb   : > { %v1878_v14 = vadd.f32 %v1877_v15, %v1769_v58  ;;  %v2252_v36 = vadd.f32 %v2251_v61, %v6141_v52  ;;  %v2298_v54 = vadd.f32 %v2297_v51, %v2197_v2  ;;  %v1771_v29 = vsel %vm1611_vm4, %v3682_v20, 0.0  ;;  %v7168_v2 = vld [vmem:[#allocation96_spill] sm:$0xff]  ;;  %v3684_v15 = vld [vmem:[%s4178_s16 + $0x128] sm:$0xff]  ;;  %v7169_v61 = vld [vmem:[#allocation27_spill] sm:$0xff] }
 0x2bc   : > { %v2734_v16 = vadd.f32 %v7160_v41, %v2733_v5  ;;  %vm7162_vm3 = vcmp.eq.s32.totalorder %v7161_v22, %v5445_v35  ;;  %vm7164_vm0 = vcmp.eq.s32.totalorder %v7163_v34, %v5445_v35  ;;  %v1833_v52 = vadd.f32 %v1832_v3, %v7165_v24  ;;  %v7170_v58 = vld [vmem:[#allocation52_spill] sm:$0xff]  ;;  %v7179_v41 = vld [vmem:[#allocation70_spill] sm:$0xff] }
 0x2bd   : > { %v2199_v55 = vsel %vm7162_vm3, %v5996_v17, 0.0  ;;  %v2201_v8 = vsel %vm7164_vm0, %v6076_v1, 0.0  ;;  %v1879_v50 = vadd.f32 %v1878_v14, %v1771_v29  ;;  %v2253_v18 = vadd.f32 %v2252_v36, %v6152_v62  ;;  %v7166_v17 = vld [vmem:[#allocation63_spill] sm:$0xff]  ;;  %v7174_v3 = vld [vmem:[#allocation100_spill] sm:$0xff] }
 0x2be   : > { %v2299_v6 = vadd.f32 %v2298_v54, %v2199_v55  ;;  %3598 = vpow2.f32 %v2646_v27  ;;  %v1773_v59 = vsel %vm1613_vm6, %v3683_v9, 0.0  ;;  %vm1646_vm4 = vcmp.eq.s32.totalorder %v7166_v17, %v5593_v10  ;;  %v7167_v1 = vld [vmem:[#allocation99_spill] sm:$0xff]  ;;  %v6310_v27 = vpop.permute.xlu0 %2117  ;;  %v3685_v29 = vld [vmem:[%s4178_s16 + $0x138] sm:$0xff]  ;;  %v3686_v9 = vld [vmem:[%s4178_s16 + $0x148] sm:$0xff] }
 0x2bf   : > { %3600 = vpow2.f32 %v2648_v45  ;;  %v1834_v5 = vadd.f32 %v1833_v52, %v7167_v1  ;;  %v1880_v7 = vadd.f32 %v1879_v50, %v1773_v59  ;;  %v2689_v39 = vadd.f32 %v7168_v2, %v2688_v48  ;;  %v7176_v48 = vld [vmem:[#allocation57_spill] sm:$0xff]  ;;  %v7185_v1 = vld [vmem:[#allocation28_spill] sm:$0xff]  ;;  %v7186_v2 = vld [vmem:[#allocation47_spill] sm:$0xff] }
 0x2c0   : > { %v2254_v62 = vadd.f32 %v2253_v18, %v6162_v46  ;;  %v2300_v4 = vadd.f32 %v2299_v6, %v2201_v8  ;;  %v1775_v53 = vsel %vm1615_vm14, %v3684_v15, 0.0  ;;  %v2735_v51 = vadd.f32 %v7169_v61, %v2734_v16  ;;  %v7180_v16 = vld [vmem:[#allocation44_spill] sm:$0xff]  ;;  %v7182_v8 = vld [vmem:[#allocation101_spill] sm:$0xff] }
 0x2c1   : > { %vm7171_vm6 = vcmp.eq.s32.totalorder %v7170_v58, %v5593_v10  ;;  %vm7173_vm13 = vcmp.eq.s32.totalorder %v7172_v57, %v5445_v35  ;;  %v1835_v14 = vadd.f32 %v1834_v5, %v7174_v3  ;;  %v1881_v44 = vadd.f32 %v1880_v7, %v1775_v53  ;;  %v7183_v50 = vld [vmem:[#allocation33_spill] sm:$0xff]  ;;  %v7193_v3 = vld [vmem:[#allocation103_spill] sm:$0xff] }
 0x2c2   : > { %v2212_v45 = vsel %vm7171_vm6, %v6298_v49, 0.0  ;;  %v2203_v46 = vsel %vm7173_vm13, %v6087_v0, 0.0  ;;  %vm1648_vm14 = vcmp.eq.s32.totalorder %v7175_v13, %v5593_v10  ;;  %vm7177_vm2 = vcmp.eq.s32.totalorder %v7176_v48, %v5593_v10  ;;  %v7189_v15 = vld [vmem:[#allocation49_spill] sm:$0xff] }
 0x2c3   : > { %v6329_v36 = vsel %vm7177_vm2, %v6312_v23, 0.0  ;;  %v2255_v54 = vadd.f32 %v2254_v62, %v6173_v28  ;;  %v2301_v20 = vadd.f32 %v2300_v4, %v2203_v46  ;;  %v1777_v0 = vsel %vm7178_vm1, %v3685_v29, 0.0  ;;  %v3688_v46 = vld [vmem:[%s4178_s16 + $0x168] sm:$0xff] }
 0x2c4   : > { %vm1650_vm12 = vcmp.eq.s32.totalorder %v7179_v41, %v5593_v10  ;;  %vm7181_vm11 = vcmp.eq.s32.totalorder %v7180_v16, %v5445_v35  ;;  %v1836_v24 = vadd.f32 %v1835_v14, %v7182_v8  ;;  %v1882_v52 = vadd.f32 %v1881_v44, %v1777_v0  ;;  %v3599_v18 = vpop.eup %3598  ;;  %v2123_v0 = vpop.permute.xlu1 %2122 }
 0x2c5   : > { %v2205_v55 = vsel %vm7181_vm11, %v6097_v40, 0.0  ;;  %v2690_v28 = vadd.f32 %v7183_v50, %v2689_v39  ;;  %v2256_v6 = vadd.f32 %v2255_v54, %v6185_v19  ;;  %v1779_v59 = vsel %vm7184_vm8, %v3686_v9, 0.0  ;;  %v3601_v7 = vpop.eup %3600  ;;  %v7188_v19 = vld [vmem:[#allocation102_spill] sm:$0xff] }
 0x2c6   : > { %v2302_v11 = vadd.f32 %v2301_v20, %v2205_v55  ;;  %v2736_v5 = vadd.f32 %v7185_v1, %v2735_v51  ;;  %v2216_v40 = vsel %vm1644_vm10, %v6310_v27, 0.0  ;;  %vm7187_vm7 = vcmp.eq.s32.totalorder %v7186_v2, %v5445_v35  ;;  %v3687_v51 = vld [vmem:[%s4178_s16 + $0x158] sm:$0xff]  ;;  %v2133_v9 = vpop.permute.xlu0 %2132 }
 0x2c7   : > { %v2207_v39 = vsel %vm7187_vm7, %v6179_v56, 0.0  ;;  %v1837_v62 = vadd.f32 %v1836_v24, %v7188_v19  ;;  %v1883_v4 = vadd.f32 %v1882_v52, %v1779_v59  ;;  %vm7190_vm5 = vcmp.eq.s32.totalorder %v7189_v15, %v5445_v35  ;;  %v7199_v52 = vld [vmem:[#allocation4_spill] sm:$0xff]  ;;  %v7203_v59 = vld [vmem:[#allocation75_spill] sm:$0xff] }
 0x2c8   : > { %v2209_v47 = vsel %vm7190_vm5, %v6192_v37, 0.0  ;;  %v2257_v53 = vadd.f32 %v2256_v6, %v6198_v25  ;;  %v2303_v61 = vadd.f32 %v2302_v11, %v2207_v39  ;;  %vm7191_vm15 = vcmp.eq.s32.totalorder %v7142_v60, %v5445_v35  ;;  %v7194_v25 = vld [vmem:[#allocation34_spill] sm:$0xff]  ;;  %v7196_v60 = vld [vmem:[#allocation51_spill] sm:$0xff]  ;;  %v3689_v11 = vld [vmem:[%s4178_s16 + $0x178] sm:$0xff] }
 0x2c9   : > { %v1781_v58 = vsel %vm7191_vm15, %v3687_v51, 0.0  ;;  %vm7192_vm9 = vcmp.eq.s32.totalorder %v7152_v12, %v5445_v35  ;;  %v1838_v14 = vadd.f32 %v1837_v62, %v7193_v3  ;;  %v2691_v48 = vadd.f32 %v3599_v18, %v2690_v28  ;;  %v7198_v12 = vld [vmem:[#allocation17_spill] sm:$0xff]  ;;  %v7201_v28 = vld [vmem:[#allocation74_spill] sm:$0xff]  ;;  %v7204_v1 = vld [vmem:[#allocation24_spill] sm:$0xff]  ;;  %v2128_v62 = vpop.permute.xlu2 %2127 }
 0x2ca   : > { %v1783_v56 = vsel %vm7192_vm9, %v3688_v46, 0.0  ;;  %v1884_v44 = vadd.f32 %v1883_v4, %v1781_v58  ;;  %v2258_v37 = vadd.f32 %v2257_v53, %v6210_v26  ;;  %v2304_v54 = vadd.f32 %v2303_v61, %v2209_v47  ;;  %v3690_v53 = vld [vmem:[%s4178_s16 + $0x188] sm:$0xff]  ;;  %v7210_v46 = vld [vmem:[#allocation105_spill] sm:$0xff] }
 0x2cb   : > { %vm7195_vm3 = vcmask 1040384   ;;  %v2737_v29 = vadd.f32 %v3601_v7, %v2736_v5  ;;  %vm7197_vm0 = vcmp.eq.s32.totalorder %v7196_v60, %v5445_v35  ;;  %v1839_v8 = vadd.f32 %v1838_v14, %v7198_v12  ;;  %v7206_v7 = vld [vmem:[#allocation104_spill] sm:$0xff] }
 0x2cc   : > { %v2692_v20 = vsel %vm7195_vm3, %v7194_v25, 0.0  ;;  %v2211_v55 = vsel %vm7197_vm0, %v6204_v31, 0.0  ;;  %v1885_v24 = vadd.f32 %v1884_v44, %v1783_v56  ;;  %vm7200_vm6 = vmmov %vm7195_vm3  ;;  %vm1652_vm13 = vcmp.eq.s32.totalorder %v7201_v28, %v5593_v10  ;;  %v3691_v44 = vld [vmem:[%s4178_s16 + $0x198] sm:$0xff] }
 0x2cd   : > { %v2738_v50 = vsel %vm7200_vm6, %v7199_v52, 0.0  ;;  %v2218_v26 = vsel %vm1646_vm4, %v2123_v0, 0.0  ;;  %v2259_v18 = vadd.f32 %v2258_v37, %v6221_v42  ;;  %v2305_v6 = vadd.f32 %v2304_v54, %v2211_v55  ;;  %v7212_v37 = vld [vmem:[#allocation62_spill] sm:$0xff]  ;;  %v7217_v52 = vld [vmem:[#allocation64_spill] sm:$0xff] }
 0x2ce   : > { %vm7202_vm2 = vcmp.eq.s32.totalorder %v7154_v30, %v5445_v35  ;;  %vm1656_vm1 = vcmp.eq.s32.totalorder %v7203_v59, %v5593_v10  ;;  %vm7205_vm11 = vcmp.eq.s32.totalorder %v7204_v1, %v5445_v35  ;;  %v1840_v39 = vadd.f32 %v1839_v8, %v7206_v7  ;;  %v7214_v54 = vld [vmem:[#allocation106_spill] sm:$0xff] }
 0x2cf   : > { %v1785_v31 = vsel %vm7202_vm2, %v3689_v11, 0.0  ;;  %v2213_v5 = vsel %vm7205_vm11, %v6298_v49, 0.0  ;;  %v2693_v42 = vadd.f32 %v2692_v20, %v2691_v48  ;;  %v2260_v4 = vadd.f32 %v2259_v18, %v2212_v45  ;;  %v7208_v49 = vld [vmem:[#allocation58_spill] sm:$0xff]  ;;  %v7220_v11 = vld [vmem:[#allocation68_spill] sm:$0xff] }
 0x2d0   : > { %v1886_v19 = vadd.f32 %v1885_v24, %v1785_v31  ;;  %v2306_v47 = vadd.f32 %v2305_v6, %v2213_v5  ;;  %vm7207_vm8 = vcmp.eq.s32.totalorder %v7161_v22, %v5445_v35  ;;  %v2739_v61 = vadd.f32 %v2738_v50, %v2737_v29  ;;  %v3692_v8 = vld [vmem:[%s4178_s16 + $0x1a8] sm:$0xff]  ;;  %v7219_v50 = vld [vmem:[#allocation21_spill] sm:$0xff] }
 0x2d1   : > { %v1787_v30 = vsel %vm7207_vm8, %v3690_v53, 0.0  ;;  %v2220_v51 = vsel %vm1648_vm14, %v2128_v62, 0.0  ;;  %vm7209_vm7 = vcmp.eq.s32.totalorder %v7208_v49, %v5445_v35  ;;  %v1841_v56 = vadd.f32 %v1840_v39, %v7210_v46  ;;  %v7223_v39 = vld [vmem:[#allocation71_spill] sm:$0xff] }
 0x2d2   : > { %v2215_v58 = vsel %vm7209_vm7, %v6312_v23, 0.0  ;;  %v1887_v45 = vadd.f32 %v1886_v19, %v1787_v30  ;;  %v2222_v3 = vsel %vm1650_vm12, %v2133_v9, 0.0  ;;  %v2261_v22 = vadd.f32 %v2260_v4, %v6329_v36  ;;  %v7225_v4 = vld [vmem:[#allocation39_spill] sm:$0xff]  ;;  %v2138_v30 = vpop.permute.xlu1 %2137 }
 0x2d3   : > { %v2307_v14 = vadd.f32 %v2306_v47, %v2215_v58  ;;  %vm7211_vm5 = vcmp.eq.s32.totalorder %v7163_v34, %v5445_v35  ;;  %vm7213_vm15 = vcmp.eq.s32.totalorder %v7212_v37, %v5445_v35  ;;  %v1842_v25 = vadd.f32 %v1841_v56, %v7214_v54  ;;  %v7216_v34 = vld [vmem:[#allocation77_spill] sm:$0xff] }
 0x2d4   : > { %v1789_v48 = vsel %vm7211_vm5, %v3691_v44, 0.0  ;;  %v2217_v23 = vsel %vm7213_vm15, %v6310_v27, 0.0  ;;  %v2694_v29 = vrot.slane %v2693_v42, 4  ;;  %v2262_v55 = vadd.f32 %v2261_v22, %v2216_v40  ;;  %v7231_v54 = vld [vmem:[#allocation25_spill] sm:$0xff] }
 0x2d5   : > { %v1888_v20 = vadd.f32 %v1887_v45, %v1789_v48  ;;  %v2308_v12 = vadd.f32 %v2307_v14, %v2217_v23  ;;  %vm7215_vm9 = vcmp.eq.s32.totalorder %v7172_v57, %v5445_v35  ;;  %v2740_v24 = vrot.slane %v2739_v61, 4  ;;  %v3693_v57 = vld [vmem:[%s4178_s16 + $0x1b8] sm:$0xff] }
 0x2d6   : > { %v1791_v36 = vsel %vm7215_vm9, %v3692_v8, 0.0  ;;  %vm1654_vm3 = vcmp.eq.s32.totalorder %v7216_v34, %v5593_v10  ;;  %vm7218_vm0 = vcmp.eq.s32.totalorder %v7217_v52, %v5445_v35  ;;  %v1843_v18 = vadd.f32 %v1842_v25, %v7219_v50  ;;  %v2143_v8 = vpop.permute.xlu2 %2142 }
 0x2d7   : > { %v2219_v27 = vsel %vm7218_vm0, %v2123_v0, 0.0  ;;  %v1889_v6 = vadd.f32 %v1888_v20, %v1791_v36  ;;  %vm7221_vm6 = vcmp.eq.s32.totalorder %v7220_v11, %v5445_v35  ;;  %v2263_v31 = vadd.f32 %v2262_v55, %v2218_v26  ;;  %v7233_v20 = vld [vmem:[#allocation23_spill] sm:$0xff] }
 0x2d8   : > { %v2221_v40 = vsel %vm7221_vm6, %v2128_v62, 0.0  ;;  %v2309_v5 = vadd.f32 %v2308_v12, %v2219_v27  ;;  %vm7222_vm2 = vcmp.eq.s32.totalorder %v7180_v16, %v5445_v35  ;;  %vm7224_vm11 = vcmp.eq.s32.totalorder %v7223_v39, %v5445_v35  ;;  %v3694_v62 = vld [vmem:[%s4178_s16 + $0x1c8] sm:$0xff]  ;;  %v2148_v16 = vpop.permute.xlu0 %2147 }
 0x2d9   : > { %v1793_v7 = vsel %vm7222_vm2, %v3693_v57, 0.0  ;;  %v2223_v19 = vsel %vm7224_vm11, %v2133_v9, 0.0  ;;  %v1844_v0 = vadd.f32 %v1843_v18, %v7225_v4  ;;  %v2695_v53 = vadd.f32 %v2694_v29, %v2693_v42  ;;  %v7227_v9 = vld [vmem:[#allocation76_spill] sm:$0xff]  ;;  %v7229_v42 = vld [vmem:[#allocation78_spill] sm:$0xff]  ;;  %v7235_v18 = vld [vmem:[#allocation79_spill] sm:$0xff] }
 0x2da   : > { %v1890_v47 = vadd.f32 %v1889_v6, %v1793_v7  ;;  %v2264_v58 = vadd.f32 %v2263_v31, %v2220_v51  ;;  %v2310_v46 = vadd.f32 %v2309_v5, %v2221_v40  ;;  %vm7226_vm8 = vcmp.eq.s32.totalorder %v7186_v2, %v5445_v35  ;;  %v3696_v27 = vld [vmem:[%s4178_s16 + $0x1e8] sm:$0xff]  ;;  %v3697_v4 = vld [vmem:[%s4178_s16 + $0x1f8] sm:$0xff] }
 0x2db   : > { %v1795_v26 = vsel %vm7226_vm8, %v3694_v62, 0.0  ;;  %v2741_v56 = vadd.f32 %v2740_v24, %v2739_v61  ;;  %v2224_v45 = vsel %vm1652_vm13, %v2138_v30, 0.0  ;;  %vm7228_vm7 = vcmp.eq.s32.totalorder %v7227_v9, %v5445_v35  ;;  %v3695_v61 = vld [vmem:[%s4178_s16 + $0x1d8] sm:$0xff]  ;;  %v7237_v40 = vld [vmem:[#allocation14_spill] sm:$0xff] }
 0x2dc   : > { %v2225_v22 = vsel %vm7228_vm7, %v2138_v30, 0.0  ;;  %v1845_v14 = vadd.f32 %v1844_v0, %v7229_v42  ;;  %v1891_v51 = vadd.f32 %v1890_v47, %v1795_v26  ;;  %v2228_v44 = vsel %vm1656_vm1, %v2148_v16, 0.0  ;;  %v7241_v47 = vld [vmem:[#allocation13_spill] sm:$0xff]  ;;  %v7243_v42 = vld [vmem:[#allocation80_spill] sm:$0xff] }
 0x2dd   : > { %v2265_v2 = vadd.f32 %v2264_v58, %v2222_v3  ;;  %v2311_v48 = vadd.f32 %v2310_v46, %v2223_v19  ;;  %vm7230_vm5 = vcmp.eq.s32.totalorder %v7189_v15, %v5445_v35  ;;  %vm7232_vm15 = vcmp.eq.s32.totalorder %v7231_v54, %v5445_v35 }
 0x2de   : > { %v1797_v23 = vsel %vm7230_vm5, %v3695_v61, 0.0  ;;  %v2229_v25 = vsel %vm7232_vm15, %v2148_v16, 0.0  ;;  %v1846_v29 = vadd.f32 %v1845_v14, %v7233_v20  ;;  %v2696_v12 = vrot.slane %v2695_v53, 2  ;;  %v3698_v16 = vld [vmem:[%s4178_s16 + $0x208] sm:$0xff] }
 0x2df   : > { %v1892_v55 = vadd.f32 %v1891_v51, %v1797_v23  ;;  %v2266_v36 = vadd.f32 %v2265_v2, %v2224_v45  ;;  %v2312_v24 = vadd.f32 %v2311_v48, %v2225_v22  ;;  %vm7234_vm9 = vcmp.eq.s32.totalorder %v7196_v60, %v5445_v35  ;;  %v7245_v61 = vld [vmem:[#allocation86_spill] sm:$0xff]  ;;  %v7247_v23 = vld [vmem:[#allocation29_spill] sm:$0xff] }
 0x2e0   : > { %v1799_v3 = vsel %vm7234_vm9, %v3696_v27, 0.0  ;;  %v2742_v50 = vrot.slane %v2741_v56, 2  ;;  %v2226_v15 = vsel %vm1654_vm3, %v2143_v8, 0.0  ;;  %vm7236_vm0 = vcmp.eq.s32.totalorder %v7235_v18, %v5445_v35 }
 0x2e1   : > { %v2227_v6 = vsel %vm7236_vm0, %v2143_v8, 0.0  ;;  %v1847_v31 = vadd.f32 %v1846_v29, %v7237_v40  ;;  %v1893_v5 = vadd.f32 %v1892_v55, %v1799_v3  ;;  %v2267_v57 = vadd.f32 %v2266_v36, %v2226_v15 }
 0x2e2   : > { %vm7238_vm6 = vcmask 1040384   ;;  %v2313_v19 = vadd.f32 %v2312_v24, %v2227_v6  ;;  %vm7239_vm2 = vcmp.eq.s32.totalorder %v7204_v1, %v5445_v35  ;;  %v2697_v46 = vadd.f32 %v2696_v12, %v2695_v53  ;;  %v7248_v12 = vld [vmem:[#allocation35_spill] sm:$0xff] }
 0x2e3   : > { %v2268_v7 = vsel %vm7238_vm6, %v2228_v44, 0.0  ;;  %v1801_v60 = vsel %vm7239_vm2, %v3697_v4, 0.0  ;;  %vm7240_vm11 = vmmov %vm7238_vm6  ;;  %v1848_v30 = vadd.f32 %v1847_v31, %v7241_v47  ;;  %vm7242_vm8 = vcmp.eq.s32.totalorder %v7208_v49, %v5445_v35  ;;  %v7244_v44 = vld [vmem:[#allocation84_spill] sm:$0xff]  ;;  %v7253_v6 = vld [vmem:[#allocation19_spill] sm:$0xff] }
 0x2e4   : > { %v2314_v0 = vsel %vm7240_vm11, %v2229_v25, 0.0  ;;  %v1894_v58 = vadd.f32 %v1893_v5, %v1801_v60  ;;  %v2269_v62 = vadd.f32 %v2268_v7, %v2267_v57  ;;  %v1803_v45 = vsel %vm7242_vm8, %v3698_v16, 0.0  ;;  %v7256_v60 = vld [vmem:[#allocation88_spill] sm:$0xff] }
 0x2e5   : > { %v2315_v26 = vadd.f32 %v2314_v0, %v2313_v19  ;;  %v2743_v22 = vadd.f32 %v2742_v50, %v2741_v56  ;;  %v1849_v14 = vadd.f32 %v1848_v30, %v7243_v42  ;;  %v1804_v1 = vsel %vm1644_vm10, %v7244_v44, 0.0  ;;  %v7251_v50 = vld [vmem:[#allocation36_spill] sm:$0xff]  ;;  %v7257_v0 = vld [vmem:[#allocation89_spill] sm:$0xff] }
 0x2e6   : > { %v1895_v51 = vadd.f32 %v1894_v58, %v1803_v45  ;;  %v2270_v2 = vrot.slane %v2269_v62, 4  ;;  %vm7246_vm7 = vcmp.eq.s32.totalorder %v7212_v37, %v5445_v35  ;;  %v1806_v49 = vsel %vm1646_vm4, %v7247_v23, 0.0  ;;  %v7250_v37 = vld [vmem:[#allocation30_spill] sm:$0xff]  ;;  %v7254_v19 = vld [vmem:[#allocation8_spill] sm:$0xff]  ;;  %v7259_v58 = vld [vmem:[#allocation9_spill] sm:$0xff] }
 0x2e7   : > { %v2316_v48 = vrot.slane %v2315_v26, 4  ;;  %v1805_v53 = vsel %vm7246_vm7, %v7245_v61, 0.0  ;;  %v1850_v56 = vadd.f32 %v1849_v14, %v1804_v1  ;;  %v2698_v20 = vrot.slane %v2697_v46, 1 }
 0x2e8   : > { %v1896_v25 = vadd.f32 %v1895_v51, %v1805_v53  ;;  %v2271_v29 = vadd.f32 %v2270_v2, %v2269_v62  ;;  %vm7249_vm10 = vcmp.eq.s32.totalorder %v7217_v52, %v5445_v35  ;;  %v2744_v8 = vrot.slane %v2743_v22, 1 }
 0x2e9   : > { %v2317_v55 = vadd.f32 %v2316_v48, %v2315_v26  ;;  %v1807_v33 = vsel %vm7249_vm10, %v7248_v12, 0.0  ;;  %v1851_v36 = vadd.f32 %v1850_v56, %v1806_v49  ;;  %v1808_v27 = vsel %vm1648_vm14, %v7250_v37, 0.0  ;;  %v7260_v26 = vld [vmem:[#allocation87_spill] sm:$0xff] }
 0x2ea   : > { %v1897_v24 = vadd.f32 %v1896_v25, %v1807_v33  ;;  %v2272_v17 = vrot.slane %v2271_v29, 2  ;;  %vm7252_vm4 = vcmp.eq.s32.totalorder %v7220_v11, %v5445_v35  ;;  %v1810_v52 = vsel %vm1650_vm12, %v7253_v6, 0.0  ;;  %vm7258_vm12 = vmmov %vm7232_vm15 }
 0x2eb   : > { %v2318_v3 = vrot.slane %v2317_v55, 2  ;;  %v1809_v15 = vsel %vm7252_vm4, %v7251_v50, 0.0  ;;  %v1852_v40 = vadd.f32 %v1851_v36, %v1808_v27  ;;  %v2699_v5 = vadd.f32 %v2698_v20, %v2697_v46 }
 0x2ec   : > { %v1898_v31 = vadd.f32 %v1897_v24, %v1809_v15  ;;  %v2273_v57 = vadd.f32 %v2272_v17, %v2271_v29  ;;  %vm7255_vm14 = vcmp.eq.s32.totalorder %v7223_v39, %v5445_v35  ;;  %v2745_v4 = vadd.f32 %v2744_v8, %v2743_v22 }
 0x2ed   : > { %v2319_v7 = vadd.f32 %v2318_v3, %v2317_v55  ;;  %v1811_v13 = vsel %vm7255_vm14, %v7254_v19, 0.0  ;;  %v1816_v11 = vsel %vm1656_vm1, %v7256_v60, 0.0  ;;  %v1817_v41 = vsel %vm7258_vm12, %v7257_v0, 0.0  ;;  %vm7263_vm1 = vmmov %vm7238_vm6 }
 0x2ee   : > { %v1853_v47 = vadd.f32 %v1852_v40, %v1810_v52  ;;  %v1899_v30 = vadd.f32 %v1898_v31, %v1811_v13  ;;  %v1812_v46 = vsel %vm1652_vm13, %v7259_v58, 0.0  ;;  %v2274_v39 = vrot.slane %v2273_v57, 1  ;;  %vm7262_vm13 = vmmov %vm7236_vm0 }
 0x2ef   : > { %v2320_v62 = vrot.slane %v2319_v7, 1  ;;  %vm7261_vm5 = vcmp.eq.s32.totalorder %v7227_v9, %v5445_v35  ;;  %v1814_v54 = vsel %vm1654_vm3, %v6237_v43, 0.0  ;;  %3602 = vlog2.f32 %v2699_v5  ;;  %vm7264_vm15 = vmmov %vm7263_vm1 }
 0x2f0   : > { %v1813_v59 = vsel %vm7261_vm5, %v7260_v26, 0.0  ;;  %v1854_v16 = vadd.f32 %v1853_v47, %v1812_v46  ;;  %v2275_v22 = vadd.f32 %v2274_v39, %v2273_v57  ;;  %v1815_v28 = vsel %vm7262_vm13, %v6246_v63, 0.0 }
 0x2f1   : > { %v1900_v45 = vadd.f32 %v1899_v30, %v1813_v59  ;;  %v2321_v42 = vadd.f32 %v2320_v62, %v2319_v7  ;;  %3604 = vlog2.f32 %v2745_v4  ;;  %v1856_v9 = vsel %vm7263_vm1, %v1816_v11, 0.0 }
 0x2f2   : > { %v1855_v14 = vadd.f32 %v1854_v16, %v1814_v54  ;;  %v1902_v44 = vsel %vm7264_vm15, %v1817_v41, 0.0  ;;  %v2763_v3 = vand.u32 127, %v7093_v32 }
 0x2f3   : > { %v1901_v51 = vadd.f32 %v1900_v45, %v1815_v28  ;;  %v2759_v1 = vadd.f32 %v2321_v42, %v2275_v22 }
 0x2f4   : > { %v1857_v10 = vadd.f32 %v1856_v9, %v1855_v14  ;;  %vm2764_vm3 = vcmp.eq.s32.totalorder %v2763_v3, 0 }
 0x2f5   : > { %v1903_v43 = vadd.f32 %v1902_v44, %v1901_v51  ;;  %2760 = vadd.xlane.f32.xlu2 %v2759_v1  ;;  %v3603_v34 = vpop.eup %3602 }
 0x2f6   : > { %v1858_v2 = vrot.slane %v1857_v10, 4  ;;  %v2747_v63 = vmul.f32 0.6931472, %v3603_v34 }
 0x2f7   : > { %v1904_v48 = vrot.slane %v1903_v43, 4  ;;  %v3605_v61 = vpop.eup %3604 }
 0x2f8   : > { %v1859_v53 = vadd.f32 %v1858_v2, %v1857_v10  ;;  %v2749_v18 = vmul.f32 0.6931472, %v3605_v61  ;;  %v2750_v55 = vadd.f32 %v2747_v63, %v7145_v21 }
 0x2f9   : > { %v1905_v23 = vadd.f32 %v1904_v48, %v1903_v43 }
 0x2fa   : > { %v1860_v49 = vrot.slane %v1859_v53, 2  ;;  %v2751_v12 = vadd.f32 %v2749_v18, %v7146_v38 }
 0x2fb   : > { %v1906_v35 = vrot.slane %v1905_v23, 2 }
 0x2fc   : > { %v1861_v56 = vadd.f32 %v1860_v49, %v1859_v53 }
 0x2fd   : > { %v1907_v25 = vadd.f32 %v1906_v35, %v1905_v23 }
 0x2fe   : > { %v1862_v20 = vrot.slane %v1861_v56, 1 }
 0x2ff   : > { %v1908_v29 = vrot.slane %v1907_v25, 1 }
 0x300   : > { %v1863_v33 = vadd.f32 %v1862_v20, %v1861_v56 }
 0x301   : > { %v1909_v8 = vadd.f32 %v1908_v29, %v1907_v25 }
 0x302   : > { %v2752_v36 = vsub.f32 %v2750_v55, %v1863_v33 }
 0x303   : > { %v2753_v24 = vsub.f32 %v2751_v12, %v1909_v8 }
 0x304   : > { %v2754_v37 = vmul.f32 %v2752_v36, %v2275_v22 }
 0x305   : > { %v2755_v27 = vmul.f32 %v2753_v24, %v2321_v42 }
 0x307   : > { %v2756_v17 = vadd.f32 %v2755_v27, %v2754_v37 }
 0x309   : > { %2757 = vadd.xlane.f32.xlu1 %v2756_v17 }
 0x368   : > { %v2761_v50 = vpop.xlane.xlu2 %2760 }
 0x369   : > { %v2767_v21 = vsel %vm2764_vm3, %v2761_v50, 0.0 }
 0x36a   : > { %2768 = vst [vmem:[%s397_s15 + $0x1] sm:$0x1] %v2767_v21 }
 0x37c   : > { %v2758_v38 = vpop.xlane.xlu1 %2757 }
 0x37d   : > { %v2765_v15 = vsel %vm2764_vm3, %v2758_v38, 0.0 }
 0x37e   : > { %2766 = vst [vmem:[%s397_s15] sm:$0x1] %v2765_v15 }
 0x37f PF: > { %s19_s29 = sadd.s32 1, %s3721_s29   ;;  %s7265_s27 = smov %s3717_s28 }
 0x380   : > { %p16_p5 = scmp.ge.s32.totalorder %s19_s29, 4   ;;  %s7266_s28 = smov %s7268_s30 }
 0x382   :  { %18 = sbr.rel (!%p16_p5) target bundleno = 2 (0x2), region = 93 }

</bundles_post_ra>
